<compile_context>
chip_gen: v7x
topology: tpu7x:2x2x1
jax: 0.10.0
libtpu: 0.0.40
codegen_flags: <defaults>
</compile_context>

<pallas_src>
import functools

import jax
import jax.numpy as jnp
from jax.experimental import pallas as pl
from jax.experimental.pallas import tpu as pltpu

FEAT = 4096                      # base_model output features (VGG fc7 width)
NUM_PARTIALS = 2                 # parallel split of the hidden reduction (v7x: 2 TCs)
_W1_SLAB_BUDGET = 24 * 1024 * 1024   # bytes for the double-buffered bf16 W1 slab
_VMEM_LIMIT_BYTES = 40 * 1024 * 1024


def _pick_tile_h(d_in, feat_per_partial):
    """Largest hidden tile (divisor of feat_per_partial, multiple of 128) whose
    double-buffered bf16 W1 slab fits the VMEM budget."""
    tile = feat_per_partial
    while tile > 128 and 2 * d_in * tile * 2 > _W1_SLAB_BUDGET:
        tile //= 2
    return tile


def _clsnet1_kernel(x_ref, w1_ref, b1_ref, w2_ref, b2_ref, o_ref, *, tile_h):
    """Fused relu(x @ W1 + b1) @ W2 (+ b2), hidden axis = (parallel half) x (streamed tile).

    Grid axis 0 ("parallel"): which half of the 4096-wide hidden axis this
    partial accumulator owns (megacore sharding on v7x).
    Grid axis 1 ("arbitrary"): streamed TILE_H slabs of W1 within that half;
    the output block index is constant along it, so o_ref stays VMEM-resident
    and acts as the accumulator.
    """
    p = pl.program_id(0)
    h = pl.program_id(1)
    n_h = pl.num_programs(1)

    @pl.when(h == 0)
    def _():
        # Partial 0 starts from the classifier bias, partial 1 from zero, so the
        # wrapper-side sum of partials already includes b2 exactly once.
        scale = (p == 0).astype(jnp.float32)
        o_ref[...] = jnp.broadcast_to(b2_ref[...], o_ref.shape) * scale

    # base_model stand-in slab: [B, d_in](bf16) @ [d_in, TILE_H](bf16) -> f32, +b1, ReLU
    feat = jnp.dot(x_ref[...], w1_ref[...], preferred_element_type=jnp.float32)
    feat = jnp.maximum(feat + b1_ref[...], 0.0)

    # classifier partial contraction against the VMEM-resident (padded) W2.
    start = pl.multiple_of((p * n_h + h) * tile_h, tile_h)
    w2_slab = w2_ref[pl.ds(start, tile_h), :]
    o_ref[...] += jnp.dot(feat.astype(w2_slab.dtype), w2_slab,
                          preferred_element_type=jnp.float32)


def clsnet1_forward(x_nchw, w1, b1, w2, b2):
    """x_nchw: [B, C, H, W] float32.  Returns logits [B, class_num] float32."""
    B = x_nchw.shape[0]
    x2d = x_nchw.reshape(B, -1).astype(jnp.bfloat16)     # torch .view(B, -1), bf16 feed
    d_in = x2d.shape[1]
    class_num = w2.shape[1]
    assert w1.shape == (d_in, FEAT) and w2.shape[0] == FEAT

    # Lane-dense padding of the tiny classifier (class_num << 128 lanes).
    c_pad = max(128, ((class_num + 127) // 128) * 128)
    w1_bf = w1.astype(jnp.bfloat16)
    b1_2d = b1.reshape(1, FEAT).astype(jnp.float32)
    w2_pad = jnp.zeros((FEAT, c_pad), jnp.bfloat16).at[:, :class_num].set(
        w2.astype(jnp.bfloat16))
    b2_pad = jnp.zeros((1, c_pad), jnp.float32).at[:, :class_num].set(
        b2.astype(jnp.float32))

    feat_per_part = FEAT // NUM_PARTIALS
    tile_h = _pick_tile_h(d_in, feat_per_part)
    n_h = feat_per_part // tile_h

    grid_spec = pltpu.PrefetchScalarGridSpec(
        num_scalar_prefetch=0,
        grid=(NUM_PARTIALS, n_h),
        in_specs=[
            pl.BlockSpec((B, d_in), lambda p, h: (0, 0)),              # x   (resident)
            pl.BlockSpec((d_in, tile_h), lambda p, h: (0, p * n_h + h)),  # W1 slab
            pl.BlockSpec((1, tile_h), lambda p, h: (0, p * n_h + h)),     # b1 slab
            pl.BlockSpec((FEAT, c_pad), lambda p, h: (0, 0)),          # W2  (resident)
            pl.BlockSpec((1, c_pad), lambda p, h: (0, 0)),             # b2  (resident)
        ],
        # One partial accumulator per parallel half; constant along the
        # reduction axis h -> stays VMEM-resident (no scratch needed).
        out_specs=pl.BlockSpec((None, B, c_pad), lambda p, h: (p, 0, 0)),
    )

    partials = pl.pallas_call(
        functools.partial(_clsnet1_kernel, tile_h=tile_h),
        out_shape=jax.ShapeDtypeStruct((NUM_PARTIALS, B, c_pad), jnp.float32),
        grid_spec=grid_spec,
        compiler_params=pltpu.CompilerParams(
            dimension_semantics=("parallel", "arbitrary"),
            vmem_limit_bytes=_VMEM_LIMIT_BYTES,
        ),
    )(x2d, w1_bf, b1_2d, w2_pad, b2_pad)

    # Tiny epilogue: sum the two parallel partials, drop lane padding.
    return partials.sum(axis=0)[:, :class_num]


if __name__ == "__main__":
    # Small shapes consistent with the module's forward contract.
    B, C, H, W = 2, 4, 16, 16          # NCHW input
    D_IN = C * H * W                   # 1024 flattened features
    CLASS_NUM = 5                      # e.g. Big-Five personality traits

    key = jax.random.PRNGKey(0)
    k_x, k_w1, k_b1, k_w2, k_b2 = jax.random.split(key, 5)

    x = jax.random.normal(k_x, (B, C, H, W), dtype=jnp.float32)

    # Deterministic synthetic parameters (scaled like torch default init).
    w1 = jax.random.normal(k_w1, (D_IN, FEAT), dtype=jnp.float32) * (1.0 / jnp.sqrt(D_IN))
    b1 = jax.random.normal(k_b1, (FEAT,), dtype=jnp.float32) * 0.01
    w2 = jax.random.normal(k_w2, (FEAT, CLASS_NUM), dtype=jnp.float32) * (1.0 / jnp.sqrt(FEAT))
    b2 = jax.random.normal(k_b2, (CLASS_NUM,), dtype=jnp.float32) * 0.01

    out = clsnet1_forward(x, w1, b1, w2, b2)
    out = jax.block_until_ready(out)

    # Reference with the same bf16 quantization of inputs/weights, f32 math.
    x2d = x.reshape(B, -1)
    x_q = x2d.astype(jnp.bfloat16).astype(jnp.float32)
    w1_q = w1.astype(jnp.bfloat16).astype(jnp.float32)
    w2_q = w2.astype(jnp.bfloat16).astype(jnp.float32)
    feat_ref = jnp.maximum(x_q @ w1_q + b1, 0.0)
    ref = feat_ref.astype(jnp.bfloat16).astype(jnp.float32) @ w2_q + b2

    assert out.shape == (B, CLASS_NUM)
    assert jnp.allclose(out, ref, atol=3e-2, rtol=3e-2), "mismatch vs reference"

    print("KERNEL_OK")
</pallas_src>

<mosaic_0001>
module attributes {stable_mosaic.version = 11 : i64} {
  func.func @_clsnet1_kernel(%arg0: i32, %arg1: i32, %arg2: memref<2x1024xbf16, #tpu.memory_space<vmem>>, %arg3: memref<1024x2048xbf16, #tpu.memory_space<vmem>>, %arg4: memref<1x2048xf32, #tpu.memory_space<vmem>>, %arg5: memref<4096x128xbf16, #tpu.memory_space<vmem>>, %arg6: memref<1x128xf32, #tpu.memory_space<vmem>>, %arg7: memref<1x2x128xf32, #tpu.memory_space<vmem>>) attributes {dimension_semantics = [#tpu.dimension_semantics<parallel>, #tpu.dimension_semantics<arbitrary>], iteration_bounds = array<i64: 2, 1>, scalar_prefetch = 0 : i64, scratch_operands = 0 : i64, tpu.core_type = #tpu.core_type<tc>, window_params = [{pipeline_mode = #tpu.pipeline_mode<synchronous>, transform_indices = @transform_0, window_bounds = array<i64: 2, 1024>}, {transform_indices = @transform_1, window_bounds = array<i64: 1024, 2048>}, {transform_indices = @transform_2, window_bounds = array<i64: 1, 2048>}, {pipeline_mode = #tpu.pipeline_mode<synchronous>, transform_indices = @transform_3, window_bounds = array<i64: 4096, 128>}, {pipeline_mode = #tpu.pipeline_mode<synchronous>, transform_indices = @transform_4, window_bounds = array<i64: 1, 128>}, {transform_indices = @transform_5, window_bounds = array<i64: 1, 2, 128>}]} {
    %c0_i32 = arith.constant 0 : i32
    %0 = arith.cmpi eq, %arg1, %c0_i32 : i32
    %1 = arith.extui %0 : i1 to i32
    %c0_i32_0 = arith.constant 0 : i32
    %2 = arith.cmpi ne, %1, %c0_i32_0 : i32
    scf.if %2 {
      %c0_i32_15 = arith.constant 0 : i32
      %25 = arith.cmpi eq, %arg0, %c0_i32_15 : i32
      %26 = arith.extui %25 : i1 to i32
      %27 = arith.sitofp %26 : i32 to f32
      %c0_16 = arith.constant 0 : index
      %c0_17 = arith.constant 0 : index
      %28 = vector.load %arg6[%c0_16, %c0_17] : memref<1x128xf32, #tpu.memory_space<vmem>>, vector<1x128xf32>
      %29 = vector.shape_cast %28 : vector<1x128xf32> to vector<1x128xf32>
      %30 = vector.broadcast %29 : vector<1x128xf32> to vector<2x128xf32>
      %31 = vector.broadcast %27 : f32 to vector<2x128xf32>
      %32 = arith.mulf %30, %31 : vector<2x128xf32>
      %c0_18 = arith.constant 0 : index
      %c0_19 = arith.constant 0 : index
      %c0_20 = arith.constant 0 : index
      %33 = vector.load %arg7[%c0_18, %c0_19, %c0_20] : memref<1x2x128xf32, #tpu.memory_space<vmem>>, vector<1x2x128xf32>
      %34 = vector.shape_cast %33 : vector<1x2x128xf32> to vector<2x128xf32>
      %35 = vector.shape_cast %32 : vector<2x128xf32> to vector<1x2x128xf32>
      tpu.vector_store %arg7[%c0_18, %c0_19, %c0_20], %35 {strides = array<i32>} : memref<1x2x128xf32, #tpu.memory_space<vmem>>, vector<1x2x128xf32>,
    } else {
    }
    %c0 = arith.constant 0 : index
    %c0_1 = arith.constant 0 : index
    %3 = vector.load %arg2[%c0, %c0_1] : memref<2x1024xbf16, #tpu.memory_space<vmem>>, vector<2x1024xbf16>
    %c0_2 = arith.constant 0 : index
    %c0_3 = arith.constant 0 : index
    %4 = vector.load %arg3[%c0_2, %c0_3] : memref<1024x2048xbf16, #tpu.memory_space<vmem>>, vector<1024x2048xbf16>
    %cst = arith.constant dense<0.000000e+00> : vector<2x2048xf32>
    %5 = tpu.matmul %3, %4, %cst {dimension_numbers = #tpu.dot_dimension_numbers<[1], [0], [0], [1], [0, 0, 1, 1], [], []>} : vector<2x1024xbf16>, vector<1024x2048xbf16>, vector<2x2048xf32> -> vector<2x2048xf32>
    %c0_4 = arith.constant 0 : index
    %c0_5 = arith.constant 0 : index
    %6 = vector.load %arg4[%c0_4, %c0_5] : memref<1x2048xf32, #tpu.memory_space<vmem>>, vector<1x2048xf32>
    %7 = vector.broadcast %6 : vector<1x2048xf32> to vector<2x2048xf32>
    %8 = arith.addf %5, %7 : vector<2x2048xf32>
    %cst_6 = arith.constant 0.000000e+00 : f32
    %9 = vector.broadcast %cst_6 : f32 to vector<2x2048xf32>
    %10 = arith.maximumf %8, %9 : vector<2x2048xf32>
    %c1_i32 = arith.constant 1 : i32
    %11 = arith.muli %arg0, %c1_i32 : i32
    %12 = arith.addi %11, %arg1 : i32
    %c2048_i32 = arith.constant 2048 : i32
    %13 = arith.muli %12, %c2048_i32 : i32
    %14 = tpu.assume_multiple %13, 2048 : i32
    %15 = arith.index_cast %14 : i32 to index
    %c0_7 = arith.constant 0 : index
    %16 = vector.load %arg5[%15, %c0_7] : memref<4096x128xbf16, #tpu.memory_space<vmem>>, vector<2048x128xbf16>
    %c0_8 = arith.constant 0 : index
    %c0_9 = arith.constant 0 : index
    %c0_10 = arith.constant 0 : index
    %17 = vector.load %arg7[%c0_8, %c0_9, %c0_10] : memref<1x2x128xf32, #tpu.memory_space<vmem>>, vector<1x2x128xf32>
    %18 = vector.shape_cast %17 : vector<1x2x128xf32> to vector<2x128xf32>
    %19 = arith.truncf %10 : vector<2x2048xf32> to vector<2x2048xbf16>
    %cst_11 = arith.constant dense<0.000000e+00> : vector<2x128xf32>
    %20 = tpu.matmul %19, %16, %cst_11 {dimension_numbers = #tpu.dot_dimension_numbers<[1], [0], [0], [1], [0, 0, 1, 1], [], []>} : vector<2x2048xbf16>, vector<2048x128xbf16>, vector<2x128xf32> -> vector<2x128xf32>
    %21 = arith.addf %18, %20 : vector<2x128xf32>
    %c0_12 = arith.constant 0 : index
    %c0_13 = arith.constant 0 : index
    %c0_14 = arith.constant 0 : index
    %22 = vector.load %arg7[%c0_12, %c0_13, %c0_14] : memref<1x2x128xf32, #tpu.memory_space<vmem>>, vector<1x2x128xf32>
    %23 = vector.shape_cast %22 : vector<1x2x128xf32> to vector<2x128xf32>
    %24 = vector.shape_cast %21 : vector<2x128xf32> to vector<1x2x128xf32>
    tpu.vector_store %arg7[%c0_12, %c0_13, %c0_14], %24 {strides = array<i32>} : memref<1x2x128xf32, #tpu.memory_space<vmem>>, vector<1x2x128xf32>,
    return
  }
  func.func @transform_0(%arg0: i32, %arg1: i32) -> (i32, i32) {
    %c0_i32 = arith.constant 0 : i32
    %c0_i32_0 = arith.constant 0 : i32
    %c0_i32_1 = arith.constant 0 : i32
    return %c0_i32, %c0_i32_0 : i32, i32
  }
  func.func @transform_1(%arg0: i32, %arg1: i32) -> (i32, i32) {
    %c1_i32 = arith.constant 1 : i32
    %0 = arith.muli %arg0, %c1_i32 : i32
    %1 = arith.addi %0, %arg1 : i32
    %c0_i32 = arith.constant 0 : i32
    %c0_i32_0 = arith.constant 0 : i32
    return %c0_i32, %1 : i32, i32
  }
  func.func @transform_2(%arg0: i32, %arg1: i32) -> (i32, i32) {
    %c1_i32 = arith.constant 1 : i32
    %0 = arith.muli %arg0, %c1_i32 : i32
    %1 = arith.addi %0, %arg1 : i32
    %c0_i32 = arith.constant 0 : i32
    %c0_i32_0 = arith.constant 0 : i32
    return %c0_i32, %1 : i32, i32
  }
  func.func @transform_3(%arg0: i32, %arg1: i32) -> (i32, i32) {
    %c0_i32 = arith.constant 0 : i32
    %c0_i32_0 = arith.constant 0 : i32
    %c0_i32_1 = arith.constant 0 : i32
    return %c0_i32, %c0_i32_0 : i32, i32
  }
  func.func @transform_4(%arg0: i32, %arg1: i32) -> (i32, i32) {
    %c0_i32 = arith.constant 0 : i32
    %c0_i32_0 = arith.constant 0 : i32
    %c0_i32_1 = arith.constant 0 : i32
    return %c0_i32, %c0_i32_0 : i32, i32
  }
  func.func @transform_5(%arg0: i32, %arg1: i32) -> (i32, i32, i32) {
    %c0_i32 = arith.constant 0 : i32
    %c0_i32_0 = arith.constant 0 : i32
    %c0_i32_1 = arith.constant 0 : i32
    return %arg0, %c0_i32, %c0_i32_0 : i32, i32, i32
  }
}

</mosaic_0001>

<bundles_post_ra>
// kernel: tpu_custom_call.1
= control target key start
LH: loop header
LB: loop body
LE: loop exit
PB: predicated region body
PF: predicated region fallthrough
CT: control target
= control target key end

     0   :  { %s13135_s0 = inlined_call_operand.hbm [shape: bf16[2,1024], index: 0, kind: input, shape index: {}]   ;;  %s13136_s1 = inlined_call_operand.hbm [shape: bf16[1024,4096], index: 1, kind: input, shape index: {}]   ;;  %s13137_s2 = inlined_call_operand.hbm [shape: f32[1,4096], index: 2, kind: input, shape index: {}]   ;;  %s13138_s3 = inlined_call_operand.hbm [shape: bf16[4096,128], index: 3, kind: input, shape index: {}]   ;;  %s13139_s4 = inlined_call_operand.hbm [shape: f32[1,128], index: 4, kind: input, shape index: {}]   ;;  %s13140_s5 = inlined_call_operand.hbm [shape: f32[2,2,128], index: 5, kind: output, shape index: {}]  }
   0x1   :  { %13157 = sst [smem:[#allocation20_spill]] %s13136_s1 }
   0x2   :  { %13158 = sst [smem:[#allocation21_spill]] %s13140_s5 }
   0x3   :  { %10 = vsyncpa [#allocation3], 0 }
   0x4   :  { %11 = vsyncpa [#allocation6], 0 }
   0x5   :  { %13 = vsyncpa [#allocation6 + $0x1], 0 }
   0x6   :  { %14 = vsyncpa [#allocation9], 0 }
   0x7   :  { %15 = vsyncpa [#allocation4], 0 }
   0x8   :  { %17 = vsyncpa [#allocation4 + $0x1], 0  ;;  %s11468_s18 = smov 0   ;;  %s11470_s19 = smov 0  }
   0x9   :  { %s11472_s20 = smov 0   ;;  %s11474_s21 = smov 0  }
   0xa   :  { %s11476_s22 = smov 0   ;;  %s11478_s23 = smov 0  }
   0xb LB: > { %13159 = sst [smem:[#allocation16_spill]] %s11405_s18  ;;  %s11499_s24 = sadd.s32 4294967295, %s11425_s23   ;;  %s11425_s23 = sphi %s11478_s23, %s23_s23   ;;  %s11421_s22 = sphi %s11476_s22, %s13197_s22   ;;  %s11417_s21 = sphi %s11474_s21, %s13196_s21   ;;  %s11413_s20 = sphi %s11472_s20, %s13195_s20   ;;  %s11409_s19 = sphi %s11470_s19, %s13194_s19   ;;  %s11405_s18 = sphi %s11468_s18, %s13193_s18  }
   0xc   : > { %13160 = sst [smem:[#allocation17_spill]] %s11417_s21  ;;  %s9490_s25 = sadd.s32 4294967294, %s11425_s23  }
   0xd   : > { %p72_p0 = scmp.ne.s32.totalorder %s11413_s20, %s11409_s19  ;;  %p73_p1 = scmp.eq.s32.totalorder %s11425_s23, 0 }
   0xe   : > { %p78_p2 = scmp.ne.s32.totalorder %s11409_s19, %s11405_s18  ;;  %p13141_p3 = scmp.eq.s32.totalorder %s11499_s24, 0 }
   0xf   : > { %p172_p4 = scmp.eq.s32.totalorder %s11499_s24, 1  ;;  %p11510_p5 = por %p73_p1, %p72_p0 }
  0x10   : > { %p178_p6 = scmp.eq.s32.totalorder %s9490_s25, 1  ;;  %p11516_p7 = por %p13141_p3, %p78_p2 }
  0x11   : > { %p11520_p8 = por %p172_p4, %p72_p0  ;;  %p9491_p10 = scmp.ge.s32.totalorder %s11425_s23, 1 }
  0x12   : > { %s13162_s28 = scalar_select %p11516_p7, 1, 0 }
  0x13   : > { %s13163_s29 = scalar_select %p11520_p8, 1, 0 }
  0x14   : > { %p11524_p9 = por %p178_p6, %p78_p2  ;;  %p185_p11 = scmp.lt.s32.totalorder %s11425_s23, 3 }
  0x15   : > { %13164 = sst [smem:[#allocation18_spill]] %s13163_s29  ;;  %s11427_s7 = smov [#allocation8]  }
  0x16   : > { %s13165_s30 = scalar_select %p11524_p9, 1, 0 }
  0x17   : > { %p11530_p12 = pnand %p9491_p10, %p185_p11  ;;  %s208_s8 = sshll.u32 %s11427_s7, 4  ;;  %s11534_s8 = int_to_ptr.vmem [resolvable:$true] %s208_s8 }
  0x18   : > { %13166 = sst [smem:[#allocation19_spill]] %s13165_s30  ;;  %p11000_p1 = scmp.lt.s32.totalorder %s11425_s23, 2 }
  0x19   : > { %s13167_s6 = scalar_select %p11530_p12, 1, 0 }
  0x1a   : > { %p10976_p13 = pneg %p11530_p12  ;;  %p11548_p4 = pnand %p11000_p1, %p11510_p5 }
  0x1b   : > { %s35_s11 = sadd.s32 1, %s11421_s22  ;;  %s11191_s15 = scalar_lea.hbm %s13138_s3, 32768 }
  0x1c   : > { %p11542_p2 = pnand %p10976_p13, %p13141_p3  ;;  %p11553_p6 = scmp.ge.s32.totalorder %s35_s11, 2 }
  0x1d   : > { %s13169_s10 = scalar_select %p11548_p4, 1, 0 }
  0x1e   : > { %s13168_s9 = scalar_select %p11542_p2, 1, 0 }
  0x1f   : > { %p11192_p10 = scmp.ne.s32.totalorder %s13138_s3, %s11191_s15  ;;  %p11565_p11 = pneg %p11542_p2 }
  0x20   : > { %p11198_p1 = scmp.lt.u32.totalorder %s11191_s15, %s13138_s3 }
  0x21   : > { %p11194_p5 = pnand %p11565_p11, %p11192_p10 }
  0x23   : > { %p11195_p13 = pneg %p11194_p5 }
  0x25   : > { %p11200_p0 = pnand %p11198_p1, %p11195_p13 }
  0x27   : > { %11203 = shalt.err (!%p11200_p0)
}
  0x28   : > { %s11204_s13 = scalar_lea.vmem %s11534_s8, 32768  ;;  %p11212_p7 = scmp.lt.s32.totalorder %s11534_s8, %s11534_s8 }
  0x29   : > { %p11205_p3 = scmp.ne.s32.totalorder %s11534_s8, %s11204_s13  ;;  %p11213_p12 = scmp.lt.s32.totalorder %s11204_s13, %s11204_s13 }
  0x2b   : > { %p11207_p9 = pnand %p11205_p3, %p11565_p11  ;;  %p11214_p10 = por %p11213_p12, %p11212_p7 }
  0x2d   : > { %p11208_p8 = pneg %p11207_p9 }
  0x2f   : > { %p11215_p5 = pnand %p11214_p10, %p11208_p8 }
  0x31   : > { %11218 = shalt.err (!%p11215_p5)
}
  0x32   : > { %s11428_s14 = smov 64   ;;  %s11429_s15 = smov 4  }
  0x33   : > { %10982 = dma.hbm_to_vmem [thread:$0]  (!%p11542_p2), %s13138_s3, 32768, %s11534_s8, [#allocation9], %s11428_s14, %s11428_s14, %s11429_s15  }
  0x34   : > { %s233_s27 = sand.u32 1, %s11425_s23   ;;  %s13199_s11 = smov (%p11553_p6, %s35_s11), 0 }
  0x35   : > { %s13153_s7 = sand.u32 1, %s11413_s20   ;;  %s62_s13 = ssub.s32 %s11421_s22, %s13199_s11 }
  0x36   : > { %s9496_s26 = sshll.u32 %s13153_s7, 13  ;;  %p63_p3 = scmp.eq.s32.totalorder %s62_s13, 0 }
  0x37   : > { %s10668_s30 = sshll.u32 %s11421_s22, 10  ;;  %s237_s18 = scalar_lea.vmem [#allocation5], %s9496_s26 }
  0x38   : > { %s245_s5 = sshll.u32 %s237_s18, 4  ;;  %s13172_s29 = sadd.s32 1, %s11413_s20  ;;  %s11609_s5 = int_to_ptr.vmem [resolvable:$true] %s245_s5 }
  0x39   : > { %s11602_s21 = scalar_select %p63_p3, %s11413_s20, %s13172_s29  }
  0x3a   : > { %s13173_s1 = sld [smem:[#allocation20_spill]]  ;;  %s11611_s12 = scalar_lea.sflag [#allocation6], %s233_s27 }
  0x3b   : > { %p13154_p8 = pneg %p11548_p4 }
  0x40   : > { %s11607_s15 = scalar_lea.hbm %s13173_s1, %s10668_s30  ;;  %s11224_s29 = scalar_lea.hbm %s13173_s1, 262144 }
  0x41   : > { %s11219_s17 = scalar_lea.hbm %s11607_s15, 131072  ;;  %p11225_p0 = scmp.lt.u32.totalorder %s11607_s15, %s13173_s1 }
  0x42   : > { %p11220_p7 = scmp.ne.s32.totalorder %s11607_s15, %s11219_s17  ;;  %p11226_p6 = scmp.lt.u32.totalorder %s11224_s29, %s11219_s17 }
  0x43   : > { %p11228_p1 = scmp.lt.u32.totalorder %s11219_s17, %s11607_s15 }
  0x44   : > { %p11222_p9 = pnand %p13154_p8, %p11220_p7  ;;  %p11227_p13 = por %p11226_p6, %p11225_p0 }
  0x46   : > { %p11223_p12 = pneg %p11222_p9  ;;  %p11229_p10 = por %p11228_p1, %p11227_p13 }
  0x48   : > { %p11230_p5 = pnand %p11229_p10, %p11223_p12 }
  0x4a   : > { %11233 = shalt.err (!%p11230_p5)
}
  0x4b   : > { %s11234_s27 = scalar_lea.vmem %s11609_s5, 131072  ;;  %s11430_s16 = smov [#allocation5]  }
  0x4c   : > { %p11235_p3 = scmp.ne.s32.totalorder %s11609_s5, %s11234_s27  ;;  %s11239_s8 = sshll.u32 %s11430_s16, 4  ;;  %s11240_s8 = int_to_ptr.vmem [resolvable:$false] %s11239_s8 }
  0x4d   : > { %s11241_s18 = scalar_lea.vmem %s11240_s8, 262144  ;;  %p11242_p2 = scmp.lt.s32.totalorder %s11609_s5, %s11240_s8 }
  0x4e   : > { %p11237_p7 = pnand %p11235_p3, %p13154_p8  ;;  %p11243_p0 = scmp.lt.s32.totalorder %s11241_s18, %s11234_s27 }
  0x50   : > { %p11238_p9 = pneg %p11237_p7  ;;  %p11244_p6 = por %p11243_p0, %p11242_p2 }
  0x52   : > { %p11245_p13 = pnand %p11244_p6, %p11238_p9 }
  0x54   : > { %11248 = shalt.err (!%p11245_p13)
}
  0x55   : > { %s11431_s17 = smov 2048   ;;  %s11432_s26 = smov 1024  }
  0x56   : > { %10989 = dma.hbm_to_vmem [thread:$0]  (!%p11548_p4), %s11607_s15, 131072, %s11609_s5, %s11611_s12, %s11431_s17, %s11432_s26, %s11428_s14  }
  0x57   : > { %s11433_s29 = smov [#allocation2]   ;;  %s11249_s27 = scalar_lea.hbm %s13135_s0, 128 }
  0x58   : > { %s198_s30 = sshll.u32 %s11433_s29, 4  ;;  %p11250_p2 = scmp.ne.s32.totalorder %s13135_s0, %s11249_s27  ;;  %s199_s30 = int_to_ptr.vmem [resolvable:$true] %s198_s30 }
  0x59   : > { %p11256_p10 = scmp.lt.u32.totalorder %s11249_s27, %s13135_s0 }
  0x5a   : > { %p11252_p12 = pnand %p11250_p2, %p11565_p11 }
  0x5c   : > { %p11253_p1 = pneg %p11252_p12 }
  0x5e   : > { %p11258_p5 = pnand %p11256_p10, %p11253_p1 }
  0x60   : > { %11261 = shalt.err (!%p11258_p5)
}
  0x61   : > { %s11262_s5 = scalar_lea.vmem %s199_s30, 128  ;;  %p11270_p0 = scmp.lt.s32.totalorder %s199_s30, %s199_s30 }
  0x62   : > { %p11263_p3 = scmp.ne.s32.totalorder %s199_s30, %s11262_s5  ;;  %p11271_p6 = scmp.lt.s32.totalorder %s11262_s5, %s11262_s5 }
  0x64   : > { %p11265_p7 = pnand %p11263_p3, %p11565_p11  ;;  %p11272_p13 = por %p11271_p6, %p11270_p0 }
  0x66   : > { %p11266_p9 = pneg %p11265_p7 }
  0x68   : > { %p11273_p8 = pnand %p11272_p13, %p11266_p9 }
  0x6a   : > { %11276 = shalt.err (!%p11273_p8)
}
  0x6b   : > { %p13174_p2 = scmp.ne.s32.totalorder %s13168_s9, 0  ;;  %s11434_s1 = smov [#allocation10]  }
  0x6c   : > { %s222_s7 = sshll.u32 %s11434_s1, 4  ;;  %s13175_s17 = sand.u32 1, %s11413_s20   ;;  %s223_s7 = int_to_ptr.vmem [resolvable:$true] %s222_s7 }
  0x6d   : > { %10979 = dma.hbm_to_vmem [thread:$0]  (!%p13174_p2), %s13135_s0, 128, %s199_s30, [#allocation3]  }
  0x6e   : > { %s9499_s26 = sshll.u32 %s13175_s17, 4  ;;  %s11277_s16 = scalar_lea.hbm %s13139_s4, 16 }
  0x6f   : > { %p11278_p8 = scmp.ne.s32.totalorder %s13139_s4, %s11277_s16  ;;  %p11284_p10 = scmp.lt.u32.totalorder %s11277_s16, %s13139_s4 }
  0x71   : > { %p11280_p12 = pnand %p11278_p8, %p11565_p11 }
  0x73   : > { %p11281_p1 = pneg %p11280_p12 }
  0x75   : > { %p11286_p5 = pnand %p11284_p10, %p11281_p1 }
  0x77   : > { %11289 = shalt.err (!%p11286_p5)
}
  0x78   : > { %s11290_s30 = scalar_lea.vmem %s223_s7, 16  ;;  %s11297_s14 = scalar_lea.vmem %s223_s7, 32 }
  0x79   : > { %p11291_p3 = scmp.ne.s32.totalorder %s223_s7, %s11290_s30  ;;  %p11298_p0 = scmp.lt.s32.totalorder %s223_s7, %s223_s7 }
  0x7a   : > { %p11299_p6 = scmp.lt.s32.totalorder %s11297_s14, %s11290_s30 }
  0x7b   : > { %p11293_p7 = pnand %p11291_p3, %p11565_p11 }
  0x7c   : > { %p11300_p13 = por %p11299_p6, %p11298_p0 }
  0x7d   : > { %p11294_p9 = pneg %p11293_p7 }
  0x7f   : > { %p11301_p4 = pnand %p11300_p13, %p11294_p9 }
  0x81   : > { %11304 = shalt.err (!%p11301_p4)
}
  0x82   : > { %10985 = dma.hbm_to_vmem [thread:$0]  (!%p13174_p2), %s13139_s4, 16, %s223_s7, [#allocation9]  }
  0x83   : > { %s10669_s17 = sshll.u32 %s11421_s22, 8  ;;  %s259_s29 = scalar_lea.vmem [#allocation7], %s9499_s26 }
  0x84   : > { %s268_s13 = sshll.u32 %s259_s29, 4  ;;  %s266_s27 = scalar_lea.hbm %s13137_s2, %s10669_s17  ;;  %s269_s13 = int_to_ptr.vmem [resolvable:$true] %s268_s13 }
  0x85   : > { %s11305_s8 = scalar_lea.hbm %s266_s27, 256  ;;  %p13176_p8 = scmp.ne.s32.totalorder %s13169_s10, 0 }
  0x86   : > { %p11306_p11 = scmp.ne.s32.totalorder %s266_s27, %s11305_s8  ;;  %s11310_s5 = scalar_lea.hbm %s13137_s2, 512 }
  0x87   : > { %p13177_p4 = pneg %p13176_p8  ;;  %p11311_p2 = scmp.lt.u32.totalorder %s266_s27, %s13137_s2 }
  0x88   : > { %p11312_p10 = scmp.lt.u32.totalorder %s11310_s5, %s11305_s8  ;;  %p11314_p3 = scmp.lt.u32.totalorder %s11305_s8, %s266_s27 }
  0x89   : > { %p11308_p12 = pnand %p11306_p11, %p13177_p4 }
  0x8a   : > { %p11313_p5 = por %p11312_p10, %p11311_p2 }
  0x8b   : > { %p11309_p1 = pneg %p11308_p12 }
  0x8c   : > { %p11315_p7 = por %p11314_p3, %p11313_p5 }
  0x8e   : > { %p11316_p9 = pnand %p11315_p7, %p11309_p1 }
  0x90   : > { %11319 = shalt.err (!%p11316_p9)
}
  0x91   : > { %s11320_s26 = scalar_lea.vmem %s269_s13, 256  ;;  %p13178_p6 = pmov %p13177_p4 }
  0x92   : > { %p11321_p0 = scmp.ne.s32.totalorder %s269_s13, %s11320_s26  ;;  %s11435_s14 = smov [#allocation7]  }
  0x93   : > { %s11325_s15 = sshll.u32 %s11435_s14, 4  ;;  %s11326_s15 = int_to_ptr.vmem [resolvable:$false] %s11325_s15 }
  0x94   : > { %p11323_p13 = pnand %p11321_p0, %p13178_p6  ;;  %s11327_s1 = scalar_lea.vmem %s11326_s15, 512 }
  0x95   : > { %p11328_p4 = scmp.lt.s32.totalorder %s269_s13, %s11326_s15  ;;  %p11329_p12 = scmp.lt.s32.totalorder %s11327_s1, %s11320_s26 }
  0x96   : > { %p11324_p11 = pneg %p11323_p13 }
  0x97   : > { %p11330_p2 = por %p11329_p12, %p11328_p4 }
  0x99   : > { %p11331_p10 = pnand %p11330_p2, %p11324_p11 }
  0x9b   : > { %11334 = shalt.err (!%p11331_p10)
}
  0x9c   : > { %10992 = dma.hbm_to_vmem [thread:$0]  (!%p13176_p8), %s266_s27, 256, %s269_s13, %s11611_s12  }
  0x9d   : > { %p13179_p1 = scmp.ne.s32.totalorder %s13167_s6, 0 }
  0x9e   : > { %p13180_p5 = scmp.eq.s32.totalorder (!%p13179_p1), %s11499_s24, 0 }
  0x9f   : > { %277 = sbr.rel (%p13179_p1) target bundleno = 1658 (0x67a), region = 40 }
  0xa6   : > { %11388 = dma.done.wait (%p13180_p5), [#allocation3], 128   ;;  %p13181_p3 = pmov %p13180_p5 }
  0xa7   : > { %s283_s17 = sand.u32 1, %s11499_s24   ;;  %s11705_s29 = sand.u32 1, %s11409_s19  }
  0xa8   : > { %11390 = vsyncadd (%p13181_p3), [#allocation3], 4294967168  ;;  %s9504_s25 = sshll.u32 %s11705_s29, 13  ;;  %s284_s10 = scalar_lea.sflag [#allocation6], %s283_s17 }
  0xa9   : > { %s11708_s16 = scalar_lea.vmem [#allocation5], %s9504_s25  ;;  %p13182_p8 = scmp.ne.s32.totalorder %s13162_s28, 0 }
  0xab   : > { %11392 = dma.done.wait (%p13182_p8), %s284_s10, 131328  }
  0xac   : > { %11394 = vsyncadd (%p13182_p8), %s284_s10, 4294835968  ;;  %s9505_s6 = sshll.u32 %s11705_s29, 4  ;;  %p13183_p7 = pmov %p13181_p3 }
  0xad   : > { %s11715_s12 = scalar_lea.vmem [#allocation7], %s9505_s6 }
  0xae   : > { %11396 = dma.done.wait (%p13183_p7), [#allocation9], 32784   ;;  %p13184_p9 = pmov %p13181_p3 }
  0xaf   : > { %v359_v0 = vld [vmem:[%s11708_s16] sm:$0xff]  ;;  %v360_v2 = vld [vmem:[%s11708_s16 + $0x8] sm:$0xff]  ;;  %v1387_v32 = vlaneseq  ;;  %v11436_v33 = vmov 1966171168   ;;  %v11754_v59 = vld [vmem:[#allocation2] sm:$0xff]  ;;  %s13185_s24 = sld [smem:[#allocation17_spill]] }
  0xb0   : > { %11398 = vsyncadd (%p13184_p9), [#allocation9], 4294934512  ;;  %v367_v1 = vld [vmem:[%s11708_s16 + $0x40] sm:$0xff]  ;;  %v368_v4 = vld [vmem:[%s11708_s16 + $0x48] sm:$0xff]  ;;  %v1470_v34 = vunpack.c.l.s4 %v11436_v33  ;;  %s9508_s5 = sshll.u32 %s11705_s29, 1  ;;  %s13186_s7 = sld [smem:[#allocation18_spill]] }
  0xb1   : > { %v9511_v3 = vcombine.high %v359_v0, %v367_v1  ;;  %v9510_v5 = vcombine.low %v359_v0, %v367_v1  ;;  %v375_v6 = vld [vmem:[%s11708_s16 + $0x80] sm:$0xff]  ;;  %v9513_v8 = vcombine.high %v360_v2, %v368_v4  ;;  %v9512_v9 = vcombine.low %v360_v2, %v368_v4  ;;  %v376_v11 = vld [vmem:[%s11708_s16 + $0x88] sm:$0xff]  ;;  %s13076_s30 = scalar_lea.vmem [#allocation11], %s9508_s5  ;;  %s13187_s17 = sld [smem:[#allocation21_spill]] }
  0xb2   : > { %v383_v7 = vld [vmem:[%s11708_s16 + $0xc0] sm:$0xff]  ;;  %v384_v12 = vld [vmem:[%s11708_s16 + $0xc8] sm:$0xff]  ;;  %v11743_v43 = vshrl.u32 %v1387_v32, 7  ;;  %v1471_v44 = vunpack.c.0.s8 %v1470_v34  ;;  %s9356_s14 = sshll.u32 %s13076_s30, 4  ;;  %s9343_s10 = scalar_lea.sflag [#allocation4], %s11705_s29  ;;  %s13087_s14 = int_to_ptr.vmem [resolvable:$true] %s9356_s14 }
  0xb3   : > { %v9527_v10 = vcombine.high %v375_v6, %v383_v7  ;;  %v391_v13 = vld [vmem:[%s11708_s16 + $0x100] sm:$0xff]  ;;  %6645 = vmatprep.subr.bf16.mxu0 %v9511_v3  ;;  %v9529_v14 = vcombine.high %v376_v11, %v384_v12  ;;  %v392_v16 = vld [vmem:[%s11708_s16 + $0x108] sm:$0xff]  ;;  %6809 = vmatprep.subr.bf16.mxu1 %v9513_v8  ;;  %v9526_v18 = vcombine.low %v375_v6, %v383_v7  ;;  %s11437_s6 = smov [#allocation11]  }
  0xb4   : > { %v399_v15 = vld [vmem:[%s11708_s16 + $0x140] sm:$0xff]  ;;  %v400_v17 = vld [vmem:[%s11708_s16 + $0x148] sm:$0xff]  ;;  %6646 = vmatpush1.bf16.msra.mxu0 %v9510_v5  ;;  %6810 = vmatpush1.bf16.msra.mxu1 %v9512_v9  ;;  %v9528_v19 = vcombine.low %v376_v11, %v384_v12  ;;  %v11750_v53 = vsub.s32 %v1471_v44, %v11743_v43 }
  0xb5   : > { %6647 = vmatprep.subr.bf16.mxu0 %v9527_v10  ;;  %v9543_v20 = vcombine.high %v391_v13, %v399_v15  ;;  %6811 = vmatprep.subr.bf16.mxu1 %v9529_v14  ;;  %v9545_v21 = vcombine.high %v392_v16, %v400_v17  ;;  %v407_v22 = vld [vmem:[%s11708_s16 + $0x180] sm:$0xff]  ;;  %v408_v24 = vld [vmem:[%s11708_s16 + $0x188] sm:$0xff]  ;;  %v9542_v26 = vcombine.low %v391_v13, %v399_v15  ;;  %s10534_s28 = sshll.u32 %s13185_s24, 11  ;;  %p345_p0 = scmp.eq.s32.totalorder %s13185_s24, 0 }
  0xb6   : > { %v415_v23 = vld [vmem:[%s11708_s16 + $0x1c0] sm:$0xff]  ;;  %v416_v25 = vld [vmem:[%s11708_s16 + $0x1c8] sm:$0xff]  ;;  %v9544_v27 = vcombine.low %v392_v16, %v400_v17  ;;  %v11760_v63 = vrot.slane %v11754_v59, %v11750_v53  ;;  %s7975_s13 = sshra.s32 %s10534_s28, 3  ;;  %s10665_s26 = sshll.u32 %s13185_s24, 5 }
  0xb7   : > { %v9559_v28 = vcombine.high %v407_v22, %v415_v23  ;;  %v9561_v29 = vcombine.high %v408_v24, %v416_v25  ;;  %v423_v30 = vld [vmem:[%s11708_s16 + $0x200] sm:$0xff]  ;;  %v424_v35 = vld [vmem:[%s11708_s16 + $0x208] sm:$0xff]  ;;  %v9558_v37 = vcombine.low %v407_v22, %v415_v23  ;;  %v9560_v38 = vcombine.low %v408_v24, %v416_v25  ;;  %s10535_s27 = sshll.u32 %s7975_s13, 2  ;;  %s13085_s25 = scalar_lea.hbm %s13187_s17, %s10665_s26 }
  0xb8   : > { %6648 = vmatpush1.bf16.msra.mxu0 %v9526_v18  ;;  %6812 = vmatpush1.bf16.msra.mxu1 %v9528_v19  ;;  %v431_v31 = vld [vmem:[%s11708_s16 + $0x240] sm:$0xff]  ;;  %v432_v36 = vld [vmem:[%s11708_s16 + $0x248] sm:$0xff]  ;;  %v1483_v3 = vcombine.high %v11760_v63, %v11760_v63  ;;  %s12744_s8 = scalar_lea.vmem [#allocation8], %s10535_s27  ;;  %p13188_p13 = scmp.ne.s32.totalorder %s13186_s7, 0 }
  0xb9   : > { %6649 = vmatprep.subr.bf16.mxu0 %v9543_v20  ;;  %6813 = vmatprep.subr.bf16.mxu1 %v9545_v21  ;;  %v9575_v39 = vcombine.high %v423_v30, %v431_v31  ;;  %v9577_v40 = vcombine.high %v424_v35, %v432_v36  ;;  %v439_v41 = vld [vmem:[%s11708_s16 + $0x280] sm:$0xff]  ;;  %v440_v45 = vld [vmem:[%s11708_s16 + $0x288] sm:$0xff]  ;;  %v9574_v47 = vcombine.low %v423_v30, %v431_v31  ;;  %s346_s9 = scalar_select %p345_p0, 1, 0 }
  0xba   : > { %v447_v42 = vld [vmem:[%s11708_s16 + $0x2c0] sm:$0xff]  ;;  %v448_v46 = vld [vmem:[%s11708_s16 + $0x2c8] sm:$0xff]  ;;  %v9576_v48 = vcombine.low %v424_v35, %v432_v36  ;;  %v11769_v9 = vrot.slane %v1483_v3, %v11750_v53 }
  0xbb   : > { %v9591_v49 = vcombine.high %v439_v41, %v447_v42  ;;  %v9593_v50 = vcombine.high %v440_v45, %v448_v46  ;;  %v455_v51 = vld [vmem:[%s11708_s16 + $0x300] sm:$0xff]  ;;  %v456_v54 = vld [vmem:[%s11708_s16 + $0x308] sm:$0xff]  ;;  %v9590_v56 = vcombine.low %v439_v41, %v447_v42  ;;  %v9592_v57 = vcombine.low %v440_v45, %v448_v46  ;;  %s347_s18 = scvt.s32.f32 %s346_s9 }
  0xbc   : > { %6650 = vmatpush1.bf16.msra.mxu0 %v9542_v26  ;;  %6814 = vmatpush1.bf16.msra.mxu1 %v9544_v27  ;;  %v463_v52 = vld [vmem:[%s11708_s16 + $0x340] sm:$0xff]  ;;  %v464_v55 = vld [vmem:[%s11708_s16 + $0x348] sm:$0xff] }
  0xbd   : > { %6651 = vmatprep.subr.bf16.mxu0 %v9559_v28  ;;  %6815 = vmatprep.subr.bf16.mxu1 %v9561_v29  ;;  %v9607_v58 = vcombine.high %v455_v51, %v463_v52  ;;  %v9609_v60 = vcombine.high %v456_v54, %v464_v55  ;;  %v471_v61 = vld [vmem:[%s11708_s16 + $0x380] sm:$0xff]  ;;  %v472_v0 = vld [vmem:[%s11708_s16 + $0x388] sm:$0xff]  ;;  %v9606_v2 = vcombine.low %v455_v51, %v463_v52 }
  0xbe   : > { %v479_v62 = vld [vmem:[%s11708_s16 + $0x3c0] sm:$0xff]  ;;  %v480_v1 = vld [vmem:[%s11708_s16 + $0x3c8] sm:$0xff]  ;;  %v9608_v4 = vcombine.low %v456_v54, %v464_v55  ;;  %6677 = vmatprep.mubr.bf16.mxu0 %v11769_v9  ;;  %6841 = vmatprep.mubr.bf16.mxu1 %v11769_v9 }
  0xbf   : > { %v9623_v5 = vcombine.high %v471_v61, %v479_v62  ;;  %v9625_v6 = vcombine.high %v472_v0, %v480_v1  ;;  %v487_v7 = vld [vmem:[%s11708_s16 + $0x400] sm:$0xff]  ;;  %v488_v10 = vld [vmem:[%s11708_s16 + $0x408] sm:$0xff]  ;;  %v9622_v12 = vcombine.low %v471_v61, %v479_v62  ;;  %v9624_v13 = vcombine.low %v472_v0, %v480_v1 }
  0xc0   : > { %6652 = vmatpush1.bf16.msra.mxu0 %v9558_v37  ;;  %6816 = vmatpush1.bf16.msra.mxu1 %v9560_v38  ;;  %v495_v8 = vld [vmem:[%s11708_s16 + $0x440] sm:$0xff]  ;;  %v496_v11 = vld [vmem:[%s11708_s16 + $0x448] sm:$0xff] }
  0xc1   : > { %6653 = vmatprep.subr.bf16.mxu0 %v9575_v39  ;;  %6817 = vmatprep.subr.bf16.mxu1 %v9577_v40  ;;  %v9639_v14 = vcombine.high %v487_v7, %v495_v8  ;;  %v9641_v15 = vcombine.high %v488_v10, %v496_v11  ;;  %v503_v16 = vld [vmem:[%s11708_s16 + $0x480] sm:$0xff]  ;;  %v504_v18 = vld [vmem:[%s11708_s16 + $0x488] sm:$0xff]  ;;  %v9638_v20 = vcombine.low %v487_v7, %v495_v8 }
  0xc2   : > { %v511_v17 = vld [vmem:[%s11708_s16 + $0x4c0] sm:$0xff]  ;;  %v512_v19 = vld [vmem:[%s11708_s16 + $0x4c8] sm:$0xff]  ;;  %v9640_v21 = vcombine.low %v488_v10, %v496_v11 }
  0xc3   : > { %v9655_v22 = vcombine.high %v503_v16, %v511_v17  ;;  %v9657_v23 = vcombine.high %v504_v18, %v512_v19  ;;  %v519_v24 = vld [vmem:[%s11708_s16 + $0x500] sm:$0xff]  ;;  %v520_v26 = vld [vmem:[%s11708_s16 + $0x508] sm:$0xff]  ;;  %v9654_v28 = vcombine.low %v503_v16, %v511_v17  ;;  %v9656_v29 = vcombine.low %v504_v18, %v512_v19 }
  0xc4   : > { %6654 = vmatpush1.bf16.msra.mxu0 %v9574_v47  ;;  %6818 = vmatpush1.bf16.msra.mxu1 %v9576_v48  ;;  %v527_v25 = vld [vmem:[%s11708_s16 + $0x540] sm:$0xff]  ;;  %v528_v27 = vld [vmem:[%s11708_s16 + $0x548] sm:$0xff]  ;;  %v1468_v18 = vcombine.high %v11754_v59, %v11754_v59 }
  0xc5   : > { %6655 = vmatprep.subr.bf16.mxu0 %v9591_v49  ;;  %6819 = vmatprep.subr.bf16.mxu1 %v9593_v50  ;;  %v9671_v30 = vcombine.high %v519_v24, %v527_v25  ;;  %v9673_v31 = vcombine.high %v520_v26, %v528_v27  ;;  %v535_v32 = vld [vmem:[%s11708_s16 + $0x580] sm:$0xff]  ;;  %v536_v34 = vld [vmem:[%s11708_s16 + $0x588] sm:$0xff]  ;;  %v9670_v36 = vcombine.low %v519_v24, %v527_v25 }
  0xc6   : > { %v543_v33 = vld [vmem:[%s11708_s16 + $0x5c0] sm:$0xff]  ;;  %v544_v35 = vld [vmem:[%s11708_s16 + $0x5c8] sm:$0xff]  ;;  %v9672_v37 = vcombine.low %v520_v26, %v528_v27  ;;  %v1482_v24 = vrot.slane %v1468_v18, %v11750_v53  ;;  %v11814_v25 = vrot.slane %v11760_v63, %v11750_v53  ;;  %v11822_v63 = vcombine.high %v11769_v9, %v11769_v9 }
  0xc7   : > { %v9687_v38 = vcombine.high %v535_v32, %v543_v33  ;;  %v9689_v39 = vcombine.high %v536_v34, %v544_v35  ;;  %v551_v40 = vld [vmem:[%s11708_s16 + $0x600] sm:$0xff]  ;;  %v552_v42 = vld [vmem:[%s11708_s16 + $0x608] sm:$0xff]  ;;  %v9686_v45 = vcombine.low %v535_v32, %v543_v33  ;;  %v9688_v46 = vcombine.low %v536_v34, %v544_v35 }
  0xc8   : > { %6656 = vmatpush1.bf16.msra.mxu0 %v9590_v56  ;;  %6820 = vmatpush1.bf16.msra.mxu1 %v9592_v57  ;;  %v559_v41 = vld [vmem:[%s11708_s16 + $0x640] sm:$0xff]  ;;  %v560_v44 = vld [vmem:[%s11708_s16 + $0x648] sm:$0xff]  ;;  %v11828_v35 = vrot.slane %v1482_v24, %v11750_v53 }
  0xc9   : > { %6657 = vmatprep.subr.bf16.mxu0 %v9607_v58  ;;  %6821 = vmatprep.subr.bf16.mxu1 %v9609_v60  ;;  %v9703_v47 = vcombine.high %v551_v40, %v559_v41  ;;  %v9705_v48 = vcombine.high %v552_v42, %v560_v44  ;;  %v567_v49 = vld [vmem:[%s11708_s16 + $0x680] sm:$0xff]  ;;  %v568_v51 = vld [vmem:[%s11708_s16 + $0x688] sm:$0xff]  ;;  %v9702_v54 = vcombine.low %v551_v40, %v559_v41 }
  0xca   : > { %v575_v50 = vld [vmem:[%s11708_s16 + $0x6c0] sm:$0xff]  ;;  %v576_v52 = vld [vmem:[%s11708_s16 + $0x6c8] sm:$0xff]  ;;  %v9704_v55 = vcombine.low %v552_v42, %v560_v44 }
  0xcb   : > { %v9719_v56 = vcombine.high %v567_v49, %v575_v50  ;;  %v9721_v57 = vcombine.high %v568_v51, %v576_v52  ;;  %v583_v58 = vld [vmem:[%s11708_s16 + $0x700] sm:$0xff]  ;;  %v584_v61 = vld [vmem:[%s11708_s16 + $0x708] sm:$0xff]  ;;  %v9718_v0 = vcombine.low %v567_v49, %v575_v50  ;;  %v9720_v1 = vcombine.low %v568_v51, %v576_v52 }
  0xcc   : > { %6658 = vmatpush1.bf16.msra.mxu0 %v9606_v2  ;;  %6822 = vmatpush1.bf16.msra.mxu1 %v9608_v4  ;;  %v591_v60 = vld [vmem:[%s11708_s16 + $0x740] sm:$0xff]  ;;  %v592_v62 = vld [vmem:[%s11708_s16 + $0x748] sm:$0xff] }
  0xcd   : > { %6659 = vmatprep.subr.bf16.mxu0 %v9623_v5  ;;  %6823 = vmatprep.subr.bf16.mxu1 %v9625_v6  ;;  %v9735_v2 = vcombine.high %v583_v58, %v591_v60  ;;  %v9737_v3 = vcombine.high %v584_v61, %v592_v62  ;;  %v599_v4 = vld [vmem:[%s11708_s16 + $0x780] sm:$0xff]  ;;  %v600_v6 = vld [vmem:[%s11708_s16 + $0x788] sm:$0xff]  ;;  %v9734_v8 = vcombine.low %v583_v58, %v591_v60 }
  0xce   : > { %v607_v5 = vld [vmem:[%s11708_s16 + $0x7c0] sm:$0xff]  ;;  %v608_v7 = vld [vmem:[%s11708_s16 + $0x7c8] sm:$0xff]  ;;  %v9736_v10 = vcombine.low %v584_v61, %v592_v62 }
  0xcf   : > { %v9751_v11 = vcombine.high %v599_v4, %v607_v5  ;;  %v624_v16 = vld [vmem:[%s11708_s16 + $0x848] sm:$0xff]  ;;  %v9750_v17 = vcombine.low %v599_v4, %v607_v5  ;;  %v9752_v19 = vcombine.low %v600_v6, %v608_v7  ;;  %v647_v32 = vld [vmem:[%s11708_s16 + $0x900] sm:$0xff] }
  0xd0   : > { %6660 = vmatpush1.bf16.msra.mxu0 %v9622_v12  ;;  %6824 = vmatpush1.bf16.msra.mxu1 %v9624_v13  ;;  %v9753_v12 = vcombine.high %v600_v6, %v608_v7  ;;  %v615_v13 = vld [vmem:[%s11708_s16 + $0x800] sm:$0xff]  ;;  %v632_v26 = vld [vmem:[%s11708_s16 + $0x888] sm:$0xff] }
  0xd1   : > { %6661 = vmatprep.subr.bf16.mxu0 %v9639_v14  ;;  %6825 = vmatprep.subr.bf16.mxu1 %v9641_v15  ;;  %v623_v14 = vld [vmem:[%s11708_s16 + $0x840] sm:$0xff]  ;;  %v616_v15 = vld [vmem:[%s11708_s16 + $0x808] sm:$0xff] }
  0xd2   : > { %v640_v27 = vld [vmem:[%s11708_s16 + $0x8c8] sm:$0xff]  ;;  %v9766_v59 = vcombine.low %v615_v13, %v623_v14  ;;  %v655_v33 = vld [vmem:[%s11708_s16 + $0x940] sm:$0xff] }
  0xd3   : > { %v9799_v40 = vcombine.high %v647_v32, %v655_v33  ;;  %v671_v42 = vld [vmem:[%s11708_s16 + $0x9c0] sm:$0xff]  ;;  %v664_v44 = vld [vmem:[%s11708_s16 + $0x988] sm:$0xff] }
  0xd4   : > { %6662 = vmatpush1.bf16.msra.mxu0 %v9638_v20  ;;  %6826 = vmatpush1.bf16.msra.mxu1 %v9640_v21  ;;  %v9767_v20 = vcombine.high %v615_v13, %v623_v14  ;;  %v9769_v21 = vcombine.high %v616_v15, %v624_v16  ;;  %v679_v50 = vld [vmem:[%s11708_s16 + $0xa00] sm:$0xff]  ;;  %v680_v52 = vld [vmem:[%s11708_s16 + $0xa08] sm:$0xff] }
  0xd5   : > { %6663 = vmatprep.subr.bf16.mxu0 %v9655_v22  ;;  %6827 = vmatprep.subr.bf16.mxu1 %v9657_v23  ;;  %v631_v22 = vld [vmem:[%s11708_s16 + $0x880] sm:$0xff]  ;;  %v696_v62 = vld [vmem:[%s11708_s16 + $0xa88] sm:$0xff] }
  0xd6   : > { %v639_v23 = vld [vmem:[%s11708_s16 + $0x8c0] sm:$0xff]  ;;  %v712_v7 = vld [vmem:[%s11708_s16 + $0xb08] sm:$0xff] }
  0xd7   : > { %v687_v51 = vld [vmem:[%s11708_s16 + $0xa40] sm:$0xff] }
  0xd8   : > { %6664 = vmatpush1.bf16.msra.mxu0 %v9654_v28  ;;  %6828 = vmatpush1.bf16.msra.mxu1 %v9656_v29  ;;  %v1484_v28 = vcombine.high %v1482_v24, %v1482_v24  ;;  %v9768_v29 = vcombine.low %v616_v15, %v624_v16  ;;  %v695_v60 = vld [vmem:[%s11708_s16 + $0xa80] sm:$0xff]  ;;  %v728_v16 = vld [vmem:[%s11708_s16 + $0xb88] sm:$0xff] }
  0xd9   : > { %6665 = vmatprep.subr.bf16.mxu0 %v9671_v30  ;;  %6829 = vmatprep.subr.bf16.mxu1 %v9673_v31  ;;  %v9783_v30 = vcombine.high %v631_v22, %v639_v23  ;;  %v9785_v31 = vcombine.high %v632_v26, %v640_v27  ;;  %v703_v61 = vld [vmem:[%s11708_s16 + $0xac0] sm:$0xff]  ;;  %v744_v24 = vld [vmem:[%s11708_s16 + $0xc08] sm:$0xff] }
  0xda   : > { %v11825_v34 = vrot.slane %v1484_v28, %v11750_v53  ;;  %v663_v53 = vld [vmem:[%s11708_s16 + $0x980] sm:$0xff] }
  0xdb   : > { %v711_v5 = vld [vmem:[%s11708_s16 + $0xb00] sm:$0xff] }
  0xdc   : > { %6666 = vmatpush1.bf16.msra.mxu0 %v9670_v36  ;;  %6830 = vmatpush1.bf16.msra.mxu1 %v9672_v37  ;;  %v648_v36 = vld [vmem:[%s11708_s16 + $0x908] sm:$0xff]  ;;  %v719_v6 = vld [vmem:[%s11708_s16 + $0xb40] sm:$0xff] }
  0xdd   : > { %6667 = vmatprep.subr.bf16.mxu0 %v9687_v38  ;;  %6831 = vmatprep.subr.bf16.mxu1 %v9689_v39  ;;  %v656_v37 = vld [vmem:[%s11708_s16 + $0x948] sm:$0xff]  ;;  %v9782_v38 = vcombine.low %v631_v22, %v639_v23  ;;  %v9784_v39 = vcombine.low %v632_v26, %v640_v27  ;;  %v727_v14 = vld [vmem:[%s11708_s16 + $0xb80] sm:$0xff]  ;;  %v9862_v18 = vcombine.low %v711_v5, %v719_v6 }
  0xde   : > { %v9801_v41 = vcombine.high %v648_v36, %v656_v37  ;;  %v735_v15 = vld [vmem:[%s11708_s16 + $0xbc0] sm:$0xff]  ;;  %v752_v26 = vld [vmem:[%s11708_s16 + $0xc48] sm:$0xff] }
  0xdf   : > { %v743_v22 = vld [vmem:[%s11708_s16 + $0xc00] sm:$0xff]  ;;  %v9878_v27 = vcombine.low %v727_v14, %v735_v15 }
  0xe0   : > { %6668 = vmatpush1.bf16.msra.mxu0 %v9686_v45  ;;  %6832 = vmatpush1.bf16.msra.mxu1 %v9688_v46  ;;  %v672_v45 = vld [vmem:[%s11708_s16 + $0x9c8] sm:$0xff]  ;;  %v9798_v46 = vcombine.low %v647_v32, %v655_v33  ;;  %v751_v23 = vld [vmem:[%s11708_s16 + $0xc40] sm:$0xff] }
  0xe1   : > { %6669 = vmatprep.subr.bf16.mxu0 %v9703_v47  ;;  %6833 = vmatprep.subr.bf16.mxu1 %v9705_v48  ;;  %v9800_v47 = vcombine.low %v648_v36, %v656_v37  ;;  %v9815_v48 = vcombine.high %v663_v53, %v671_v42  ;;  %v9817_v49 = vcombine.high %v664_v44, %v672_v45  ;;  %v760_v32 = vld [vmem:[%s11708_s16 + $0xc88] sm:$0xff] }
  0xe2   : > { %v9895_v28 = vcombine.high %v743_v22, %v751_v23  ;;  %v768_v33 = vld [vmem:[%s11708_s16 + $0xcc8] sm:$0xff]  ;;  %v9894_v36 = vcombine.low %v743_v22, %v751_v23  ;;  %v9896_v37 = vcombine.low %v744_v24, %v752_v26 }
  0xe3   : > { %v856_v22 = vld [vmem:[%s11708_s16 + $0xf88] sm:$0xff] }
  0xe4   : > { %6670 = vmatpush1.bf16.msra.mxu0 %v9702_v54  ;;  %6834 = vmatpush1.bf16.msra.mxu1 %v9704_v55  ;;  %v688_v54 = vld [vmem:[%s11708_s16 + $0xa48] sm:$0xff]  ;;  %v9814_v55 = vcombine.low %v663_v53, %v671_v42 }
  0xe5   : > { %6671 = vmatprep.subr.bf16.mxu0 %v9719_v56  ;;  %6835 = vmatprep.subr.bf16.mxu1 %v9721_v57  ;;  %v9816_v56 = vcombine.low %v664_v44, %v672_v45  ;;  %v9831_v57 = vcombine.high %v679_v50, %v687_v51  ;;  %v9833_v58 = vcombine.high %v680_v52, %v688_v54  ;;  %v776_v53 = vld [vmem:[%s11708_s16 + $0xd08] sm:$0xff] }
  0xe6   : > { %v784_v42 = vld [vmem:[%s11708_s16 + $0xd48] sm:$0xff]  ;;  %v9912_v45 = vcombine.low %v760_v32, %v768_v33 }
  0xe7   : > { %v864_v23 = vld [vmem:[%s11708_s16 + $0xfc8] sm:$0xff] }
  0xe8   : > { %6672 = vmatpush1.bf16.msra.mxu0 %v9718_v0  ;;  %6836 = vmatpush1.bf16.msra.mxu1 %v9720_v1  ;;  %v704_v0 = vld [vmem:[%s11708_s16 + $0xac8] sm:$0xff]  ;;  %v9830_v1 = vcombine.low %v679_v50, %v687_v51 }
  0xe9   : > { %6673 = vmatprep.subr.bf16.mxu0 %v9735_v2  ;;  %6837 = vmatprep.subr.bf16.mxu1 %v9737_v3  ;;  %v9832_v2 = vcombine.low %v680_v52, %v688_v54  ;;  %v9847_v3 = vcombine.high %v695_v60, %v703_v61  ;;  %v9849_v4 = vcombine.high %v696_v62, %v704_v0  ;;  %v792_v50 = vld [vmem:[%s11708_s16 + $0xd88] sm:$0xff] }
  0xea   : > { %v800_v51 = vld [vmem:[%s11708_s16 + $0xdc8] sm:$0xff]  ;;  %v9928_v54 = vcombine.low %v776_v53, %v784_v42 }
  0xec   : > { %6674 = vmatpush1.bf16.msra.mxu0 %v9734_v8  ;;  %6838 = vmatpush1.bf16.msra.mxu1 %v9736_v10  ;;  %v720_v8 = vld [vmem:[%s11708_s16 + $0xb48] sm:$0xff]  ;;  %v9846_v10 = vcombine.low %v695_v60, %v703_v61 }
  0xed   : > { %6675 = vmatprep.subr.bf16.mxu0 %v9751_v11  ;;  %6839 = vmatprep.subr.bf16.mxu1 %v9753_v12  ;;  %v9848_v11 = vcombine.low %v696_v62, %v704_v0  ;;  %v9863_v12 = vcombine.high %v711_v5, %v719_v6  ;;  %v9865_v13 = vcombine.high %v712_v7, %v720_v8  ;;  %v808_v60 = vld [vmem:[%s11708_s16 + $0xe08] sm:$0xff] }
  0xee   : > { %v816_v61 = vld [vmem:[%s11708_s16 + $0xe48] sm:$0xff]  ;;  %v9944_v0 = vcombine.low %v792_v50, %v800_v51 }
  0xef   : > { %v824_v5 = vld [vmem:[%s11708_s16 + $0xe88] sm:$0xff] }
  0xf0   : > { %6676 = vmatpush1.bf16.msra.mxu0 %v9750_v17  ;;  %6840 = vmatpush1.bf16.msra.mxu1 %v9752_v19  ;;  %v736_v17 = vld [vmem:[%s11708_s16 + $0xbc8] sm:$0xff]  ;;  %v9864_v19 = vcombine.low %v712_v7, %v720_v8  ;;  %v9960_v8 = vcombine.low %v808_v60, %v816_v61 }
  0xf1   : > { %6686 = vmatprep.subr.bf16.mxu0 %v9767_v20  ;;  %6850 = vmatprep.subr.bf16.mxu1 %v9769_v21  ;;  %v9879_v20 = vcombine.high %v727_v14, %v735_v15  ;;  %v9881_v21 = vcombine.high %v728_v16, %v736_v17  ;;  %v832_v6 = vld [vmem:[%s11708_s16 + $0xec8] sm:$0xff] }
  0xf2   : > { %v840_v14 = vld [vmem:[%s11708_s16 + $0xf08] sm:$0xff] }
  0xf3   : > { %6678 = vmatmul.mubr.bf16.vlgmr.msra.gmra.mrb[0].mxu0 %v11814_v25  ;;  %6842 = vmatmul.mubr.bf16.vlgmr.msra.gmra.mrb[0].mxu1 %v11814_v25  ;;  %v848_v15 = vld [vmem:[%s11708_s16 + $0xf48] sm:$0xff] }
  0xf4   : > { %6687 = vmatpush1.bf16.msra.mxu0 %v9766_v59  ;;  %6851 = vmatpush1.bf16.msra.mxu1 %v9768_v29  ;;  %v9880_v59 = vcombine.low %v728_v16, %v736_v17  ;;  %v9897_v29 = vcombine.high %v744_v24, %v752_v26  ;;  %v9976_v17 = vcombine.low %v824_v5, %v832_v6 }
  0xf5   : > { %6688 = vmatprep.subr.bf16.mxu0 %v9783_v30  ;;  %6852 = vmatprep.subr.bf16.mxu1 %v9785_v31  ;;  %v759_v30 = vld [vmem:[%s11708_s16 + $0xc80] sm:$0xff]  ;;  %v9992_v26 = vcombine.low %v840_v14, %v848_v15 }
  0xf6   : > { %6718 = vmatprep.mubr.bf16.mxu0 %v11822_v63  ;;  %6882 = vmatprep.mubr.bf16.mxu1 %v11822_v63  ;;  %v767_v31 = vld [vmem:[%s11708_s16 + $0xcc0] sm:$0xff] }
  0xf7   : > { %v9910_v44 = vcombine.low %v759_v30, %v767_v31 }
  0xf8   : > { %6689 = vmatpush1.bf16.msra.mxu0 %v9782_v38  ;;  %6853 = vmatpush1.bf16.msra.mxu1 %v9784_v39  ;;  %v9911_v38 = vcombine.high %v759_v30, %v767_v31  ;;  %v9913_v39 = vcombine.high %v760_v32, %v768_v33  ;;  %v872_v30 = vld [vmem:[%s11708_s16 + $0x1008] sm:$0xff]  ;;  %v10008_v33 = vcombine.low %v856_v22, %v864_v23 }
  0xf9   : > { %6690 = vmatprep.subr.bf16.mxu0 %v9799_v40  ;;  %6854 = vmatprep.subr.bf16.mxu1 %v9801_v41  ;;  %v775_v40 = vld [vmem:[%s11708_s16 + $0xd00] sm:$0xff]  ;;  %v880_v31 = vld [vmem:[%s11708_s16 + $0x1048] sm:$0xff] }
  0xfa   : > { %v783_v41 = vld [vmem:[%s11708_s16 + $0xd40] sm:$0xff] }
  0xfb   : > { %v9926_v52 = vcombine.low %v775_v40, %v783_v41 }
  0xfc   : > { %6691 = vmatpush1.bf16.msra.mxu0 %v9798_v46  ;;  %6855 = vmatpush1.bf16.msra.mxu1 %v9800_v47  ;;  %v9927_v46 = vcombine.high %v775_v40, %v783_v41  ;;  %v9929_v47 = vcombine.high %v776_v53, %v784_v42  ;;  %v11896_v40 = vcombine.high %v11814_v25, %v11814_v25  ;;  %v888_v41 = vld [vmem:[%s11708_s16 + $0x1088] sm:$0xff] }
  0xfd   : > { %6692 = vmatprep.subr.bf16.mxu0 %v9815_v48  ;;  %6856 = vmatprep.subr.bf16.mxu1 %v9817_v49  ;;  %v791_v48 = vld [vmem:[%s11708_s16 + $0xd80] sm:$0xff]  ;;  %v896_v53 = vld [vmem:[%s11708_s16 + $0x10c8] sm:$0xff] }
  0xfe   : > { %v799_v49 = vld [vmem:[%s11708_s16 + $0xdc0] sm:$0xff] }
  0xff   : > { %v9942_v62 = vcombine.low %v791_v48, %v799_v49 }
 0x100   : > { %6693 = vmatpush1.bf16.msra.mxu0 %v9814_v55  ;;  %6857 = vmatpush1.bf16.msra.mxu1 %v9816_v56  ;;  %v9943_v55 = vcombine.high %v791_v48, %v799_v49  ;;  %v9945_v56 = vcombine.high %v792_v50, %v800_v51  ;;  %v911_v48 = vld [vmem:[%s11708_s16 + $0x1140] sm:$0xff]  ;;  %v904_v49 = vld [vmem:[%s11708_s16 + $0x1108] sm:$0xff] }
 0x101   : > { %6694 = vmatprep.subr.bf16.mxu0 %v9831_v57  ;;  %6858 = vmatprep.subr.bf16.mxu1 %v9833_v58  ;;  %v807_v57 = vld [vmem:[%s11708_s16 + $0xe00] sm:$0xff]  ;;  %v912_v50 = vld [vmem:[%s11708_s16 + $0x1148] sm:$0xff] }
 0x102   : > { %v815_v58 = vld [vmem:[%s11708_s16 + $0xe40] sm:$0xff] }
 0x103   : > { %v9958_v7 = vcombine.low %v807_v57, %v815_v58 }
 0x104   : > { %6695 = vmatpush1.bf16.msra.mxu0 %v9830_v1  ;;  %6859 = vmatpush1.bf16.msra.mxu1 %v9832_v2  ;;  %v9959_v1 = vcombine.high %v807_v57, %v815_v58  ;;  %v9961_v2 = vcombine.high %v808_v60, %v816_v61  ;;  %v927_v57 = vld [vmem:[%s11708_s16 + $0x11c0] sm:$0xff]  ;;  %v920_v58 = vld [vmem:[%s11708_s16 + $0x1188] sm:$0xff] }
 0x105   : > { %6696 = vmatprep.subr.bf16.mxu0 %v9847_v3  ;;  %6860 = vmatprep.subr.bf16.mxu1 %v9849_v4  ;;  %v823_v3 = vld [vmem:[%s11708_s16 + $0xe80] sm:$0xff]  ;;  %v928_v60 = vld [vmem:[%s11708_s16 + $0x11c8] sm:$0xff] }
 0x106   : > { %v831_v4 = vld [vmem:[%s11708_s16 + $0xec0] sm:$0xff] }
 0x107   : > { %v9974_v16 = vcombine.low %v823_v3, %v831_v4 }
 0x108   : > { %6697 = vmatpush1.bf16.msra.mxu0 %v9846_v10  ;;  %6861 = vmatpush1.bf16.msra.mxu1 %v9848_v11  ;;  %v9975_v10 = vcombine.high %v823_v3, %v831_v4  ;;  %v9977_v11 = vcombine.high %v824_v5, %v832_v6  ;;  %v943_v3 = vld [vmem:[%s11708_s16 + $0x1240] sm:$0xff]  ;;  %v936_v4 = vld [vmem:[%s11708_s16 + $0x1208] sm:$0xff] }
 0x109   : > { %6698 = vmatprep.subr.bf16.mxu0 %v9863_v12  ;;  %6862 = vmatprep.subr.bf16.mxu1 %v9865_v13  ;;  %v839_v12 = vld [vmem:[%s11708_s16 + $0xf00] sm:$0xff]  ;;  %v944_v5 = vld [vmem:[%s11708_s16 + $0x1248] sm:$0xff] }
 0x10a   : > { %v847_v13 = vld [vmem:[%s11708_s16 + $0xf40] sm:$0xff] }
 0x10b   : > { %v9990_v24 = vcombine.low %v839_v12, %v847_v13 }
 0x10c   : > { %6699 = vmatpush1.bf16.msra.mxu0 %v9862_v18  ;;  %6863 = vmatpush1.bf16.msra.mxu1 %v9864_v19  ;;  %v9991_v18 = vcombine.high %v839_v12, %v847_v13  ;;  %v9993_v19 = vcombine.high %v840_v14, %v848_v15  ;;  %v959_v12 = vld [vmem:[%s11708_s16 + $0x12c0] sm:$0xff]  ;;  %v952_v13 = vld [vmem:[%s11708_s16 + $0x1288] sm:$0xff] }
 0x10d   : > { %6700 = vmatprep.subr.bf16.mxu0 %v9879_v20  ;;  %6864 = vmatprep.subr.bf16.mxu1 %v9881_v21  ;;  %v855_v20 = vld [vmem:[%s11708_s16 + $0xf80] sm:$0xff]  ;;  %v960_v14 = vld [vmem:[%s11708_s16 + $0x12c8] sm:$0xff] }
 0x10e   : > { %v863_v21 = vld [vmem:[%s11708_s16 + $0xfc0] sm:$0xff] }
 0x10f   : > { %v10006_v32 = vcombine.low %v855_v20, %v863_v21 }
 0x110   : > { %6701 = vmatpush1.bf16.msra.mxu0 %v9878_v27  ;;  %6865 = vmatpush1.bf16.msra.mxu1 %v9880_v59  ;;  %v10007_v27 = vcombine.high %v855_v20, %v863_v21  ;;  %v10009_v59 = vcombine.high %v856_v22, %v864_v23  ;;  %v975_v20 = vld [vmem:[%s11708_s16 + $0x1340] sm:$0xff]  ;;  %v968_v21 = vld [vmem:[%s11708_s16 + $0x1308] sm:$0xff] }
 0x111   : > { %6702 = vmatprep.subr.bf16.mxu0 %v9895_v28  ;;  %6866 = vmatprep.subr.bf16.mxu1 %v9897_v29  ;;  %v871_v28 = vld [vmem:[%s11708_s16 + $0x1000] sm:$0xff]  ;;  %v976_v22 = vld [vmem:[%s11708_s16 + $0x1348] sm:$0xff] }
 0x112   : > { %v879_v29 = vld [vmem:[%s11708_s16 + $0x1040] sm:$0xff] }
 0x113   : > { %v10022_v42 = vcombine.low %v871_v28, %v879_v29 }
 0x114   : > { %6703 = vmatpush1.bf16.msra.mxu0 %v9894_v36  ;;  %6867 = vmatpush1.bf16.msra.mxu1 %v9896_v37  ;;  %v10023_v36 = vcombine.high %v871_v28, %v879_v29  ;;  %v10025_v37 = vcombine.high %v872_v30, %v880_v31  ;;  %v991_v28 = vld [vmem:[%s11708_s16 + $0x13c0] sm:$0xff]  ;;  %v984_v29 = vld [vmem:[%s11708_s16 + $0x1388] sm:$0xff] }
 0x115   : > { %6704 = vmatprep.subr.bf16.mxu0 %v9911_v38  ;;  %6868 = vmatprep.subr.bf16.mxu1 %v9913_v39  ;;  %v887_v38 = vld [vmem:[%s11708_s16 + $0x1080] sm:$0xff] }
 0x116   : > { %v895_v39 = vld [vmem:[%s11708_s16 + $0x10c0] sm:$0xff] }
 0x117   : > { %v10038_v51 = vcombine.low %v887_v38, %v895_v39 }
 0x118   : > { %6705 = vmatpush1.bf16.msra.mxu0 %v9910_v44  ;;  %6869 = vmatpush1.bf16.msra.mxu1 %v9912_v45  ;;  %v10024_v44 = vcombine.low %v872_v30, %v880_v31  ;;  %v10039_v45 = vcombine.high %v887_v38, %v895_v39  ;;  %v992_v30 = vld [vmem:[%s11708_s16 + $0x13c8] sm:$0xff]  ;;  %v1007_v38 = vld [vmem:[%s11708_s16 + $0x1440] sm:$0xff] }
 0x119   : > { %6706 = vmatprep.subr.bf16.mxu0 %v9927_v46  ;;  %6870 = vmatprep.subr.bf16.mxu1 %v9929_v47  ;;  %v10041_v46 = vcombine.high %v888_v41, %v896_v53  ;;  %v903_v47 = vld [vmem:[%s11708_s16 + $0x1100] sm:$0xff]  ;;  %v1000_v39 = vld [vmem:[%s11708_s16 + $0x1408] sm:$0xff] }
 0x11a   : > { %v10054_v61 = vcombine.low %v903_v47, %v911_v48 }
 0x11c   : > { %6707 = vmatpush1.bf16.msra.mxu0 %v9926_v52  ;;  %6871 = vmatpush1.bf16.msra.mxu1 %v9928_v54  ;;  %v10040_v52 = vcombine.low %v888_v41, %v896_v53  ;;  %v10055_v54 = vcombine.high %v903_v47, %v911_v48  ;;  %v1008_v41 = vld [vmem:[%s11708_s16 + $0x1448] sm:$0xff]  ;;  %v1023_v47 = vld [vmem:[%s11708_s16 + $0x14c0] sm:$0xff] }
 0x11d   : > { %6708 = vmatprep.subr.bf16.mxu0 %v9943_v55  ;;  %6872 = vmatprep.subr.bf16.mxu1 %v9945_v56  ;;  %v10057_v55 = vcombine.high %v904_v49, %v912_v50  ;;  %v919_v56 = vld [vmem:[%s11708_s16 + $0x1180] sm:$0xff]  ;;  %v1016_v48 = vld [vmem:[%s11708_s16 + $0x1488] sm:$0xff] }
 0x11e   : > { %v10070_v6 = vcombine.low %v919_v56, %v927_v57 }
 0x120   : > { %6709 = vmatpush1.bf16.msra.mxu0 %v9942_v62  ;;  %6873 = vmatpush1.bf16.msra.mxu1 %v9944_v0  ;;  %v10056_v62 = vcombine.low %v904_v49, %v912_v50  ;;  %v10071_v0 = vcombine.high %v919_v56, %v927_v57  ;;  %v1024_v49 = vld [vmem:[%s11708_s16 + $0x14c8] sm:$0xff]  ;;  %v1039_v56 = vld [vmem:[%s11708_s16 + $0x1540] sm:$0xff] }
 0x121   : > { %6710 = vmatprep.subr.bf16.mxu0 %v9959_v1  ;;  %6874 = vmatprep.subr.bf16.mxu1 %v9961_v2  ;;  %v10073_v1 = vcombine.high %v920_v58, %v928_v60  ;;  %v935_v2 = vld [vmem:[%s11708_s16 + $0x1200] sm:$0xff]  ;;  %v1032_v57 = vld [vmem:[%s11708_s16 + $0x1508] sm:$0xff] }
 0x122   : > { %v10086_v15 = vcombine.low %v935_v2, %v943_v3 }
 0x124   : > { %6711 = vmatpush1.bf16.msra.mxu0 %v9958_v7  ;;  %6875 = vmatpush1.bf16.msra.mxu1 %v9960_v8  ;;  %v10072_v7 = vcombine.low %v920_v58, %v928_v60  ;;  %v10087_v8 = vcombine.high %v935_v2, %v943_v3  ;;  %v1040_v58 = vld [vmem:[%s11708_s16 + $0x1548] sm:$0xff]  ;;  %v1055_v2 = vld [vmem:[%s11708_s16 + $0x15c0] sm:$0xff] }
 0x125   : > { %6712 = vmatprep.subr.bf16.mxu0 %v9975_v10  ;;  %6876 = vmatprep.subr.bf16.mxu1 %v9977_v11  ;;  %v10089_v10 = vcombine.high %v936_v4, %v944_v5  ;;  %v951_v11 = vld [vmem:[%s11708_s16 + $0x1280] sm:$0xff]  ;;  %v1048_v3 = vld [vmem:[%s11708_s16 + $0x1588] sm:$0xff] }
 0x126   : > { %v10102_v23 = vcombine.low %v951_v11, %v959_v12 }
 0x128   : > { %6713 = vmatpush1.bf16.msra.mxu0 %v9974_v16  ;;  %6877 = vmatpush1.bf16.msra.mxu1 %v9976_v17  ;;  %v10088_v16 = vcombine.low %v936_v4, %v944_v5  ;;  %v10103_v17 = vcombine.high %v951_v11, %v959_v12  ;;  %v1056_v4 = vld [vmem:[%s11708_s16 + $0x15c8] sm:$0xff]  ;;  %v1071_v11 = vld [vmem:[%s11708_s16 + $0x1640] sm:$0xff] }
 0x129   : > { %6714 = vmatprep.subr.bf16.mxu0 %v9991_v18  ;;  %6878 = vmatprep.subr.bf16.mxu1 %v9993_v19  ;;  %v10105_v18 = vcombine.high %v952_v13, %v960_v14  ;;  %v967_v19 = vld [vmem:[%s11708_s16 + $0x1300] sm:$0xff]  ;;  %v1064_v12 = vld [vmem:[%s11708_s16 + $0x1608] sm:$0xff] }
 0x12a   : > { %v10118_v31 = vcombine.low %v967_v19, %v975_v20 }
 0x12c   : > { %6715 = vmatpush1.bf16.msra.mxu0 %v9990_v24  ;;  %6879 = vmatpush1.bf16.msra.mxu1 %v9992_v26  ;;  %v10104_v24 = vcombine.low %v952_v13, %v960_v14  ;;  %v10119_v26 = vcombine.high %v967_v19, %v975_v20  ;;  %v1072_v13 = vld [vmem:[%s11708_s16 + $0x1648] sm:$0xff]  ;;  %v1087_v19 = vld [vmem:[%s11708_s16 + $0x16c0] sm:$0xff] }
 0x12d   : > { %6716 = vmatprep.subr.bf16.mxu0 %v10007_v27  ;;  %6880 = vmatprep.subr.bf16.mxu1 %v10009_v59  ;;  %v10121_v27 = vcombine.high %v968_v21, %v976_v22  ;;  %v983_v59 = vld [vmem:[%s11708_s16 + $0x1380] sm:$0xff]  ;;  %v1080_v20 = vld [vmem:[%s11708_s16 + $0x1688] sm:$0xff] }
 0x12e   : > { %v10134_v53 = vcombine.low %v983_v59, %v991_v28 }
 0x130   : > { %6717 = vmatpush1.bf16.msra.mxu0 %v10006_v32  ;;  %6881 = vmatpush1.bf16.msra.mxu1 %v10008_v33  ;;  %v10120_v32 = vcombine.low %v968_v21, %v976_v22  ;;  %v10135_v33 = vcombine.high %v983_v59, %v991_v28  ;;  %v1088_v21 = vld [vmem:[%s11708_s16 + $0x16c8] sm:$0xff]  ;;  %v1103_v59 = vld [vmem:[%s11708_s16 + $0x1740] sm:$0xff] }
 0x131   : > { %6727 = vmatprep.subr.bf16.mxu0 %v10023_v36  ;;  %6891 = vmatprep.subr.bf16.mxu1 %v10025_v37  ;;  %v10137_v36 = vcombine.high %v984_v29, %v992_v30  ;;  %v999_v37 = vld [vmem:[%s11708_s16 + $0x1400] sm:$0xff]  ;;  %v1096_v28 = vld [vmem:[%s11708_s16 + $0x1708] sm:$0xff] }
 0x132   : > { %v10150_v50 = vcombine.low %v999_v37, %v1007_v38 }
 0x133   : > { %6719 = vmatmul.mubr.bf16.vlgmr.msra.gmra.mrb[0].mxu0 %v11896_v40  ;;  %6883 = vmatmul.mubr.bf16.vlgmr.msra.gmra.mrb[0].mxu1 %v11896_v40 }
 0x134   : > { %6728 = vmatpush1.bf16.msra.mxu0 %v10022_v42  ;;  %6892 = vmatpush1.bf16.msra.mxu1 %v10024_v44  ;;  %v10136_v42 = vcombine.low %v984_v29, %v992_v30  ;;  %v10151_v44 = vcombine.high %v999_v37, %v1007_v38  ;;  %v1104_v29 = vld [vmem:[%s11708_s16 + $0x1748] sm:$0xff]  ;;  %v1119_v37 = vld [vmem:[%s11708_s16 + $0x17c0] sm:$0xff] }
 0x135   : > { %6729 = vmatprep.subr.bf16.mxu0 %v10039_v45  ;;  %6893 = vmatprep.subr.bf16.mxu1 %v10041_v46  ;;  %v10153_v45 = vcombine.high %v1000_v39, %v1008_v41  ;;  %v1015_v46 = vld [vmem:[%s11708_s16 + $0x1480] sm:$0xff]  ;;  %v1112_v38 = vld [vmem:[%s11708_s16 + $0x1788] sm:$0xff] }
 0x136   : > { %6759 = vmatprep.mubr.bf16.mxu0 %v11825_v34  ;;  %6923 = vmatprep.mubr.bf16.mxu1 %v11825_v34  ;;  %v10166_v60 = vcombine.low %v1015_v46, %v1023_v47 }
 0x138   : > { %6730 = vmatpush1.bf16.msra.mxu0 %v10038_v51  ;;  %6894 = vmatpush1.bf16.msra.mxu1 %v10040_v52  ;;  %v10152_v51 = vcombine.low %v1000_v39, %v1008_v41  ;;  %v10167_v52 = vcombine.high %v1015_v46, %v1023_v47  ;;  %v1120_v39 = vld [vmem:[%s11708_s16 + $0x17c8] sm:$0xff]  ;;  %v1135_v46 = vld [vmem:[%s11708_s16 + $0x1840] sm:$0xff] }
 0x139   : > { %6731 = vmatprep.subr.bf16.mxu0 %v10055_v54  ;;  %6895 = vmatprep.subr.bf16.mxu1 %v10057_v55  ;;  %v10169_v54 = vcombine.high %v1016_v48, %v1024_v49  ;;  %v1031_v55 = vld [vmem:[%s11708_s16 + $0x1500] sm:$0xff]  ;;  %v1128_v47 = vld [vmem:[%s11708_s16 + $0x1808] sm:$0xff] }
 0x13a   : > { %v10182_v5 = vcombine.low %v1031_v55, %v1039_v56 }
 0x13c   : > { %6732 = vmatpush1.bf16.msra.mxu0 %v10054_v61  ;;  %6896 = vmatpush1.bf16.msra.mxu1 %v10056_v62  ;;  %v10168_v61 = vcombine.low %v1016_v48, %v1024_v49  ;;  %v10183_v62 = vcombine.high %v1031_v55, %v1039_v56  ;;  %v1136_v48 = vld [vmem:[%s11708_s16 + $0x1848] sm:$0xff]  ;;  %v1151_v55 = vld [vmem:[%s11708_s16 + $0x18c0] sm:$0xff] }
 0x13d   : > { %6733 = vmatprep.subr.bf16.mxu0 %v10071_v0  ;;  %6897 = vmatprep.subr.bf16.mxu1 %v10073_v1  ;;  %v10185_v0 = vcombine.high %v1032_v57, %v1040_v58  ;;  %v1047_v1 = vld [vmem:[%s11708_s16 + $0x1580] sm:$0xff]  ;;  %v1144_v56 = vld [vmem:[%s11708_s16 + $0x1888] sm:$0xff] }
 0x13e   : > { %v10198_v14 = vcombine.low %v1047_v1, %v1055_v2 }
 0x140   : > { %6734 = vmatpush1.bf16.msra.mxu0 %v10070_v6  ;;  %6898 = vmatpush1.bf16.msra.mxu1 %v10072_v7  ;;  %v10184_v6 = vcombine.low %v1032_v57, %v1040_v58  ;;  %v10199_v7 = vcombine.high %v1047_v1, %v1055_v2  ;;  %v1152_v57 = vld [vmem:[%s11708_s16 + $0x18c8] sm:$0xff]  ;;  %v1167_v1 = vld [vmem:[%s11708_s16 + $0x1940] sm:$0xff]  ;;  %v11972_v2 = vcombine.high %v11825_v34, %v11825_v34 }
 0x141   : > { %6735 = vmatprep.subr.bf16.mxu0 %v10087_v8  ;;  %6899 = vmatprep.subr.bf16.mxu1 %v10089_v10  ;;  %v10201_v8 = vcombine.high %v1048_v3, %v1056_v4  ;;  %v1063_v10 = vld [vmem:[%s11708_s16 + $0x1600] sm:$0xff] }
 0x142   : > { %v10214_v22 = vcombine.low %v1063_v10, %v1071_v11 }
 0x144   : > { %6736 = vmatpush1.bf16.msra.mxu0 %v10086_v15  ;;  %6900 = vmatpush1.bf16.msra.mxu1 %v10088_v16  ;;  %v10200_v15 = vcombine.low %v1048_v3, %v1056_v4  ;;  %v10215_v16 = vcombine.high %v1063_v10, %v1071_v11  ;;  %v1160_v3 = vld [vmem:[%s11708_s16 + $0x1908] sm:$0xff]  ;;  %v1175_v10 = vld [vmem:[%s11708_s16 + $0x1980] sm:$0xff] }
 0x145   : > { %6737 = vmatprep.subr.bf16.mxu0 %v10103_v17  ;;  %6901 = vmatprep.subr.bf16.mxu1 %v10105_v18  ;;  %v10217_v17 = vcombine.high %v1064_v12, %v1072_v13  ;;  %v1079_v18 = vld [vmem:[%s11708_s16 + $0x1680] sm:$0xff]  ;;  %v1168_v4 = vld [vmem:[%s11708_s16 + $0x1948] sm:$0xff] }
 0x146   : > { %v10230_v30 = vcombine.low %v1079_v18, %v1087_v19  ;;  %v1183_v11 = vld [vmem:[%s11708_s16 + $0x19c0] sm:$0xff] }
 0x148   : > { %6738 = vmatpush1.bf16.msra.mxu0 %v10102_v23  ;;  %6902 = vmatpush1.bf16.msra.mxu1 %v10104_v24  ;;  %v10216_v23 = vcombine.low %v1064_v12, %v1072_v13  ;;  %v10231_v24 = vcombine.high %v1079_v18, %v1087_v19  ;;  %v1176_v12 = vld [vmem:[%s11708_s16 + $0x1988] sm:$0xff]  ;;  %v1191_v18 = vld [vmem:[%s11708_s16 + $0x1a00] sm:$0xff] }
 0x149   : > { %6739 = vmatprep.subr.bf16.mxu0 %v10119_v26  ;;  %6903 = vmatprep.subr.bf16.mxu1 %v10121_v27  ;;  %v10233_v26 = vcombine.high %v1080_v20, %v1088_v21  ;;  %v1095_v27 = vld [vmem:[%s11708_s16 + $0x1700] sm:$0xff]  ;;  %v1184_v13 = vld [vmem:[%s11708_s16 + $0x19c8] sm:$0xff] }
 0x14a   : > { %v10246_v41 = vcombine.low %v1095_v27, %v1103_v59  ;;  %v1199_v19 = vld [vmem:[%s11708_s16 + $0x1a40] sm:$0xff] }
 0x14c   : > { %6740 = vmatpush1.bf16.msra.mxu0 %v10118_v31  ;;  %6904 = vmatpush1.bf16.msra.mxu1 %v10120_v32  ;;  %v10232_v31 = vcombine.low %v1080_v20, %v1088_v21  ;;  %v10247_v32 = vcombine.high %v1095_v27, %v1103_v59  ;;  %v1192_v20 = vld [vmem:[%s11708_s16 + $0x1a08] sm:$0xff]  ;;  %v1207_v27 = vld [vmem:[%s11708_s16 + $0x1a80] sm:$0xff] }
 0x14d   : > { %6741 = vmatprep.subr.bf16.mxu0 %v10135_v33  ;;  %6905 = vmatprep.subr.bf16.mxu1 %v10137_v36  ;;  %v10249_v33 = vcombine.high %v1096_v28, %v1104_v29  ;;  %v1111_v36 = vld [vmem:[%s11708_s16 + $0x1780] sm:$0xff]  ;;  %v1200_v21 = vld [vmem:[%s11708_s16 + $0x1a48] sm:$0xff] }
 0x14e   : > { %v10262_v49 = vcombine.low %v1111_v36, %v1119_v37  ;;  %v1215_v59 = vld [vmem:[%s11708_s16 + $0x1ac0] sm:$0xff] }
 0x150   : > { %6742 = vmatpush1.bf16.msra.mxu0 %v10134_v53  ;;  %6906 = vmatpush1.bf16.msra.mxu1 %v10136_v42  ;;  %v10248_v53 = vcombine.low %v1096_v28, %v1104_v29  ;;  %v10263_v42 = vcombine.high %v1111_v36, %v1119_v37  ;;  %v1208_v28 = vld [vmem:[%s11708_s16 + $0x1a88] sm:$0xff]  ;;  %v1223_v36 = vld [vmem:[%s11708_s16 + $0x1b00] sm:$0xff] }
 0x151   : > { %6743 = vmatprep.subr.bf16.mxu0 %v10151_v44  ;;  %6907 = vmatprep.subr.bf16.mxu1 %v10153_v45  ;;  %v10265_v44 = vcombine.high %v1112_v38, %v1120_v39  ;;  %v1127_v45 = vld [vmem:[%s11708_s16 + $0x1800] sm:$0xff]  ;;  %v1216_v29 = vld [vmem:[%s11708_s16 + $0x1ac8] sm:$0xff] }
 0x152   : > { %v10278_v58 = vcombine.low %v1127_v45, %v1135_v46  ;;  %v1231_v37 = vld [vmem:[%s11708_s16 + $0x1b40] sm:$0xff] }
 0x154   : > { %6744 = vmatpush1.bf16.msra.mxu0 %v10150_v50  ;;  %6908 = vmatpush1.bf16.msra.mxu1 %v10152_v51  ;;  %v10264_v50 = vcombine.low %v1112_v38, %v1120_v39  ;;  %v10279_v51 = vcombine.high %v1127_v45, %v1135_v46  ;;  %v1224_v38 = vld [vmem:[%s11708_s16 + $0x1b08] sm:$0xff]  ;;  %v1239_v45 = vld [vmem:[%s11708_s16 + $0x1b80] sm:$0xff] }
 0x155   : > { %6745 = vmatprep.subr.bf16.mxu0 %v10167_v52  ;;  %6909 = vmatprep.subr.bf16.mxu1 %v10169_v54  ;;  %v10281_v52 = vcombine.high %v1128_v47, %v1136_v48  ;;  %v1143_v54 = vld [vmem:[%s11708_s16 + $0x1880] sm:$0xff]  ;;  %v1232_v39 = vld [vmem:[%s11708_s16 + $0x1b48] sm:$0xff] }
 0x156   : > { %v1247_v46 = vld [vmem:[%s11708_s16 + $0x1bc0] sm:$0xff] }
 0x158   : > { %6746 = vmatpush1.bf16.msra.mxu0 %v10166_v60  ;;  %6910 = vmatpush1.bf16.msra.mxu1 %v10168_v61  ;;  %v10280_v60 = vcombine.low %v1128_v47, %v1136_v48  ;;  %v10295_v61 = vcombine.high %v1143_v54, %v1151_v55  ;;  %v1240_v47 = vld [vmem:[%s11708_s16 + $0x1b88] sm:$0xff] }
 0x159   : > { %6747 = vmatprep.subr.bf16.mxu0 %v10183_v62  ;;  %6911 = vmatprep.subr.bf16.mxu1 %v10185_v0  ;;  %v10297_v62 = vcombine.high %v1144_v56, %v1152_v57  ;;  %v1159_v0 = vld [vmem:[%s11708_s16 + $0x1900] sm:$0xff]  ;;  %v1248_v48 = vld [vmem:[%s11708_s16 + $0x1bc8] sm:$0xff] }
 0x15c   : > { %6748 = vmatpush1.bf16.msra.mxu0 %v10182_v5  ;;  %6912 = vmatpush1.bf16.msra.mxu1 %v10184_v6  ;;  %v10294_v5 = vcombine.low %v1143_v54, %v1151_v55  ;;  %v10296_v6 = vcombine.low %v1144_v56, %v1152_v57  ;;  %v1255_v54 = vld [vmem:[%s11708_s16 + $0x1c00] sm:$0xff]  ;;  %v1256_v56 = vld [vmem:[%s11708_s16 + $0x1c08] sm:$0xff] }
 0x15d   : > { %6749 = vmatprep.subr.bf16.mxu0 %v10199_v7  ;;  %6913 = vmatprep.subr.bf16.mxu1 %v10201_v8  ;;  %v10311_v7 = vcombine.high %v1159_v0, %v1167_v1  ;;  %v10313_v8 = vcombine.high %v1160_v3, %v1168_v4  ;;  %v1263_v55 = vld [vmem:[%s11708_s16 + $0x1c40] sm:$0xff]  ;;  %v1264_v57 = vld [vmem:[%s11708_s16 + $0x1c48] sm:$0xff] }
 0x160   : > { %6750 = vmatpush1.bf16.msra.mxu0 %v10198_v14  ;;  %6914 = vmatpush1.bf16.msra.mxu1 %v10200_v15  ;;  %v10310_v14 = vcombine.low %v1159_v0, %v1167_v1  ;;  %v10312_v15 = vcombine.low %v1160_v3, %v1168_v4  ;;  %v1271_v0 = vld [vmem:[%s11708_s16 + $0x1c80] sm:$0xff]  ;;  %v1272_v3 = vld [vmem:[%s11708_s16 + $0x1c88] sm:$0xff] }
 0x161   : > { %6751 = vmatprep.subr.bf16.mxu0 %v10215_v16  ;;  %6915 = vmatprep.subr.bf16.mxu1 %v10217_v17  ;;  %v10327_v16 = vcombine.high %v1175_v10, %v1183_v11  ;;  %v10329_v17 = vcombine.high %v1176_v12, %v1184_v13  ;;  %v1279_v1 = vld [vmem:[%s11708_s16 + $0x1cc0] sm:$0xff]  ;;  %v1280_v4 = vld [vmem:[%s11708_s16 + $0x1cc8] sm:$0xff] }
 0x164   : > { %6752 = vmatpush1.bf16.msra.mxu0 %v10214_v22  ;;  %6916 = vmatpush1.bf16.msra.mxu1 %v10216_v23  ;;  %v10326_v22 = vcombine.low %v1175_v10, %v1183_v11  ;;  %v10328_v23 = vcombine.low %v1176_v12, %v1184_v13  ;;  %v1287_v10 = vld [vmem:[%s11708_s16 + $0x1d00] sm:$0xff]  ;;  %v1288_v12 = vld [vmem:[%s11708_s16 + $0x1d08] sm:$0xff] }
 0x165   : > { %6753 = vmatprep.subr.bf16.mxu0 %v10231_v24  ;;  %6917 = vmatprep.subr.bf16.mxu1 %v10233_v26  ;;  %v10343_v24 = vcombine.high %v1191_v18, %v1199_v19  ;;  %v10345_v26 = vcombine.high %v1192_v20, %v1200_v21  ;;  %v1295_v11 = vld [vmem:[%s11708_s16 + $0x1d40] sm:$0xff]  ;;  %v1296_v13 = vld [vmem:[%s11708_s16 + $0x1d48] sm:$0xff] }
 0x168   : > { %6754 = vmatpush1.bf16.msra.mxu0 %v10230_v30  ;;  %6918 = vmatpush1.bf16.msra.mxu1 %v10232_v31  ;;  %v10342_v30 = vcombine.low %v1191_v18, %v1199_v19  ;;  %v10344_v31 = vcombine.low %v1192_v20, %v1200_v21  ;;  %v1303_v18 = vld [vmem:[%s11708_s16 + $0x1d80] sm:$0xff]  ;;  %v1304_v20 = vld [vmem:[%s11708_s16 + $0x1d88] sm:$0xff] }
 0x169   : > { %6755 = vmatprep.subr.bf16.mxu0 %v10247_v32  ;;  %6919 = vmatprep.subr.bf16.mxu1 %v10249_v33  ;;  %v10359_v32 = vcombine.high %v1207_v27, %v1215_v59  ;;  %v10361_v33 = vcombine.high %v1208_v28, %v1216_v29  ;;  %v1311_v19 = vld [vmem:[%s11708_s16 + $0x1dc0] sm:$0xff]  ;;  %v1312_v21 = vld [vmem:[%s11708_s16 + $0x1dc8] sm:$0xff] }
 0x16c   : > { %6756 = vmatpush1.bf16.msra.mxu0 %v10246_v41  ;;  %6920 = vmatpush1.bf16.msra.mxu1 %v10248_v53  ;;  %v10358_v41 = vcombine.low %v1207_v27, %v1215_v59  ;;  %v10360_v53 = vcombine.low %v1208_v28, %v1216_v29  ;;  %v1319_v27 = vld [vmem:[%s11708_s16 + $0x1e00] sm:$0xff]  ;;  %v1320_v28 = vld [vmem:[%s11708_s16 + $0x1e08] sm:$0xff] }
 0x16d   : > { %6757 = vmatprep.subr.bf16.mxu0 %v10263_v42  ;;  %6921 = vmatprep.subr.bf16.mxu1 %v10265_v44  ;;  %v10375_v42 = vcombine.high %v1223_v36, %v1231_v37  ;;  %v10377_v44 = vcombine.high %v1224_v38, %v1232_v39  ;;  %v1327_v59 = vld [vmem:[%s11708_s16 + $0x1e40] sm:$0xff]  ;;  %v1328_v29 = vld [vmem:[%s11708_s16 + $0x1e48] sm:$0xff] }
 0x170   : > { %6758 = vmatpush1.bf16.msra.mxu0 %v10262_v49  ;;  %6922 = vmatpush1.bf16.msra.mxu1 %v10264_v50  ;;  %v10374_v49 = vcombine.low %v1223_v36, %v1231_v37  ;;  %v10376_v50 = vcombine.low %v1224_v38, %v1232_v39  ;;  %v1335_v36 = vld [vmem:[%s11708_s16 + $0x1e80] sm:$0xff]  ;;  %v1336_v38 = vld [vmem:[%s11708_s16 + $0x1e88] sm:$0xff] }
 0x171   : > { %6768 = vmatprep.subr.bf16.mxu0 %v10279_v51  ;;  %6932 = vmatprep.subr.bf16.mxu1 %v10281_v52  ;;  %v10391_v51 = vcombine.high %v1239_v45, %v1247_v46  ;;  %v10393_v52 = vcombine.high %v1240_v47, %v1248_v48  ;;  %v1343_v37 = vld [vmem:[%s11708_s16 + $0x1ec0] sm:$0xff]  ;;  %v1344_v39 = vld [vmem:[%s11708_s16 + $0x1ec8] sm:$0xff] }
 0x173   : > { %6760 = vmatmul.mubr.bf16.vlgmr.msra.gmra.mrb[0].mxu0 %v11828_v35  ;;  %6924 = vmatmul.mubr.bf16.vlgmr.msra.gmra.mrb[0].mxu1 %v11828_v35 }
 0x174   : > { %6769 = vmatpush1.bf16.msra.mxu0 %v10278_v58  ;;  %6933 = vmatpush1.bf16.msra.mxu1 %v10280_v60  ;;  %v10390_v58 = vcombine.low %v1239_v45, %v1247_v46  ;;  %v10392_v60 = vcombine.low %v1240_v47, %v1248_v48  ;;  %v1351_v45 = vld [vmem:[%s11708_s16 + $0x1f00] sm:$0xff]  ;;  %v1352_v47 = vld [vmem:[%s11708_s16 + $0x1f08] sm:$0xff] }
 0x175   : > { %6770 = vmatprep.subr.bf16.mxu0 %v10295_v61  ;;  %6934 = vmatprep.subr.bf16.mxu1 %v10297_v62  ;;  %v10407_v61 = vcombine.high %v1255_v54, %v1263_v55  ;;  %v10409_v62 = vcombine.high %v1256_v56, %v1264_v57  ;;  %v1359_v46 = vld [vmem:[%s11708_s16 + $0x1f40] sm:$0xff]  ;;  %v1360_v48 = vld [vmem:[%s11708_s16 + $0x1f48] sm:$0xff] }
 0x176   : > { %6800 = vmatprep.mubr.bf16.mxu0 %v11972_v2  ;;  %6964 = vmatprep.mubr.bf16.mxu1 %v11972_v2 }
 0x178   : > { %6771 = vmatpush1.bf16.msra.mxu0 %v10294_v5  ;;  %6935 = vmatpush1.bf16.msra.mxu1 %v10296_v6  ;;  %v10406_v5 = vcombine.low %v1255_v54, %v1263_v55  ;;  %v10408_v6 = vcombine.low %v1256_v56, %v1264_v57  ;;  %v1367_v54 = vld [vmem:[%s11708_s16 + $0x1f80] sm:$0xff]  ;;  %v1368_v56 = vld [vmem:[%s11708_s16 + $0x1f88] sm:$0xff] }
 0x179   : > { %6772 = vmatprep.subr.bf16.mxu0 %v10311_v7  ;;  %6936 = vmatprep.subr.bf16.mxu1 %v10313_v8  ;;  %v10423_v7 = vcombine.high %v1271_v0, %v1279_v1  ;;  %v10425_v8 = vcombine.high %v1272_v3, %v1280_v4  ;;  %v1375_v55 = vld [vmem:[%s11708_s16 + $0x1fc0] sm:$0xff]  ;;  %v1376_v57 = vld [vmem:[%s11708_s16 + $0x1fc8] sm:$0xff] }
 0x17c   : > { %6773 = vmatpush1.bf16.msra.mxu0 %v10310_v14  ;;  %6937 = vmatpush1.bf16.msra.mxu1 %v10312_v15  ;;  %v10422_v14 = vcombine.low %v1271_v0, %v1279_v1  ;;  %v10424_v15 = vcombine.low %v1272_v3, %v1280_v4  ;;  %v361_v0 = vld [vmem:[%s11708_s16 + $0x10] sm:$0xff]  ;;  %v362_v3 = vld [vmem:[%s11708_s16 + $0x18] sm:$0xff] }
 0x17d   : > { %6774 = vmatprep.subr.bf16.mxu0 %v10327_v16  ;;  %6938 = vmatprep.subr.bf16.mxu1 %v10329_v17  ;;  %v10439_v16 = vcombine.high %v1287_v10, %v1295_v11  ;;  %v10441_v17 = vcombine.high %v1288_v12, %v1296_v13  ;;  %v369_v1 = vld [vmem:[%s11708_s16 + $0x50] sm:$0xff]  ;;  %v370_v4 = vld [vmem:[%s11708_s16 + $0x58] sm:$0xff] }
 0x180   : > { %6775 = vmatpush1.bf16.msra.mxu0 %v10326_v22  ;;  %6939 = vmatpush1.bf16.msra.mxu1 %v10328_v23  ;;  %v10438_v22 = vcombine.low %v1287_v10, %v1295_v11  ;;  %v10440_v23 = vcombine.low %v1288_v12, %v1296_v13  ;;  %v377_v10 = vld [vmem:[%s11708_s16 + $0x90] sm:$0xff]  ;;  %v12040_v12 = vcombine.high %v11828_v35, %v11828_v35  ;;  %v378_v13 = vld [vmem:[%s11708_s16 + $0x98] sm:$0xff] }
 0x181   : > { %6776 = vmatprep.subr.bf16.mxu0 %v10343_v24  ;;  %6940 = vmatprep.subr.bf16.mxu1 %v10345_v26  ;;  %v10455_v24 = vcombine.high %v1303_v18, %v1311_v19  ;;  %v10457_v26 = vcombine.high %v1304_v20, %v1312_v21  ;;  %v385_v11 = vld [vmem:[%s11708_s16 + $0xd0] sm:$0xff] }
 0x184   : > { %6777 = vmatpush1.bf16.msra.mxu0 %v10342_v30  ;;  %6941 = vmatpush1.bf16.msra.mxu1 %v10344_v31  ;;  %v10454_v30 = vcombine.low %v1303_v18, %v1311_v19  ;;  %v10456_v31 = vcombine.low %v1304_v20, %v1312_v21  ;;  %v393_v19 = vld [vmem:[%s11708_s16 + $0x110] sm:$0xff]  ;;  %v394_v21 = vld [vmem:[%s11708_s16 + $0x118] sm:$0xff] }
 0x185   : > { %6778 = vmatprep.subr.bf16.mxu0 %v10359_v32  ;;  %6942 = vmatprep.subr.bf16.mxu1 %v10361_v33  ;;  %v10471_v32 = vcombine.high %v1319_v27, %v1327_v59  ;;  %v10473_v33 = vcombine.high %v1320_v28, %v1328_v29  ;;  %v401_v20 = vld [vmem:[%s11708_s16 + $0x150] sm:$0xff] }
 0x188   : > { %6779 = vmatpush1.bf16.msra.mxu0 %v10358_v41  ;;  %6943 = vmatpush1.bf16.msra.mxu1 %v10360_v53  ;;  %v10470_v41 = vcombine.low %v1319_v27, %v1327_v59  ;;  %v10472_v53 = vcombine.low %v1320_v28, %v1328_v29  ;;  %v409_v59 = vld [vmem:[%s11708_s16 + $0x190] sm:$0xff]  ;;  %v410_v29 = vld [vmem:[%s11708_s16 + $0x198] sm:$0xff] }
 0x189   : > { %6780 = vmatprep.subr.bf16.mxu0 %v10375_v42  ;;  %6944 = vmatprep.subr.bf16.mxu1 %v10377_v44  ;;  %v10487_v42 = vcombine.high %v1335_v36, %v1343_v37  ;;  %v10489_v44 = vcombine.high %v1336_v38, %v1344_v39  ;;  %v417_v28 = vld [vmem:[%s11708_s16 + $0x1d0] sm:$0xff] }
 0x18c   : > { %6781 = vmatpush1.bf16.msra.mxu0 %v10374_v49  ;;  %6945 = vmatpush1.bf16.msra.mxu1 %v10376_v50  ;;  %v10486_v49 = vcombine.low %v1335_v36, %v1343_v37  ;;  %v10488_v50 = vcombine.low %v1336_v38, %v1344_v39  ;;  %v425_v37 = vld [vmem:[%s11708_s16 + $0x210] sm:$0xff]  ;;  %v426_v39 = vld [vmem:[%s11708_s16 + $0x218] sm:$0xff] }
 0x18d   : > { %6782 = vmatprep.subr.bf16.mxu0 %v10391_v51  ;;  %6946 = vmatprep.subr.bf16.mxu1 %v10393_v52  ;;  %v10503_v51 = vcombine.high %v1351_v45, %v1359_v46  ;;  %v10505_v52 = vcombine.high %v1352_v47, %v1360_v48  ;;  %v433_v38 = vld [vmem:[%s11708_s16 + $0x250] sm:$0xff] }
 0x190   : > { %6783 = vmatpush1.bf16.msra.mxu0 %v10390_v58  ;;  %6947 = vmatpush1.bf16.msra.mxu1 %v10392_v60  ;;  %v10502_v58 = vcombine.low %v1351_v45, %v1359_v46  ;;  %v10504_v60 = vcombine.low %v1352_v47, %v1360_v48  ;;  %v441_v46 = vld [vmem:[%s11708_s16 + $0x290] sm:$0xff]  ;;  %v442_v48 = vld [vmem:[%s11708_s16 + $0x298] sm:$0xff] }
 0x191   : > { %6784 = vmatprep.subr.bf16.mxu0 %v10407_v61  ;;  %6948 = vmatprep.subr.bf16.mxu1 %v10409_v62  ;;  %v10519_v61 = vcombine.high %v1367_v54, %v1375_v55  ;;  %v10521_v62 = vcombine.high %v1368_v56, %v1376_v57  ;;  %v449_v47 = vld [vmem:[%s11708_s16 + $0x2d0] sm:$0xff] }
 0x194   : > { %6785 = vmatpush1.bf16.msra.mxu0 %v10406_v5  ;;  %6949 = vmatpush1.bf16.msra.mxu1 %v10408_v6  ;;  %v10518_v5 = vcombine.low %v1367_v54, %v1375_v55  ;;  %v10520_v6 = vcombine.low %v1368_v56, %v1376_v57  ;;  %v457_v55 = vld [vmem:[%s11708_s16 + $0x310] sm:$0xff]  ;;  %v458_v57 = vld [vmem:[%s11708_s16 + $0x318] sm:$0xff] }
 0x195   : > { %6786 = vmatprep.subr.bf16.mxu0 %v10423_v7  ;;  %6950 = vmatprep.subr.bf16.mxu1 %v10425_v8  ;;  %v9515_v7 = vcombine.high %v361_v0, %v369_v1  ;;  %v9517_v8 = vcombine.high %v362_v3, %v370_v4  ;;  %v465_v56 = vld [vmem:[%s11708_s16 + $0x350] sm:$0xff] }
 0x198   : > { %6787 = vmatpush1.bf16.msra.mxu0 %v10422_v14  ;;  %6951 = vmatpush1.bf16.msra.mxu1 %v10424_v15  ;;  %v386_v14 = vld [vmem:[%s11708_s16 + $0xd8] sm:$0xff]  ;;  %v9514_v15 = vcombine.low %v361_v0, %v369_v1  ;;  %v473_v1 = vld [vmem:[%s11708_s16 + $0x390] sm:$0xff] }
 0x199   : > { %6788 = vmatprep.subr.bf16.mxu0 %v10439_v16  ;;  %6952 = vmatprep.subr.bf16.mxu1 %v10441_v17  ;;  %v9516_v16 = vcombine.low %v362_v3, %v370_v4  ;;  %v9531_v17 = vcombine.high %v377_v10, %v385_v11  ;;  %v9533_v18 = vcombine.high %v378_v13, %v386_v14  ;;  %v481_v3 = vld [vmem:[%s11708_s16 + $0x3d0] sm:$0xff]  ;;  %v474_v4 = vld [vmem:[%s11708_s16 + $0x398] sm:$0xff] }
 0x19c   : > { %6789 = vmatpush1.bf16.msra.mxu0 %v10438_v22  ;;  %6953 = vmatpush1.bf16.msra.mxu1 %v10440_v23  ;;  %v402_v22 = vld [vmem:[%s11708_s16 + $0x158] sm:$0xff]  ;;  %v9530_v23 = vcombine.low %v377_v10, %v385_v11  ;;  %v489_v11 = vld [vmem:[%s11708_s16 + $0x410] sm:$0xff] }
 0x19d   : > { %6790 = vmatprep.subr.bf16.mxu0 %v10455_v24  ;;  %6954 = vmatprep.subr.bf16.mxu1 %v10457_v26  ;;  %v9532_v24 = vcombine.low %v378_v13, %v386_v14  ;;  %v9547_v26 = vcombine.high %v393_v19, %v401_v20  ;;  %v9549_v27 = vcombine.high %v394_v21, %v402_v22  ;;  %v497_v13 = vld [vmem:[%s11708_s16 + $0x450] sm:$0xff]  ;;  %v490_v14 = vld [vmem:[%s11708_s16 + $0x418] sm:$0xff] }
 0x1a0   : > { %6791 = vmatpush1.bf16.msra.mxu0 %v10454_v30  ;;  %6955 = vmatpush1.bf16.msra.mxu1 %v10456_v31  ;;  %v418_v30 = vld [vmem:[%s11708_s16 + $0x1d8] sm:$0xff]  ;;  %v9546_v31 = vcombine.low %v393_v19, %v401_v20  ;;  %v505_v20 = vld [vmem:[%s11708_s16 + $0x490] sm:$0xff] }
 0x1a1   : > { %6792 = vmatprep.subr.bf16.mxu0 %v10471_v32  ;;  %6956 = vmatprep.subr.bf16.mxu1 %v10473_v33  ;;  %v9548_v32 = vcombine.low %v394_v21, %v402_v22  ;;  %v9563_v33 = vcombine.high %v409_v59, %v417_v28  ;;  %v9565_v36 = vcombine.high %v410_v29, %v418_v30  ;;  %v513_v21 = vld [vmem:[%s11708_s16 + $0x4d0] sm:$0xff]  ;;  %v506_v22 = vld [vmem:[%s11708_s16 + $0x498] sm:$0xff] }
 0x1a4   : > { %6793 = vmatpush1.bf16.msra.mxu0 %v10470_v41  ;;  %6957 = vmatpush1.bf16.msra.mxu1 %v10472_v53  ;;  %v434_v41 = vld [vmem:[%s11708_s16 + $0x258] sm:$0xff]  ;;  %v9562_v53 = vcombine.low %v409_v59, %v417_v28  ;;  %v521_v28 = vld [vmem:[%s11708_s16 + $0x510] sm:$0xff] }
 0x1a5   : > { %6794 = vmatprep.subr.bf16.mxu0 %v10487_v42  ;;  %6958 = vmatprep.subr.bf16.mxu1 %v10489_v44  ;;  %v9564_v42 = vcombine.low %v410_v29, %v418_v30  ;;  %v9579_v44 = vcombine.high %v425_v37, %v433_v38  ;;  %v9581_v45 = vcombine.high %v426_v39, %v434_v41  ;;  %v529_v29 = vld [vmem:[%s11708_s16 + $0x550] sm:$0xff]  ;;  %v522_v30 = vld [vmem:[%s11708_s16 + $0x518] sm:$0xff] }
 0x1a8   : > { %6795 = vmatpush1.bf16.msra.mxu0 %v10486_v49  ;;  %6959 = vmatpush1.bf16.msra.mxu1 %v10488_v50  ;;  %v450_v49 = vld [vmem:[%s11708_s16 + $0x2d8] sm:$0xff]  ;;  %v9578_v50 = vcombine.low %v425_v37, %v433_v38  ;;  %v537_v38 = vld [vmem:[%s11708_s16 + $0x590] sm:$0xff] }
 0x1a9   : > { %6796 = vmatprep.subr.bf16.mxu0 %v10503_v51  ;;  %6960 = vmatprep.subr.bf16.mxu1 %v10505_v52  ;;  %v9580_v51 = vcombine.low %v426_v39, %v434_v41  ;;  %v9595_v52 = vcombine.high %v441_v46, %v449_v47  ;;  %v9597_v54 = vcombine.high %v442_v48, %v450_v49  ;;  %v545_v39 = vld [vmem:[%s11708_s16 + $0x5d0] sm:$0xff]  ;;  %v538_v41 = vld [vmem:[%s11708_s16 + $0x598] sm:$0xff] }
 0x1ac   : > { %6797 = vmatpush1.bf16.msra.mxu0 %v10502_v58  ;;  %6961 = vmatpush1.bf16.msra.mxu1 %v10504_v60  ;;  %v466_v58 = vld [vmem:[%s11708_s16 + $0x358] sm:$0xff]  ;;  %v9594_v60 = vcombine.low %v441_v46, %v449_v47  ;;  %v553_v47 = vld [vmem:[%s11708_s16 + $0x610] sm:$0xff] }
 0x1ad   : > { %6798 = vmatprep.subr.bf16.mxu0 %v10519_v61  ;;  %6962 = vmatprep.subr.bf16.mxu1 %v10521_v62  ;;  %v9596_v61 = vcombine.low %v442_v48, %v450_v49  ;;  %v9611_v62 = vcombine.high %v457_v55, %v465_v56  ;;  %v9613_v0 = vcombine.high %v458_v57, %v466_v58  ;;  %v561_v48 = vld [vmem:[%s11708_s16 + $0x650] sm:$0xff]  ;;  %v554_v49 = vld [vmem:[%s11708_s16 + $0x618] sm:$0xff] }
 0x1b0   : > { %6799 = vmatpush1.bf16.msra.mxu0 %v10518_v5  ;;  %6963 = vmatpush1.bf16.msra.mxu1 %v10520_v6  ;;  %v482_v5 = vld [vmem:[%s11708_s16 + $0x3d8] sm:$0xff]  ;;  %v9610_v6 = vcombine.low %v457_v55, %v465_v56  ;;  %v569_v56 = vld [vmem:[%s11708_s16 + $0x690] sm:$0xff] }
 0x1b1   : > { %6973 = vmatprep.subr.bf16.mxu0 %v9515_v7  ;;  %7137 = vmatprep.subr.bf16.mxu1 %v9517_v8  ;;  %v9612_v7 = vcombine.low %v458_v57, %v466_v58  ;;  %v9627_v8 = vcombine.high %v473_v1, %v481_v3  ;;  %v9629_v10 = vcombine.high %v474_v4, %v482_v5  ;;  %v577_v57 = vld [vmem:[%s11708_s16 + $0x6d0] sm:$0xff]  ;;  %v570_v58 = vld [vmem:[%s11708_s16 + $0x698] sm:$0xff] }
 0x1b3   : > { %6801 = vmatmul.mubr.bf16.vlgmr.msra.gmra.mrb[0].mxu0 %v12040_v12  ;;  %6965 = vmatmul.mubr.bf16.vlgmr.msra.gmra.mrb[0].mxu1 %v12040_v12 }
 0x1b4   : > { %6974 = vmatpush1.bf16.msra.mxu0 %v9514_v15  ;;  %7138 = vmatpush1.bf16.msra.mxu1 %v9516_v16  ;;  %v498_v15 = vld [vmem:[%s11708_s16 + $0x458] sm:$0xff]  ;;  %v9626_v16 = vcombine.low %v473_v1, %v481_v3  ;;  %v585_v3 = vld [vmem:[%s11708_s16 + $0x710] sm:$0xff] }
 0x1b5   : > { %6975 = vmatprep.subr.bf16.mxu0 %v9531_v17  ;;  %7139 = vmatprep.subr.bf16.mxu1 %v9533_v18  ;;  %v9628_v17 = vcombine.low %v474_v4, %v482_v5  ;;  %v9643_v18 = vcombine.high %v489_v11, %v497_v13  ;;  %v9645_v19 = vcombine.high %v490_v14, %v498_v15  ;;  %v593_v4 = vld [vmem:[%s11708_s16 + $0x750] sm:$0xff]  ;;  %v586_v5 = vld [vmem:[%s11708_s16 + $0x718] sm:$0xff] }
 0x1b6   : > { %7005 = vmatprep.mubr.bf16.mxu0 %v11769_v9  ;;  %7169 = vmatprep.mubr.bf16.mxu1 %v11769_v9 }
 0x1b8   : > { %6976 = vmatpush1.bf16.msra.mxu0 %v9530_v23  ;;  %7140 = vmatpush1.bf16.msra.mxu1 %v9532_v24  ;;  %v514_v23 = vld [vmem:[%s11708_s16 + $0x4d8] sm:$0xff]  ;;  %v9642_v24 = vcombine.low %v489_v11, %v497_v13  ;;  %v601_v13 = vld [vmem:[%s11708_s16 + $0x790] sm:$0xff] }
 0x1b9   : > { %6977 = vmatprep.subr.bf16.mxu0 %v9547_v26  ;;  %7141 = vmatprep.subr.bf16.mxu1 %v9549_v27  ;;  %v9644_v26 = vcombine.low %v490_v14, %v498_v15  ;;  %v9659_v27 = vcombine.high %v505_v20, %v513_v21  ;;  %v9661_v59 = vcombine.high %v506_v22, %v514_v23  ;;  %v609_v14 = vld [vmem:[%s11708_s16 + $0x7d0] sm:$0xff]  ;;  %v602_v15 = vld [vmem:[%s11708_s16 + $0x798] sm:$0xff] }
 0x1bc   : > { %6978 = vmatpush1.bf16.msra.mxu0 %v9546_v31  ;;  %7142 = vmatpush1.bf16.msra.mxu1 %v9548_v32  ;;  %v530_v31 = vld [vmem:[%s11708_s16 + $0x558] sm:$0xff]  ;;  %v9658_v32 = vcombine.low %v505_v20, %v513_v21  ;;  %v617_v21 = vld [vmem:[%s11708_s16 + $0x810] sm:$0xff] }
 0x1bd   : > { %6979 = vmatprep.subr.bf16.mxu0 %v9563_v33  ;;  %7143 = vmatprep.subr.bf16.mxu1 %v9565_v36  ;;  %v9660_v33 = vcombine.low %v506_v22, %v514_v23  ;;  %v9675_v36 = vcombine.high %v521_v28, %v529_v29  ;;  %v9677_v37 = vcombine.high %v522_v30, %v530_v31  ;;  %v625_v22 = vld [vmem:[%s11708_s16 + $0x850] sm:$0xff]  ;;  %v618_v23 = vld [vmem:[%s11708_s16 + $0x818] sm:$0xff] }
 0x1c0   : > { %6980 = vmatpush1.bf16.msra.mxu0 %v9562_v53  ;;  %7144 = vmatpush1.bf16.msra.mxu1 %v9564_v42  ;;  %v546_v53 = vld [vmem:[%s11708_s16 + $0x5d8] sm:$0xff]  ;;  %v9674_v42 = vcombine.low %v521_v28, %v529_v29  ;;  %v633_v29 = vld [vmem:[%s11708_s16 + $0x890] sm:$0xff] }
 0x1c1   : > { %6981 = vmatprep.subr.bf16.mxu0 %v9579_v44  ;;  %7145 = vmatprep.subr.bf16.mxu1 %v9581_v45  ;;  %v9676_v44 = vcombine.low %v522_v30, %v530_v31  ;;  %v9691_v45 = vcombine.high %v537_v38, %v545_v39  ;;  %v9693_v46 = vcombine.high %v538_v41, %v546_v53  ;;  %v641_v30 = vld [vmem:[%s11708_s16 + $0x8d0] sm:$0xff]  ;;  %v634_v31 = vld [vmem:[%s11708_s16 + $0x898] sm:$0xff] }
 0x1c4   : > { %6982 = vmatpush1.bf16.msra.mxu0 %v9578_v50  ;;  %7146 = vmatpush1.bf16.msra.mxu1 %v9580_v51  ;;  %v562_v50 = vld [vmem:[%s11708_s16 + $0x658] sm:$0xff]  ;;  %v9690_v51 = vcombine.low %v537_v38, %v545_v39  ;;  %v649_v39 = vld [vmem:[%s11708_s16 + $0x910] sm:$0xff] }
 0x1c5   : > { %6983 = vmatprep.subr.bf16.mxu0 %v9595_v52  ;;  %7147 = vmatprep.subr.bf16.mxu1 %v9597_v54  ;;  %v9692_v52 = vcombine.low %v538_v41, %v546_v53  ;;  %v9707_v54 = vcombine.high %v553_v47, %v561_v48  ;;  %v9709_v55 = vcombine.high %v554_v49, %v562_v50  ;;  %v657_v41 = vld [vmem:[%s11708_s16 + $0x950] sm:$0xff]  ;;  %v650_v53 = vld [vmem:[%s11708_s16 + $0x918] sm:$0xff] }
 0x1c8   : > { %6984 = vmatpush1.bf16.msra.mxu0 %v9594_v60  ;;  %7148 = vmatpush1.bf16.msra.mxu1 %v9596_v61  ;;  %v578_v60 = vld [vmem:[%s11708_s16 + $0x6d8] sm:$0xff]  ;;  %v9706_v61 = vcombine.low %v553_v47, %v561_v48  ;;  %v665_v48 = vld [vmem:[%s11708_s16 + $0x990] sm:$0xff] }
 0x1c9   : > { %6985 = vmatprep.subr.bf16.mxu0 %v9611_v62  ;;  %7149 = vmatprep.subr.bf16.mxu1 %v9613_v0  ;;  %v9708_v62 = vcombine.low %v554_v49, %v562_v50  ;;  %v9723_v0 = vcombine.high %v569_v56, %v577_v57  ;;  %v9725_v1 = vcombine.high %v570_v58, %v578_v60  ;;  %v673_v49 = vld [vmem:[%s11708_s16 + $0x9d0] sm:$0xff]  ;;  %v666_v50 = vld [vmem:[%s11708_s16 + $0x998] sm:$0xff] }
 0x1cc   : > { %6986 = vmatpush1.bf16.msra.mxu0 %v9610_v6  ;;  %7150 = vmatpush1.bf16.msra.mxu1 %v9612_v7  ;;  %v594_v6 = vld [vmem:[%s11708_s16 + $0x758] sm:$0xff]  ;;  %v9722_v7 = vcombine.low %v569_v56, %v577_v57  ;;  %v681_v57 = vld [vmem:[%s11708_s16 + $0xa10] sm:$0xff] }
 0x1cd   : > { %6987 = vmatprep.subr.bf16.mxu0 %v9627_v8  ;;  %7151 = vmatprep.subr.bf16.mxu1 %v9629_v10  ;;  %v9724_v8 = vcombine.low %v570_v58, %v578_v60  ;;  %v9739_v10 = vcombine.high %v585_v3, %v593_v4  ;;  %v9741_v11 = vcombine.high %v586_v5, %v594_v6  ;;  %v689_v58 = vld [vmem:[%s11708_s16 + $0xa50] sm:$0xff]  ;;  %v682_v60 = vld [vmem:[%s11708_s16 + $0xa18] sm:$0xff] }
 0x1d0   : > { %6988 = vmatpush1.bf16.msra.mxu0 %v9626_v16  ;;  %7152 = vmatpush1.bf16.msra.mxu1 %v9628_v17  ;;  %v610_v16 = vld [vmem:[%s11708_s16 + $0x7d8] sm:$0xff]  ;;  %v9738_v17 = vcombine.low %v585_v3, %v593_v4  ;;  %v697_v4 = vld [vmem:[%s11708_s16 + $0xa90] sm:$0xff] }
 0x1d1   : > { %6989 = vmatprep.subr.bf16.mxu0 %v9643_v18  ;;  %7153 = vmatprep.subr.bf16.mxu1 %v9645_v19  ;;  %v9740_v18 = vcombine.low %v586_v5, %v594_v6  ;;  %v9755_v19 = vcombine.high %v601_v13, %v609_v14  ;;  %v9757_v20 = vcombine.high %v602_v15, %v610_v16  ;;  %v705_v5 = vld [vmem:[%s11708_s16 + $0xad0] sm:$0xff]  ;;  %v698_v6 = vld [vmem:[%s11708_s16 + $0xa98] sm:$0xff] }
 0x1d4   : > { %6990 = vmatpush1.bf16.msra.mxu0 %v9642_v24  ;;  %7154 = vmatpush1.bf16.msra.mxu1 %v9644_v26  ;;  %v626_v24 = vld [vmem:[%s11708_s16 + $0x858] sm:$0xff]  ;;  %v9754_v26 = vcombine.low %v601_v13, %v609_v14  ;;  %v713_v14 = vld [vmem:[%s11708_s16 + $0xb10] sm:$0xff] }
 0x1d5   : > { %6991 = vmatprep.subr.bf16.mxu0 %v9659_v27  ;;  %7155 = vmatprep.subr.bf16.mxu1 %v9661_v59  ;;  %v9756_v27 = vcombine.low %v602_v15, %v610_v16  ;;  %v9771_v59 = vcombine.high %v617_v21, %v625_v22  ;;  %v9773_v28 = vcombine.high %v618_v23, %v626_v24  ;;  %v721_v15 = vld [vmem:[%s11708_s16 + $0xb50] sm:$0xff]  ;;  %v714_v16 = vld [vmem:[%s11708_s16 + $0xb18] sm:$0xff] }
 0x1d8   : > { %6992 = vmatpush1.bf16.msra.mxu0 %v9658_v32  ;;  %7156 = vmatpush1.bf16.msra.mxu1 %v9660_v33  ;;  %v642_v32 = vld [vmem:[%s11708_s16 + $0x8d8] sm:$0xff]  ;;  %v9770_v33 = vcombine.low %v617_v21, %v625_v22  ;;  %v729_v22 = vld [vmem:[%s11708_s16 + $0xb90] sm:$0xff] }
 0x1d9   : > { %6993 = vmatprep.subr.bf16.mxu0 %v9675_v36  ;;  %7157 = vmatprep.subr.bf16.mxu1 %v9677_v37  ;;  %v9772_v36 = vcombine.low %v618_v23, %v626_v24  ;;  %v9787_v37 = vcombine.high %v633_v29, %v641_v30  ;;  %v9789_v38 = vcombine.high %v634_v31, %v642_v32  ;;  %v737_v23 = vld [vmem:[%s11708_s16 + $0xbd0] sm:$0xff]  ;;  %v730_v24 = vld [vmem:[%s11708_s16 + $0xb98] sm:$0xff] }
 0x1dc   : > { %6994 = vmatpush1.bf16.msra.mxu0 %v9674_v42  ;;  %7158 = vmatpush1.bf16.msra.mxu1 %v9676_v44  ;;  %v658_v42 = vld [vmem:[%s11708_s16 + $0x958] sm:$0xff]  ;;  %v9786_v44 = vcombine.low %v633_v29, %v641_v30  ;;  %v745_v30 = vld [vmem:[%s11708_s16 + $0xc10] sm:$0xff] }
 0x1dd   : > { %6995 = vmatprep.subr.bf16.mxu0 %v9691_v45  ;;  %7159 = vmatprep.subr.bf16.mxu1 %v9693_v46  ;;  %v9788_v45 = vcombine.low %v634_v31, %v642_v32  ;;  %v9803_v46 = vcombine.high %v649_v39, %v657_v41  ;;  %v9805_v47 = vcombine.high %v650_v53, %v658_v42  ;;  %v753_v31 = vld [vmem:[%s11708_s16 + $0xc50] sm:$0xff]  ;;  %v746_v32 = vld [vmem:[%s11708_s16 + $0xc18] sm:$0xff] }
 0x1e0   : > { %6996 = vmatpush1.bf16.msra.mxu0 %v9690_v51  ;;  %7160 = vmatpush1.bf16.msra.mxu1 %v9692_v52  ;;  %v674_v51 = vld [vmem:[%s11708_s16 + $0x9d8] sm:$0xff]  ;;  %v9802_v52 = vcombine.low %v649_v39, %v657_v41  ;;  %v761_v41 = vld [vmem:[%s11708_s16 + $0xc90] sm:$0xff] }
 0x1e1   : > { %6997 = vmatprep.subr.bf16.mxu0 %v9707_v54  ;;  %7161 = vmatprep.subr.bf16.mxu1 %v9709_v55  ;;  %v9804_v54 = vcombine.low %v650_v53, %v658_v42  ;;  %v9819_v55 = vcombine.high %v665_v48, %v673_v49  ;;  %v9821_v56 = vcombine.high %v666_v50, %v674_v51  ;;  %v769_v53 = vld [vmem:[%s11708_s16 + $0xcd0] sm:$0xff]  ;;  %v762_v42 = vld [vmem:[%s11708_s16 + $0xc98] sm:$0xff] }
 0x1e4   : > { %6998 = vmatpush1.bf16.msra.mxu0 %v9706_v61  ;;  %7162 = vmatpush1.bf16.msra.mxu1 %v9708_v62  ;;  %v690_v61 = vld [vmem:[%s11708_s16 + $0xa58] sm:$0xff]  ;;  %v9818_v62 = vcombine.low %v665_v48, %v673_v49  ;;  %v777_v49 = vld [vmem:[%s11708_s16 + $0xd10] sm:$0xff] }
 0x1e5   : > { %6999 = vmatprep.subr.bf16.mxu0 %v9723_v0  ;;  %7163 = vmatprep.subr.bf16.mxu1 %v9725_v1  ;;  %v9820_v0 = vcombine.low %v666_v50, %v674_v51  ;;  %v9835_v1 = vcombine.high %v681_v57, %v689_v58  ;;  %v9837_v3 = vcombine.high %v682_v60, %v690_v61  ;;  %v785_v50 = vld [vmem:[%s11708_s16 + $0xd50] sm:$0xff]  ;;  %v778_v51 = vld [vmem:[%s11708_s16 + $0xd18] sm:$0xff] }
 0x1e8   : > { %7000 = vmatpush1.bf16.msra.mxu0 %v9722_v7  ;;  %7164 = vmatpush1.bf16.msra.mxu1 %v9724_v8  ;;  %v706_v7 = vld [vmem:[%s11708_s16 + $0xad8] sm:$0xff]  ;;  %v9834_v8 = vcombine.low %v681_v57, %v689_v58  ;;  %v793_v58 = vld [vmem:[%s11708_s16 + $0xd90] sm:$0xff] }
 0x1e9   : > { %7001 = vmatprep.subr.bf16.mxu0 %v9739_v10  ;;  %7165 = vmatprep.subr.bf16.mxu1 %v9741_v11  ;;  %v9836_v10 = vcombine.low %v682_v60, %v690_v61  ;;  %v9851_v11 = vcombine.high %v697_v4, %v705_v5  ;;  %v9853_v13 = vcombine.high %v698_v6, %v706_v7  ;;  %v801_v60 = vld [vmem:[%s11708_s16 + $0xdd0] sm:$0xff]  ;;  %v794_v61 = vld [vmem:[%s11708_s16 + $0xd98] sm:$0xff] }
 0x1ec   : > { %7002 = vmatpush1.bf16.msra.mxu0 %v9738_v17  ;;  %7166 = vmatpush1.bf16.msra.mxu1 %v9740_v18  ;;  %v722_v17 = vld [vmem:[%s11708_s16 + $0xb58] sm:$0xff]  ;;  %v9850_v18 = vcombine.low %v697_v4, %v705_v5  ;;  %v809_v5 = vld [vmem:[%s11708_s16 + $0xe10] sm:$0xff] }
 0x1ed   : > { %7003 = vmatprep.subr.bf16.mxu0 %v9755_v19  ;;  %7167 = vmatprep.subr.bf16.mxu1 %v9757_v20  ;;  %v9852_v19 = vcombine.low %v698_v6, %v706_v7  ;;  %v9867_v20 = vcombine.high %v713_v14, %v721_v15  ;;  %v9869_v21 = vcombine.high %v714_v16, %v722_v17  ;;  %v817_v6 = vld [vmem:[%s11708_s16 + $0xe50] sm:$0xff]  ;;  %v810_v7 = vld [vmem:[%s11708_s16 + $0xe18] sm:$0xff] }
 0x1f0   : > { %7004 = vmatpush1.bf16.msra.mxu0 %v9754_v26  ;;  %7168 = vmatpush1.bf16.msra.mxu1 %v9756_v27  ;;  %v738_v26 = vld [vmem:[%s11708_s16 + $0xbd8] sm:$0xff]  ;;  %v9866_v27 = vcombine.low %v713_v14, %v721_v15  ;;  %v825_v15 = vld [vmem:[%s11708_s16 + $0xe90] sm:$0xff] }
 0x1f1   : > { %7014 = vmatprep.subr.bf16.mxu0 %v9771_v59  ;;  %7178 = vmatprep.subr.bf16.mxu1 %v9773_v28  ;;  %v9868_v59 = vcombine.low %v714_v16, %v722_v17  ;;  %v9883_v28 = vcombine.high %v729_v22, %v737_v23  ;;  %v9885_v29 = vcombine.high %v730_v24, %v738_v26  ;;  %v833_v16 = vld [vmem:[%s11708_s16 + $0xed0] sm:$0xff]  ;;  %v826_v17 = vld [vmem:[%s11708_s16 + $0xe98] sm:$0xff] }
 0x1f3   : > { %7006 = vmatmul.mubr.bf16.vlgmr.msra.gmra.mrb[4].mxu0 %v11814_v25  ;;  %7170 = vmatmul.mubr.bf16.vlgmr.msra.gmra.mrb[4].mxu1 %v11814_v25 }
 0x1f4   : > { %7015 = vmatpush1.bf16.msra.mxu0 %v9770_v33  ;;  %7179 = vmatpush1.bf16.msra.mxu1 %v9772_v36  ;;  %v754_v33 = vld [vmem:[%s11708_s16 + $0xc58] sm:$0xff]  ;;  %v9882_v36 = vcombine.low %v729_v22, %v737_v23  ;;  %v841_v23 = vld [vmem:[%s11708_s16 + $0xf10] sm:$0xff] }
 0x1f5   : > { %7016 = vmatprep.subr.bf16.mxu0 %v9787_v37  ;;  %7180 = vmatprep.subr.bf16.mxu1 %v9789_v38  ;;  %v9884_v37 = vcombine.low %v730_v24, %v738_v26  ;;  %v9899_v38 = vcombine.high %v745_v30, %v753_v31  ;;  %v9901_v39 = vcombine.high %v746_v32, %v754_v33  ;;  %v849_v24 = vld [vmem:[%s11708_s16 + $0xf50] sm:$0xff]  ;;  %v842_v26 = vld [vmem:[%s11708_s16 + $0xf18] sm:$0xff] }
 0x1f6   : > { %7046 = vmatprep.mubr.bf16.mxu0 %v11822_v63  ;;  %7210 = vmatprep.mubr.bf16.mxu1 %v11822_v63 }
 0x1f8   : > { %7017 = vmatpush1.bf16.msra.mxu0 %v9786_v44  ;;  %7181 = vmatpush1.bf16.msra.mxu1 %v9788_v45  ;;  %v770_v44 = vld [vmem:[%s11708_s16 + $0xcd8] sm:$0xff]  ;;  %v9898_v45 = vcombine.low %v745_v30, %v753_v31  ;;  %v857_v31 = vld [vmem:[%s11708_s16 + $0xf90] sm:$0xff] }
 0x1f9   : > { %7018 = vmatprep.subr.bf16.mxu0 %v9803_v46  ;;  %7182 = vmatprep.subr.bf16.mxu1 %v9805_v47  ;;  %v9900_v46 = vcombine.low %v746_v32, %v754_v33  ;;  %v9915_v47 = vcombine.high %v761_v41, %v769_v53  ;;  %v9917_v48 = vcombine.high %v762_v42, %v770_v44  ;;  %v865_v32 = vld [vmem:[%s11708_s16 + $0xfd0] sm:$0xff]  ;;  %v858_v33 = vld [vmem:[%s11708_s16 + $0xf98] sm:$0xff] }
 0x1fc   : > { %7019 = vmatpush1.bf16.msra.mxu0 %v9802_v52  ;;  %7183 = vmatpush1.bf16.msra.mxu1 %v9804_v54  ;;  %v786_v52 = vld [vmem:[%s11708_s16 + $0xd58] sm:$0xff]  ;;  %v9914_v54 = vcombine.low %v761_v41, %v769_v53  ;;  %v873_v53 = vld [vmem:[%s11708_s16 + $0x1010] sm:$0xff] }
 0x1fd   : > { %7020 = vmatprep.subr.bf16.mxu0 %v9819_v55  ;;  %7184 = vmatprep.subr.bf16.mxu1 %v9821_v56  ;;  %v9916_v55 = vcombine.low %v762_v42, %v770_v44  ;;  %v9931_v56 = vcombine.high %v777_v49, %v785_v50  ;;  %v9933_v57 = vcombine.high %v778_v51, %v786_v52  ;;  %v881_v42 = vld [vmem:[%s11708_s16 + $0x1050] sm:$0xff]  ;;  %v874_v44 = vld [vmem:[%s11708_s16 + $0x1018] sm:$0xff] }
 0x200   : > { %7021 = vmatpush1.bf16.msra.mxu0 %v9818_v62  ;;  %7185 = vmatpush1.bf16.msra.mxu1 %v9820_v0  ;;  %v802_v62 = vld [vmem:[%s11708_s16 + $0xdd8] sm:$0xff]  ;;  %v9930_v0 = vcombine.low %v777_v49, %v785_v50  ;;  %v889_v50 = vld [vmem:[%s11708_s16 + $0x1090] sm:$0xff] }
 0x201   : > { %7022 = vmatprep.subr.bf16.mxu0 %v9835_v1  ;;  %7186 = vmatprep.subr.bf16.mxu1 %v9837_v3  ;;  %v9932_v1 = vcombine.low %v778_v51, %v786_v52  ;;  %v9947_v3 = vcombine.high %v793_v58, %v801_v60  ;;  %v9949_v4 = vcombine.high %v794_v61, %v802_v62  ;;  %v897_v51 = vld [vmem:[%s11708_s16 + $0x10d0] sm:$0xff]  ;;  %v890_v52 = vld [vmem:[%s11708_s16 + $0x1098] sm:$0xff] }
 0x204   : > { %7023 = vmatpush1.bf16.msra.mxu0 %v9834_v8  ;;  %7187 = vmatpush1.bf16.msra.mxu1 %v9836_v10  ;;  %v818_v8 = vld [vmem:[%s11708_s16 + $0xe58] sm:$0xff]  ;;  %v9946_v10 = vcombine.low %v793_v58, %v801_v60  ;;  %v905_v60 = vld [vmem:[%s11708_s16 + $0x1110] sm:$0xff] }
 0x205   : > { %7024 = vmatprep.subr.bf16.mxu0 %v9851_v11  ;;  %7188 = vmatprep.subr.bf16.mxu1 %v9853_v13  ;;  %v9948_v11 = vcombine.low %v794_v61, %v802_v62  ;;  %v9963_v13 = vcombine.high %v809_v5, %v817_v6  ;;  %v9965_v14 = vcombine.high %v810_v7, %v818_v8  ;;  %v913_v61 = vld [vmem:[%s11708_s16 + $0x1150] sm:$0xff]  ;;  %v906_v62 = vld [vmem:[%s11708_s16 + $0x1118] sm:$0xff] }
 0x208   : > { %7025 = vmatpush1.bf16.msra.mxu0 %v9850_v18  ;;  %7189 = vmatpush1.bf16.msra.mxu1 %v9852_v19  ;;  %v834_v18 = vld [vmem:[%s11708_s16 + $0xed8] sm:$0xff]  ;;  %v9962_v19 = vcombine.low %v809_v5, %v817_v6  ;;  %v921_v6 = vld [vmem:[%s11708_s16 + $0x1190] sm:$0xff] }
 0x209   : > { %7026 = vmatprep.subr.bf16.mxu0 %v9867_v20  ;;  %7190 = vmatprep.subr.bf16.mxu1 %v9869_v21  ;;  %v9964_v20 = vcombine.low %v810_v7, %v818_v8  ;;  %v9979_v21 = vcombine.high %v825_v15, %v833_v16  ;;  %v9981_v22 = vcombine.high %v826_v17, %v834_v18  ;;  %v929_v7 = vld [vmem:[%s11708_s16 + $0x11d0] sm:$0xff]  ;;  %v922_v8 = vld [vmem:[%s11708_s16 + $0x1198] sm:$0xff] }
 0x20c   : > { %7027 = vmatpush1.bf16.msra.mxu0 %v9866_v27  ;;  %7191 = vmatpush1.bf16.msra.mxu1 %v9868_v59  ;;  %v850_v27 = vld [vmem:[%s11708_s16 + $0xf58] sm:$0xff]  ;;  %v9978_v59 = vcombine.low %v825_v15, %v833_v16  ;;  %v937_v16 = vld [vmem:[%s11708_s16 + $0x1210] sm:$0xff] }
 0x20d   : > { %7028 = vmatprep.subr.bf16.mxu0 %v9883_v28  ;;  %7192 = vmatprep.subr.bf16.mxu1 %v9885_v29  ;;  %v9980_v28 = vcombine.low %v826_v17, %v834_v18  ;;  %v9995_v29 = vcombine.high %v841_v23, %v849_v24  ;;  %v9997_v30 = vcombine.high %v842_v26, %v850_v27  ;;  %v945_v17 = vld [vmem:[%s11708_s16 + $0x1250] sm:$0xff]  ;;  %v938_v18 = vld [vmem:[%s11708_s16 + $0x1218] sm:$0xff] }
 0x210   : > { %7029 = vmatpush1.bf16.msra.mxu0 %v9882_v36  ;;  %7193 = vmatpush1.bf16.msra.mxu1 %v9884_v37  ;;  %v866_v36 = vld [vmem:[%s11708_s16 + $0xfd8] sm:$0xff]  ;;  %v9994_v37 = vcombine.low %v841_v23, %v849_v24  ;;  %v953_v24 = vld [vmem:[%s11708_s16 + $0x1290] sm:$0xff] }
 0x211   : > { %7030 = vmatprep.subr.bf16.mxu0 %v9899_v38  ;;  %7194 = vmatprep.subr.bf16.mxu1 %v9901_v39  ;;  %v9996_v38 = vcombine.low %v842_v26, %v850_v27  ;;  %v10011_v39 = vcombine.high %v857_v31, %v865_v32  ;;  %v10013_v41 = vcombine.high %v858_v33, %v866_v36  ;;  %v961_v26 = vld [vmem:[%s11708_s16 + $0x12d0] sm:$0xff]  ;;  %v954_v27 = vld [vmem:[%s11708_s16 + $0x1298] sm:$0xff] }
 0x214   : > { %7031 = vmatpush1.bf16.msra.mxu0 %v9898_v45  ;;  %7195 = vmatpush1.bf16.msra.mxu1 %v9900_v46  ;;  %v882_v45 = vld [vmem:[%s11708_s16 + $0x1058] sm:$0xff]  ;;  %v10010_v46 = vcombine.low %v857_v31, %v865_v32  ;;  %v969_v32 = vld [vmem:[%s11708_s16 + $0x1310] sm:$0xff] }
 0x215   : > { %7032 = vmatprep.subr.bf16.mxu0 %v9915_v47  ;;  %7196 = vmatprep.subr.bf16.mxu1 %v9917_v48  ;;  %v10012_v47 = vcombine.low %v858_v33, %v866_v36  ;;  %v10027_v48 = vcombine.high %v873_v53, %v881_v42  ;;  %v10029_v49 = vcombine.high %v874_v44, %v882_v45  ;;  %v977_v33 = vld [vmem:[%s11708_s16 + $0x1350] sm:$0xff]  ;;  %v970_v36 = vld [vmem:[%s11708_s16 + $0x1318] sm:$0xff] }
 0x218   : > { %7033 = vmatpush1.bf16.msra.mxu0 %v9914_v54  ;;  %7197 = vmatpush1.bf16.msra.mxu1 %v9916_v55  ;;  %v898_v54 = vld [vmem:[%s11708_s16 + $0x10d8] sm:$0xff]  ;;  %v10026_v55 = vcombine.low %v873_v53, %v881_v42  ;;  %v985_v42 = vld [vmem:[%s11708_s16 + $0x1390] sm:$0xff] }
 0x219   : > { %7034 = vmatprep.subr.bf16.mxu0 %v9931_v56  ;;  %7198 = vmatprep.subr.bf16.mxu1 %v9933_v57  ;;  %v10028_v56 = vcombine.low %v874_v44, %v882_v45  ;;  %v10043_v57 = vcombine.high %v889_v50, %v897_v51  ;;  %v10045_v58 = vcombine.high %v890_v52, %v898_v54  ;;  %v993_v44 = vld [vmem:[%s11708_s16 + $0x13d0] sm:$0xff]  ;;  %v986_v45 = vld [vmem:[%s11708_s16 + $0x1398] sm:$0xff] }
 0x21c   : > { %7035 = vmatpush1.bf16.msra.mxu0 %v9930_v0  ;;  %7199 = vmatpush1.bf16.msra.mxu1 %v9932_v1  ;;  %v914_v0 = vld [vmem:[%s11708_s16 + $0x1158] sm:$0xff]  ;;  %v10042_v1 = vcombine.low %v889_v50, %v897_v51  ;;  %v1001_v51 = vld [vmem:[%s11708_s16 + $0x1410] sm:$0xff] }
 0x21d   : > { %7036 = vmatprep.subr.bf16.mxu0 %v9947_v3  ;;  %7200 = vmatprep.subr.bf16.mxu1 %v9949_v4  ;;  %v10044_v3 = vcombine.low %v890_v52, %v898_v54  ;;  %v10059_v4 = vcombine.high %v905_v60, %v913_v61  ;;  %v10061_v5 = vcombine.high %v906_v62, %v914_v0  ;;  %v1009_v52 = vld [vmem:[%s11708_s16 + $0x1450] sm:$0xff]  ;;  %v1002_v54 = vld [vmem:[%s11708_s16 + $0x1418] sm:$0xff] }
 0x220   : > { %7037 = vmatpush1.bf16.msra.mxu0 %v9946_v10  ;;  %7201 = vmatpush1.bf16.msra.mxu1 %v9948_v11  ;;  %v930_v10 = vld [vmem:[%s11708_s16 + $0x11d8] sm:$0xff]  ;;  %v10058_v11 = vcombine.low %v905_v60, %v913_v61  ;;  %v1017_v61 = vld [vmem:[%s11708_s16 + $0x1490] sm:$0xff] }
 0x221   : > { %7038 = vmatprep.subr.bf16.mxu0 %v9963_v13  ;;  %7202 = vmatprep.subr.bf16.mxu1 %v9965_v14  ;;  %v10060_v13 = vcombine.low %v906_v62, %v914_v0  ;;  %v10075_v14 = vcombine.high %v921_v6, %v929_v7  ;;  %v10077_v15 = vcombine.high %v922_v8, %v930_v10  ;;  %v1025_v62 = vld [vmem:[%s11708_s16 + $0x14d0] sm:$0xff]  ;;  %v1018_v0 = vld [vmem:[%s11708_s16 + $0x1498] sm:$0xff] }
 0x224   : > { %7039 = vmatpush1.bf16.msra.mxu0 %v9962_v19  ;;  %7203 = vmatpush1.bf16.msra.mxu1 %v9964_v20  ;;  %v946_v19 = vld [vmem:[%s11708_s16 + $0x1258] sm:$0xff]  ;;  %v10074_v20 = vcombine.low %v921_v6, %v929_v7  ;;  %v1033_v7 = vld [vmem:[%s11708_s16 + $0x1510] sm:$0xff] }
 0x225   : > { %7040 = vmatprep.subr.bf16.mxu0 %v9979_v21  ;;  %7204 = vmatprep.subr.bf16.mxu1 %v9981_v22  ;;  %v10076_v21 = vcombine.low %v922_v8, %v930_v10  ;;  %v10091_v22 = vcombine.high %v937_v16, %v945_v17  ;;  %v10093_v23 = vcombine.high %v938_v18, %v946_v19  ;;  %v1041_v8 = vld [vmem:[%s11708_s16 + $0x1550] sm:$0xff]  ;;  %v1034_v10 = vld [vmem:[%s11708_s16 + $0x1518] sm:$0xff] }
 0x228   : > { %7041 = vmatpush1.bf16.msra.mxu0 %v9978_v59  ;;  %7205 = vmatpush1.bf16.msra.mxu1 %v9980_v28  ;;  %v962_v59 = vld [vmem:[%s11708_s16 + $0x12d8] sm:$0xff]  ;;  %v10090_v28 = vcombine.low %v937_v16, %v945_v17  ;;  %v1049_v17 = vld [vmem:[%s11708_s16 + $0x1590] sm:$0xff] }
 0x229   : > { %7042 = vmatprep.subr.bf16.mxu0 %v9995_v29  ;;  %7206 = vmatprep.subr.bf16.mxu1 %v9997_v30  ;;  %v10092_v29 = vcombine.low %v938_v18, %v946_v19  ;;  %v10107_v30 = vcombine.high %v953_v24, %v961_v26  ;;  %v10109_v31 = vcombine.high %v954_v27, %v962_v59  ;;  %v1057_v18 = vld [vmem:[%s11708_s16 + $0x15d0] sm:$0xff]  ;;  %v1050_v19 = vld [vmem:[%s11708_s16 + $0x1598] sm:$0xff] }
 0x22c   : > { %7043 = vmatpush1.bf16.msra.mxu0 %v9994_v37  ;;  %7207 = vmatpush1.bf16.msra.mxu1 %v9996_v38  ;;  %v978_v37 = vld [vmem:[%s11708_s16 + $0x1358] sm:$0xff]  ;;  %v10106_v38 = vcombine.low %v953_v24, %v961_v26  ;;  %v1065_v26 = vld [vmem:[%s11708_s16 + $0x1610] sm:$0xff] }
 0x22d   : > { %7044 = vmatprep.subr.bf16.mxu0 %v10011_v39  ;;  %7208 = vmatprep.subr.bf16.mxu1 %v10013_v41  ;;  %v10108_v39 = vcombine.low %v954_v27, %v962_v59  ;;  %v10123_v41 = vcombine.high %v969_v32, %v977_v33  ;;  %v10125_v53 = vcombine.high %v970_v36, %v978_v37  ;;  %v1073_v27 = vld [vmem:[%s11708_s16 + $0x1650] sm:$0xff]  ;;  %v1066_v59 = vld [vmem:[%s11708_s16 + $0x1618] sm:$0xff] }
 0x230   : > { %7045 = vmatpush1.bf16.msra.mxu0 %v10010_v46  ;;  %7209 = vmatpush1.bf16.msra.mxu1 %v10012_v47  ;;  %v994_v46 = vld [vmem:[%s11708_s16 + $0x13d8] sm:$0xff]  ;;  %v10122_v47 = vcombine.low %v969_v32, %v977_v33  ;;  %v1081_v33 = vld [vmem:[%s11708_s16 + $0x1690] sm:$0xff] }
 0x231   : > { %7055 = vmatprep.subr.bf16.mxu0 %v10027_v48  ;;  %7219 = vmatprep.subr.bf16.mxu1 %v10029_v49  ;;  %v10124_v48 = vcombine.low %v970_v36, %v978_v37  ;;  %v10139_v49 = vcombine.high %v985_v42, %v993_v44  ;;  %v10141_v50 = vcombine.high %v986_v45, %v994_v46  ;;  %v1089_v36 = vld [vmem:[%s11708_s16 + $0x16d0] sm:$0xff]  ;;  %v1082_v37 = vld [vmem:[%s11708_s16 + $0x1698] sm:$0xff] }
 0x233   : > { %7047 = vmatmul.mubr.bf16.vlgmr.msra.gmra.mrb[4].mxu0 %v11896_v40  ;;  %7211 = vmatmul.mubr.bf16.vlgmr.msra.gmra.mrb[4].mxu1 %v11896_v40 }
 0x234   : > { %7056 = vmatpush1.bf16.msra.mxu0 %v10026_v55  ;;  %7220 = vmatpush1.bf16.msra.mxu1 %v10028_v56  ;;  %v1010_v55 = vld [vmem:[%s11708_s16 + $0x1458] sm:$0xff]  ;;  %v10138_v56 = vcombine.low %v985_v42, %v993_v44  ;;  %v1097_v44 = vld [vmem:[%s11708_s16 + $0x1710] sm:$0xff] }
 0x235   : > { %7057 = vmatprep.subr.bf16.mxu0 %v10043_v57  ;;  %7221 = vmatprep.subr.bf16.mxu1 %v10045_v58  ;;  %v10140_v57 = vcombine.low %v986_v45, %v994_v46  ;;  %v10155_v58 = vcombine.high %v1001_v51, %v1009_v52  ;;  %v10157_v60 = vcombine.high %v1002_v54, %v1010_v55  ;;  %v1105_v45 = vld [vmem:[%s11708_s16 + $0x1750] sm:$0xff]  ;;  %v1098_v46 = vld [vmem:[%s11708_s16 + $0x1718] sm:$0xff] }
 0x236   : > { %7087 = vmatprep.mubr.bf16.mxu0 %v11825_v34  ;;  %7251 = vmatprep.mubr.bf16.mxu1 %v11825_v34 }
 0x238   : > { %7058 = vmatpush1.bf16.msra.mxu0 %v10042_v1  ;;  %7222 = vmatpush1.bf16.msra.mxu1 %v10044_v3  ;;  %v1026_v1 = vld [vmem:[%s11708_s16 + $0x14d8] sm:$0xff]  ;;  %v10154_v3 = vcombine.low %v1001_v51, %v1009_v52  ;;  %v1113_v52 = vld [vmem:[%s11708_s16 + $0x1790] sm:$0xff] }
 0x239   : > { %7059 = vmatprep.subr.bf16.mxu0 %v10059_v4  ;;  %7223 = vmatprep.subr.bf16.mxu1 %v10061_v5  ;;  %v10156_v4 = vcombine.low %v1002_v54, %v1010_v55  ;;  %v10171_v5 = vcombine.high %v1017_v61, %v1025_v62  ;;  %v10173_v6 = vcombine.high %v1018_v0, %v1026_v1  ;;  %v1121_v54 = vld [vmem:[%s11708_s16 + $0x17d0] sm:$0xff]  ;;  %v1114_v55 = vld [vmem:[%s11708_s16 + $0x1798] sm:$0xff] }
 0x23c   : > { %7060 = vmatpush1.bf16.msra.mxu0 %v10058_v11  ;;  %7224 = vmatpush1.bf16.msra.mxu1 %v10060_v13  ;;  %v1042_v11 = vld [vmem:[%s11708_s16 + $0x1558] sm:$0xff]  ;;  %v10170_v13 = vcombine.low %v1017_v61, %v1025_v62  ;;  %v1129_v62 = vld [vmem:[%s11708_s16 + $0x1810] sm:$0xff] }
 0x23d   : > { %7061 = vmatprep.subr.bf16.mxu0 %v10075_v14  ;;  %7225 = vmatprep.subr.bf16.mxu1 %v10077_v15  ;;  %v10172_v14 = vcombine.low %v1018_v0, %v1026_v1  ;;  %v10187_v15 = vcombine.high %v1033_v7, %v1041_v8  ;;  %v10189_v16 = vcombine.high %v1034_v10, %v1042_v11  ;;  %v1137_v0 = vld [vmem:[%s11708_s16 + $0x1850] sm:$0xff]  ;;  %v1130_v1 = vld [vmem:[%s11708_s16 + $0x1818] sm:$0xff] }
 0x240   : > { %7062 = vmatpush1.bf16.msra.mxu0 %v10074_v20  ;;  %7226 = vmatpush1.bf16.msra.mxu1 %v10076_v21  ;;  %v1058_v20 = vld [vmem:[%s11708_s16 + $0x15d8] sm:$0xff]  ;;  %v10186_v21 = vcombine.low %v1033_v7, %v1041_v8  ;;  %v1145_v8 = vld [vmem:[%s11708_s16 + $0x1890] sm:$0xff] }
 0x241   : > { %7063 = vmatprep.subr.bf16.mxu0 %v10091_v22  ;;  %7227 = vmatprep.subr.bf16.mxu1 %v10093_v23  ;;  %v10188_v22 = vcombine.low %v1034_v10, %v1042_v11  ;;  %v10203_v23 = vcombine.high %v1049_v17, %v1057_v18  ;;  %v10205_v24 = vcombine.high %v1050_v19, %v1058_v20  ;;  %v1153_v10 = vld [vmem:[%s11708_s16 + $0x18d0] sm:$0xff]  ;;  %v1146_v11 = vld [vmem:[%s11708_s16 + $0x1898] sm:$0xff] }
 0x244   : > { %7064 = vmatpush1.bf16.msra.mxu0 %v10090_v28  ;;  %7228 = vmatpush1.bf16.msra.mxu1 %v10092_v29  ;;  %v1074_v28 = vld [vmem:[%s11708_s16 + $0x1658] sm:$0xff]  ;;  %v10202_v29 = vcombine.low %v1049_v17, %v1057_v18  ;;  %v1161_v18 = vld [vmem:[%s11708_s16 + $0x1910] sm:$0xff] }
 0x245   : > { %7065 = vmatprep.subr.bf16.mxu0 %v10107_v30  ;;  %7229 = vmatprep.subr.bf16.mxu1 %v10109_v31  ;;  %v10204_v30 = vcombine.low %v1050_v19, %v1058_v20  ;;  %v10219_v31 = vcombine.high %v1065_v26, %v1073_v27  ;;  %v10221_v32 = vcombine.high %v1066_v59, %v1074_v28  ;;  %v1169_v19 = vld [vmem:[%s11708_s16 + $0x1950] sm:$0xff]  ;;  %v1162_v20 = vld [vmem:[%s11708_s16 + $0x1918] sm:$0xff] }
 0x248   : > { %7066 = vmatpush1.bf16.msra.mxu0 %v10106_v38  ;;  %7230 = vmatpush1.bf16.msra.mxu1 %v10108_v39  ;;  %v1090_v38 = vld [vmem:[%s11708_s16 + $0x16d8] sm:$0xff]  ;;  %v10218_v39 = vcombine.low %v1065_v26, %v1073_v27  ;;  %v1177_v27 = vld [vmem:[%s11708_s16 + $0x1990] sm:$0xff] }
 0x249   : > { %7067 = vmatprep.subr.bf16.mxu0 %v10123_v41  ;;  %7231 = vmatprep.subr.bf16.mxu1 %v10125_v53  ;;  %v10220_v41 = vcombine.low %v1066_v59, %v1074_v28  ;;  %v10235_v53 = vcombine.high %v1081_v33, %v1089_v36  ;;  %v10237_v42 = vcombine.high %v1082_v37, %v1090_v38  ;;  %v1185_v59 = vld [vmem:[%s11708_s16 + $0x19d0] sm:$0xff]  ;;  %v1178_v28 = vld [vmem:[%s11708_s16 + $0x1998] sm:$0xff] }
 0x24c   : > { %7068 = vmatpush1.bf16.msra.mxu0 %v10122_v47  ;;  %7232 = vmatpush1.bf16.msra.mxu1 %v10124_v48  ;;  %v1106_v47 = vld [vmem:[%s11708_s16 + $0x1758] sm:$0xff]  ;;  %v10234_v48 = vcombine.low %v1081_v33, %v1089_v36  ;;  %v1193_v36 = vld [vmem:[%s11708_s16 + $0x1a10] sm:$0xff] }
 0x24d   : > { %7069 = vmatprep.subr.bf16.mxu0 %v10139_v49  ;;  %7233 = vmatprep.subr.bf16.mxu1 %v10141_v50  ;;  %v10236_v49 = vcombine.low %v1082_v37, %v1090_v38  ;;  %v10251_v50 = vcombine.high %v1097_v44, %v1105_v45  ;;  %v10253_v51 = vcombine.high %v1098_v46, %v1106_v47  ;;  %v1201_v37 = vld [vmem:[%s11708_s16 + $0x1a50] sm:$0xff]  ;;  %v1194_v38 = vld [vmem:[%s11708_s16 + $0x1a18] sm:$0xff] }
 0x250   : > { %7070 = vmatpush1.bf16.msra.mxu0 %v10138_v56  ;;  %7234 = vmatpush1.bf16.msra.mxu1 %v10140_v57  ;;  %v1122_v56 = vld [vmem:[%s11708_s16 + $0x17d8] sm:$0xff]  ;;  %v10250_v57 = vcombine.low %v1097_v44, %v1105_v45  ;;  %v1209_v45 = vld [vmem:[%s11708_s16 + $0x1a90] sm:$0xff] }
 0x251   : > { %7071 = vmatprep.subr.bf16.mxu0 %v10155_v58  ;;  %7235 = vmatprep.subr.bf16.mxu1 %v10157_v60  ;;  %v10252_v58 = vcombine.low %v1098_v46, %v1106_v47  ;;  %v10267_v60 = vcombine.high %v1113_v52, %v1121_v54  ;;  %v10269_v61 = vcombine.high %v1114_v55, %v1122_v56  ;;  %v1217_v46 = vld [vmem:[%s11708_s16 + $0x1ad0] sm:$0xff]  ;;  %v1210_v47 = vld [vmem:[%s11708_s16 + $0x1a98] sm:$0xff] }
 0x254   : > { %7072 = vmatpush1.bf16.msra.mxu0 %v10154_v3  ;;  %7236 = vmatpush1.bf16.msra.mxu1 %v10156_v4  ;;  %v1138_v3 = vld [vmem:[%s11708_s16 + $0x1858] sm:$0xff]  ;;  %v10266_v4 = vcombine.low %v1113_v52, %v1121_v54  ;;  %v1225_v54 = vld [vmem:[%s11708_s16 + $0x1b10] sm:$0xff] }
 0x255   : > { %7073 = vmatprep.subr.bf16.mxu0 %v10171_v5  ;;  %7237 = vmatprep.subr.bf16.mxu1 %v10173_v6  ;;  %v10268_v5 = vcombine.low %v1114_v55, %v1122_v56  ;;  %v10283_v6 = vcombine.high %v1129_v62, %v1137_v0  ;;  %v10285_v7 = vcombine.high %v1130_v1, %v1138_v3  ;;  %v1233_v55 = vld [vmem:[%s11708_s16 + $0x1b50] sm:$0xff]  ;;  %v1226_v56 = vld [vmem:[%s11708_s16 + $0x1b18] sm:$0xff] }
 0x258   : > { %7074 = vmatpush1.bf16.msra.mxu0 %v10170_v13  ;;  %7238 = vmatpush1.bf16.msra.mxu1 %v10172_v14  ;;  %v1154_v13 = vld [vmem:[%s11708_s16 + $0x18d8] sm:$0xff]  ;;  %v10282_v14 = vcombine.low %v1129_v62, %v1137_v0 }
 0x259   : > { %7075 = vmatprep.subr.bf16.mxu0 %v10187_v15  ;;  %7239 = vmatprep.subr.bf16.mxu1 %v10189_v16  ;;  %v10284_v15 = vcombine.low %v1130_v1, %v1138_v3  ;;  %v10299_v16 = vcombine.high %v1145_v8, %v1153_v10  ;;  %v10301_v17 = vcombine.high %v1146_v11, %v1154_v13  ;;  %v1241_v1 = vld [vmem:[%s11708_s16 + $0x1b90] sm:$0xff] }
 0x25a   : > { %v1249_v3 = vld [vmem:[%s11708_s16 + $0x1bd0] sm:$0xff] }
 0x25c   : > { %7076 = vmatpush1.bf16.msra.mxu0 %v10186_v21  ;;  %7240 = vmatpush1.bf16.msra.mxu1 %v10188_v22  ;;  %v1170_v21 = vld [vmem:[%s11708_s16 + $0x1958] sm:$0xff]  ;;  %v10298_v22 = vcombine.low %v1145_v8, %v1153_v10 }
 0x25d   : > { %7077 = vmatprep.subr.bf16.mxu0 %v10203_v23  ;;  %7241 = vmatprep.subr.bf16.mxu1 %v10205_v24  ;;  %v10300_v23 = vcombine.low %v1146_v11, %v1154_v13  ;;  %v10315_v24 = vcombine.high %v1161_v18, %v1169_v19  ;;  %v10317_v26 = vcombine.high %v1162_v20, %v1170_v21 }
 0x25e   : > { %v10378_v11 = vcombine.low %v1225_v54, %v1233_v55 }
 0x260   : > { %7078 = vmatpush1.bf16.msra.mxu0 %v10202_v29  ;;  %7242 = vmatpush1.bf16.msra.mxu1 %v10204_v30  ;;  %v1186_v29 = vld [vmem:[%s11708_s16 + $0x19d8] sm:$0xff]  ;;  %v10314_v30 = vcombine.low %v1161_v18, %v1169_v19  ;;  %v1257_v19 = vld [vmem:[%s11708_s16 + $0x1c10] sm:$0xff] }
 0x261   : > { %7079 = vmatprep.subr.bf16.mxu0 %v10219_v31  ;;  %7243 = vmatprep.subr.bf16.mxu1 %v10221_v32  ;;  %v10316_v31 = vcombine.low %v1162_v20, %v1170_v21  ;;  %v10331_v32 = vcombine.high %v1177_v27, %v1185_v59  ;;  %v10333_v33 = vcombine.high %v1178_v28, %v1186_v29  ;;  %v1265_v20 = vld [vmem:[%s11708_s16 + $0x1c50] sm:$0xff]  ;;  %v1258_v21 = vld [vmem:[%s11708_s16 + $0x1c18] sm:$0xff] }
 0x264   : > { %7080 = vmatpush1.bf16.msra.mxu0 %v10218_v39  ;;  %7244 = vmatpush1.bf16.msra.mxu1 %v10220_v41  ;;  %v1202_v39 = vld [vmem:[%s11708_s16 + $0x1a58] sm:$0xff]  ;;  %v10330_v41 = vcombine.low %v1177_v27, %v1185_v59  ;;  %v1273_v59 = vld [vmem:[%s11708_s16 + $0x1c90] sm:$0xff] }
 0x265   : > { %7081 = vmatprep.subr.bf16.mxu0 %v10235_v53  ;;  %7245 = vmatprep.subr.bf16.mxu1 %v10237_v42  ;;  %v10332_v53 = vcombine.low %v1178_v28, %v1186_v29  ;;  %v10347_v42 = vcombine.high %v1193_v36, %v1201_v37  ;;  %v10349_v44 = vcombine.high %v1194_v38, %v1202_v39  ;;  %v1281_v28 = vld [vmem:[%s11708_s16 + $0x1cd0] sm:$0xff]  ;;  %v1274_v29 = vld [vmem:[%s11708_s16 + $0x1c98] sm:$0xff] }
 0x268   : > { %7082 = vmatpush1.bf16.msra.mxu0 %v10234_v48  ;;  %7246 = vmatpush1.bf16.msra.mxu1 %v10236_v49  ;;  %v1218_v48 = vld [vmem:[%s11708_s16 + $0x1ad8] sm:$0xff]  ;;  %v10346_v49 = vcombine.low %v1193_v36, %v1201_v37  ;;  %v1289_v37 = vld [vmem:[%s11708_s16 + $0x1d10] sm:$0xff] }
 0x269   : > { %7083 = vmatprep.subr.bf16.mxu0 %v10251_v50  ;;  %7247 = vmatprep.subr.bf16.mxu1 %v10253_v51  ;;  %v10348_v50 = vcombine.low %v1194_v38, %v1202_v39  ;;  %v10363_v51 = vcombine.high %v1209_v45, %v1217_v46  ;;  %v10365_v52 = vcombine.high %v1210_v47, %v1218_v48  ;;  %v1297_v38 = vld [vmem:[%s11708_s16 + $0x1d50] sm:$0xff]  ;;  %v1290_v39 = vld [vmem:[%s11708_s16 + $0x1d18] sm:$0xff] }
 0x26c   : > { %7084 = vmatpush1.bf16.msra.mxu0 %v10250_v57  ;;  %7248 = vmatpush1.bf16.msra.mxu1 %v10252_v58  ;;  %v1234_v57 = vld [vmem:[%s11708_s16 + $0x1b58] sm:$0xff]  ;;  %v10362_v58 = vcombine.low %v1209_v45, %v1217_v46  ;;  %v1305_v46 = vld [vmem:[%s11708_s16 + $0x1d90] sm:$0xff] }
 0x26d   : > { %7085 = vmatprep.subr.bf16.mxu0 %v10267_v60  ;;  %7249 = vmatprep.subr.bf16.mxu1 %v10269_v61  ;;  %v10364_v60 = vcombine.low %v1210_v47, %v1218_v48  ;;  %v10379_v61 = vcombine.high %v1225_v54, %v1233_v55  ;;  %v10381_v0 = vcombine.high %v1226_v56, %v1234_v57  ;;  %v1313_v47 = vld [vmem:[%s11708_s16 + $0x1dd0] sm:$0xff]  ;;  %v1306_v48 = vld [vmem:[%s11708_s16 + $0x1d98] sm:$0xff] }
 0x26e   : > { %v1321_v55 = vld [vmem:[%s11708_s16 + $0x1e10] sm:$0xff] }
 0x270   : > { %7086 = vmatpush1.bf16.msra.mxu0 %v10266_v4  ;;  %7250 = vmatpush1.bf16.msra.mxu1 %v10268_v5 }
 0x271   : > { %7096 = vmatprep.subr.bf16.mxu0 %v10283_v6  ;;  %7260 = vmatprep.subr.bf16.mxu1 %v10285_v7  ;;  %v1242_v6 = vld [vmem:[%s11708_s16 + $0x1b98] sm:$0xff] }
 0x272   : > { %v1250_v7 = vld [vmem:[%s11708_s16 + $0x1bd8] sm:$0xff] }
 0x273   : > { %7088 = vmatmul.mubr.bf16.vlgmr.msra.gmra.mrb[4].mxu0 %v11828_v35  ;;  %7252 = vmatmul.mubr.bf16.vlgmr.msra.gmra.mrb[4].mxu1 %v11828_v35  ;;  %v10397_v18 = vcombine.high %v1242_v6, %v1250_v7 }
 0x274   : > { %7097 = vmatpush1.bf16.msra.mxu0 %v10282_v14  ;;  %7261 = vmatpush1.bf16.msra.mxu1 %v10284_v15  ;;  %v10380_v15 = vcombine.low %v1226_v56, %v1234_v57  ;;  %v1329_v56 = vld [vmem:[%s11708_s16 + $0x1e50] sm:$0xff]  ;;  %v1322_v57 = vld [vmem:[%s11708_s16 + $0x1e18] sm:$0xff] }
 0x275   : > { %7098 = vmatprep.subr.bf16.mxu0 %v10299_v16  ;;  %7262 = vmatprep.subr.bf16.mxu1 %v10301_v17  ;;  %v10395_v16 = vcombine.high %v1241_v1, %v1249_v3 }
 0x276   : > { %7128 = vmatprep.mubr.bf16.mxu0 %v11972_v2  ;;  %7292 = vmatprep.mubr.bf16.mxu1 %v11972_v2 }
 0x278   : > { %7099 = vmatpush1.bf16.msra.mxu0 %v10298_v22  ;;  %7263 = vmatpush1.bf16.msra.mxu1 %v10300_v23  ;;  %v1266_v22 = vld [vmem:[%s11708_s16 + $0x1c58] sm:$0xff]  ;;  %v10394_v23 = vcombine.low %v1241_v1, %v1249_v3  ;;  %v1337_v3 = vld [vmem:[%s11708_s16 + $0x1e90] sm:$0xff] }
 0x279   : > { %7100 = vmatprep.subr.bf16.mxu0 %v10315_v24  ;;  %7264 = vmatprep.subr.bf16.mxu1 %v10317_v26  ;;  %v10396_v24 = vcombine.low %v1242_v6, %v1250_v7  ;;  %v10411_v26 = vcombine.high %v1257_v19, %v1265_v20  ;;  %v10413_v27 = vcombine.high %v1258_v21, %v1266_v22  ;;  %v1345_v6 = vld [vmem:[%s11708_s16 + $0x1ed0] sm:$0xff]  ;;  %v1338_v7 = vld [vmem:[%s11708_s16 + $0x1e98] sm:$0xff] }
 0x27c   : > { %7101 = vmatpush1.bf16.msra.mxu0 %v10314_v30  ;;  %7265 = vmatpush1.bf16.msra.mxu1 %v10316_v31  ;;  %v1282_v30 = vld [vmem:[%s11708_s16 + $0x1cd8] sm:$0xff]  ;;  %v10410_v31 = vcombine.low %v1257_v19, %v1265_v20  ;;  %v10490_v20 = vcombine.low %v1337_v3, %v1345_v6 }
 0x27d   : > { %7102 = vmatprep.subr.bf16.mxu0 %v10331_v32  ;;  %7266 = vmatprep.subr.bf16.mxu1 %v10333_v33  ;;  %v10412_v32 = vcombine.low %v1258_v21, %v1266_v22  ;;  %v10427_v33 = vcombine.high %v1273_v59, %v1281_v28  ;;  %v10429_v36 = vcombine.high %v1274_v29, %v1282_v30  ;;  %v1362_v19 = vld [vmem:[%s11708_s16 + $0x1f58] sm:$0xff] }
 0x280   : > { %7103 = vmatpush1.bf16.msra.mxu0 %v10330_v41  ;;  %7267 = vmatpush1.bf16.msra.mxu1 %v10332_v53  ;;  %v1298_v41 = vld [vmem:[%s11708_s16 + $0x1d58] sm:$0xff]  ;;  %v10426_v53 = vcombine.low %v1273_v59, %v1281_v28 }
 0x281   : > { %7104 = vmatprep.subr.bf16.mxu0 %v10347_v42  ;;  %7268 = vmatprep.subr.bf16.mxu1 %v10349_v44  ;;  %v10428_v42 = vcombine.low %v1274_v29, %v1282_v30  ;;  %v10443_v44 = vcombine.high %v1289_v37, %v1297_v38  ;;  %v10445_v45 = vcombine.high %v1290_v39, %v1298_v41  ;;  %v1378_v59 = vld [vmem:[%s11708_s16 + $0x1fd8] sm:$0xff] }
 0x284   : > { %7105 = vmatpush1.bf16.msra.mxu0 %v10346_v49  ;;  %7269 = vmatpush1.bf16.msra.mxu1 %v10348_v50  ;;  %v1314_v49 = vld [vmem:[%s11708_s16 + $0x1dd8] sm:$0xff]  ;;  %v10442_v50 = vcombine.low %v1289_v37, %v1297_v38  ;;  %v372_v37 = vld [vmem:[%s11708_s16 + $0x68] sm:$0xff] }
 0x285   : > { %7106 = vmatprep.subr.bf16.mxu0 %v10363_v51  ;;  %7270 = vmatprep.subr.bf16.mxu1 %v10365_v52  ;;  %v10444_v51 = vcombine.low %v1290_v39, %v1298_v41  ;;  %v10459_v52 = vcombine.high %v1305_v46, %v1313_v47  ;;  %v10461_v54 = vcombine.high %v1306_v48, %v1314_v49 }
 0x286   : > { %v12272_v62 = vpop.f32.mrb[0].mxu0  ;;  %v12276_v4 = vpop.f32.mrb[0].mxu1 }
 0x287   : > { %v12278_v5 = vpop.f32.mrb[1].mxu0  ;;  %v12282_v8 = vpop.f32.mrb[1].mxu1 }
 0x288   : > { %v6806_v10 = vpop.f32.mrb[2].mxu0  ;;  %7107 = vmatpush1.bf16.msra.mxu0 %v10362_v58  ;;  %v6970_v13 = vpop.f32.mrb[2].mxu1  ;;  %7271 = vmatpush1.bf16.msra.mxu1 %v10364_v60  ;;  %v1330_v58 = vld [vmem:[%s11708_s16 + $0x1e58] sm:$0xff]  ;;  %v10458_v60 = vcombine.low %v1305_v46, %v1313_v47  ;;  %v388_v46 = vld [vmem:[%s11708_s16 + $0xe8] sm:$0xff] }
 0x289   : > { %v6807_v14 = vpop.f32.mrb[3].mxu0  ;;  %7108 = vmatprep.subr.bf16.mxu0 %v10379_v61  ;;  %v6971_v17 = vpop.f32.mrb[3].mxu1  ;;  %7272 = vmatprep.subr.bf16.mxu1 %v10381_v0  ;;  %v10460_v61 = vcombine.low %v1306_v48, %v1314_v49  ;;  %v10475_v0 = vcombine.high %v1321_v55, %v1329_v56  ;;  %v10477_v1 = vcombine.high %v1322_v57, %v1330_v58  ;;  %v1346_v10 = vld [vmem:[%s11708_s16 + $0x1ed8] sm:$0xff] }
 0x28a   : > { %v10476_v13 = vcombine.low %v1322_v57, %v1330_v58  ;;  %v10491_v14 = vcombine.high %v1337_v3, %v1345_v6  ;;  %v1361_v17 = vld [vmem:[%s11708_s16 + $0x1f50] sm:$0xff]  ;;  %v10492_v21 = vcombine.low %v1338_v7, %v1346_v10  ;;  %v420_v3 = vld [vmem:[%s11708_s16 + $0x1e8] sm:$0xff] }
 0x28c   : > { %7109 = vmatpush1.bf16.msra.mxu0 %v10378_v11  ;;  %7273 = vmatpush1.bf16.msra.mxu1 %v10380_v15  ;;  %v10474_v11 = vcombine.low %v1321_v55, %v1329_v56  ;;  %v10493_v15 = vcombine.high %v1338_v7, %v1346_v10  ;;  %v404_v55 = vld [vmem:[%s11708_s16 + $0x168] sm:$0xff] }
 0x28d   : > { %7110 = vmatprep.subr.bf16.mxu0 %v10395_v16  ;;  %7274 = vmatprep.subr.bf16.mxu1 %v10397_v18  ;;  %v1353_v16 = vld [vmem:[%s11708_s16 + $0x1f10] sm:$0xff]  ;;  %v1354_v18 = vld [vmem:[%s11708_s16 + $0x1f18] sm:$0xff] }
 0x28e   : > { %v10507_v22 = vcombine.high %v1353_v16, %v1361_v17  ;;  %v10506_v28 = vcombine.low %v1353_v16, %v1361_v17  ;;  %v10508_v29 = vcombine.low %v1354_v18, %v1362_v19  ;;  %v436_v16 = vld [vmem:[%s11708_s16 + $0x268] sm:$0xff] }
 0x290   : > { %7111 = vmatpush1.bf16.msra.mxu0 %v10394_v23  ;;  %7275 = vmatpush1.bf16.msra.mxu1 %v10396_v24  ;;  %v10509_v23 = vcombine.high %v1354_v18, %v1362_v19  ;;  %v1369_v24 = vld [vmem:[%s11708_s16 + $0x1f90] sm:$0xff] }
 0x291   : > { %7112 = vmatprep.subr.bf16.mxu0 %v10411_v26  ;;  %7276 = vmatprep.subr.bf16.mxu1 %v10413_v27  ;;  %v1377_v26 = vld [vmem:[%s11708_s16 + $0x1fd0] sm:$0xff]  ;;  %v1370_v27 = vld [vmem:[%s11708_s16 + $0x1f98] sm:$0xff] }
 0x292   : > { %v10523_v30 = vcombine.high %v1369_v24, %v1377_v26  ;;  %v10522_v38 = vcombine.low %v1369_v24, %v1377_v26  ;;  %v10524_v39 = vcombine.low %v1370_v27, %v1378_v59  ;;  %v452_v24 = vld [vmem:[%s11708_s16 + $0x2e8] sm:$0xff] }
 0x294   : > { %7113 = vmatpush1.bf16.msra.mxu0 %v10410_v31  ;;  %7277 = vmatpush1.bf16.msra.mxu1 %v10412_v32  ;;  %v10525_v31 = vcombine.high %v1370_v27, %v1378_v59  ;;  %v363_v32 = vld [vmem:[%s11708_s16 + $0x20] sm:$0xff] }
 0x295   : > { %7114 = vmatprep.subr.bf16.mxu0 %v10427_v33  ;;  %7278 = vmatprep.subr.bf16.mxu1 %v10429_v36  ;;  %v371_v33 = vld [vmem:[%s11708_s16 + $0x60] sm:$0xff]  ;;  %v364_v36 = vld [vmem:[%s11708_s16 + $0x28] sm:$0xff] }
 0x296   : > { %v9519_v41 = vcombine.high %v363_v32, %v371_v33  ;;  %v9518_v47 = vcombine.low %v363_v32, %v371_v33  ;;  %v9520_v48 = vcombine.low %v364_v36, %v372_v37  ;;  %v468_v32 = vld [vmem:[%s11708_s16 + $0x368] sm:$0xff] }
 0x298   : > { %7115 = vmatpush1.bf16.msra.mxu0 %v10426_v53  ;;  %7279 = vmatpush1.bf16.msra.mxu1 %v10428_v42  ;;  %v9521_v53 = vcombine.high %v364_v36, %v372_v37  ;;  %v379_v42 = vld [vmem:[%s11708_s16 + $0xa0] sm:$0xff] }
 0x299   : > { %7116 = vmatprep.subr.bf16.mxu0 %v10443_v44  ;;  %7280 = vmatprep.subr.bf16.mxu1 %v10445_v45  ;;  %v387_v44 = vld [vmem:[%s11708_s16 + $0xe0] sm:$0xff]  ;;  %v380_v45 = vld [vmem:[%s11708_s16 + $0xa8] sm:$0xff] }
 0x29a   : > { %v9535_v49 = vcombine.high %v379_v42, %v387_v44  ;;  %v9534_v56 = vcombine.low %v379_v42, %v387_v44  ;;  %v9536_v57 = vcombine.low %v380_v45, %v388_v46  ;;  %v484_v42 = vld [vmem:[%s11708_s16 + $0x3e8] sm:$0xff] }
 0x29c   : > { %7117 = vmatpush1.bf16.msra.mxu0 %v10442_v50  ;;  %7281 = vmatpush1.bf16.msra.mxu1 %v10444_v51  ;;  %v9537_v50 = vcombine.high %v380_v45, %v388_v46  ;;  %v395_v51 = vld [vmem:[%s11708_s16 + $0x120] sm:$0xff] }
 0x29d   : > { %7118 = vmatprep.subr.bf16.mxu0 %v10459_v52  ;;  %7282 = vmatprep.subr.bf16.mxu1 %v10461_v54  ;;  %v403_v52 = vld [vmem:[%s11708_s16 + $0x160] sm:$0xff]  ;;  %v396_v54 = vld [vmem:[%s11708_s16 + $0x128] sm:$0xff] }
 0x29e   : > { %v9551_v58 = vcombine.high %v395_v51, %v403_v52  ;;  %v9550_v6 = vcombine.low %v395_v51, %v403_v52  ;;  %v9552_v7 = vcombine.low %v396_v54, %v404_v55  ;;  %v500_v51 = vld [vmem:[%s11708_s16 + $0x468] sm:$0xff] }
 0x2a0   : > { %7119 = vmatpush1.bf16.msra.mxu0 %v10458_v60  ;;  %7283 = vmatpush1.bf16.msra.mxu1 %v10460_v61  ;;  %v9553_v60 = vcombine.high %v396_v54, %v404_v55  ;;  %v411_v61 = vld [vmem:[%s11708_s16 + $0x1a0] sm:$0xff] }
 0x2a1   : > { %7120 = vmatprep.subr.bf16.mxu0 %v10475_v0  ;;  %7284 = vmatprep.subr.bf16.mxu1 %v10477_v1  ;;  %v419_v0 = vld [vmem:[%s11708_s16 + $0x1e0] sm:$0xff]  ;;  %v412_v1 = vld [vmem:[%s11708_s16 + $0x1a8] sm:$0xff] }
 0x2a2   : > { %v9567_v10 = vcombine.high %v411_v61, %v419_v0  ;;  %v9566_v17 = vcombine.low %v411_v61, %v419_v0  ;;  %v9568_v18 = vcombine.low %v412_v1, %v420_v3  ;;  %v516_v61 = vld [vmem:[%s11708_s16 + $0x4e8] sm:$0xff] }
 0x2a4   : > { %7121 = vmatpush1.bf16.msra.mxu0 %v10474_v11  ;;  %7285 = vmatpush1.bf16.msra.mxu1 %v10476_v13  ;;  %v9569_v11 = vcombine.high %v412_v1, %v420_v3  ;;  %v427_v13 = vld [vmem:[%s11708_s16 + $0x220] sm:$0xff] }
 0x2a5   : > { %7122 = vmatprep.subr.bf16.mxu0 %v10491_v14  ;;  %7286 = vmatprep.subr.bf16.mxu1 %v10493_v15  ;;  %v435_v14 = vld [vmem:[%s11708_s16 + $0x260] sm:$0xff]  ;;  %v428_v15 = vld [vmem:[%s11708_s16 + $0x228] sm:$0xff] }
 0x2a6   : > { %v9583_v19 = vcombine.high %v427_v13, %v435_v14  ;;  %v9582_v26 = vcombine.low %v427_v13, %v435_v14  ;;  %v9584_v27 = vcombine.low %v428_v15, %v436_v16  ;;  %v532_v13 = vld [vmem:[%s11708_s16 + $0x568] sm:$0xff] }
 0x2a8   : > { %7123 = vmatpush1.bf16.msra.mxu0 %v10490_v20  ;;  %7287 = vmatpush1.bf16.msra.mxu1 %v10492_v21  ;;  %v9585_v20 = vcombine.high %v428_v15, %v436_v16  ;;  %v443_v21 = vld [vmem:[%s11708_s16 + $0x2a0] sm:$0xff] }
 0x2a9   : > { %7124 = vmatprep.subr.bf16.mxu0 %v10507_v22  ;;  %7288 = vmatprep.subr.bf16.mxu1 %v10509_v23  ;;  %v451_v22 = vld [vmem:[%s11708_s16 + $0x2e0] sm:$0xff]  ;;  %v444_v23 = vld [vmem:[%s11708_s16 + $0x2a8] sm:$0xff] }
 0x2aa   : > { %v9599_v59 = vcombine.high %v443_v21, %v451_v22  ;;  %v9598_v33 = vcombine.low %v443_v21, %v451_v22  ;;  %v9600_v36 = vcombine.low %v444_v23, %v452_v24  ;;  %v548_v21 = vld [vmem:[%s11708_s16 + $0x5e8] sm:$0xff] }
 0x2ac   : > { %7125 = vmatpush1.bf16.msra.mxu0 %v10506_v28  ;;  %7289 = vmatpush1.bf16.msra.mxu1 %v10508_v29  ;;  %v9601_v28 = vcombine.high %v444_v23, %v452_v24  ;;  %v459_v29 = vld [vmem:[%s11708_s16 + $0x320] sm:$0xff] }
 0x2ad   : > { %7126 = vmatprep.subr.bf16.mxu0 %v10523_v30  ;;  %7290 = vmatprep.subr.bf16.mxu1 %v10525_v31  ;;  %v467_v30 = vld [vmem:[%s11708_s16 + $0x360] sm:$0xff]  ;;  %v460_v31 = vld [vmem:[%s11708_s16 + $0x328] sm:$0xff] }
 0x2ae   : > { %v9615_v37 = vcombine.high %v459_v29, %v467_v30  ;;  %v9614_v44 = vcombine.low %v459_v29, %v467_v30  ;;  %v9616_v45 = vcombine.low %v460_v31, %v468_v32  ;;  %v564_v29 = vld [vmem:[%s11708_s16 + $0x668] sm:$0xff] }
 0x2b0   : > { %7127 = vmatpush1.bf16.msra.mxu0 %v10522_v38  ;;  %7291 = vmatpush1.bf16.msra.mxu1 %v10524_v39  ;;  %v9617_v38 = vcombine.high %v460_v31, %v468_v32  ;;  %v475_v39 = vld [vmem:[%s11708_s16 + $0x3a0] sm:$0xff] }
 0x2b1   : > { %7301 = vmatprep.subr.bf16.mxu0 %v9519_v41  ;;  %7465 = vmatprep.subr.bf16.mxu1 %v9521_v53  ;;  %v483_v41 = vld [vmem:[%s11708_s16 + $0x3e0] sm:$0xff]  ;;  %v476_v53 = vld [vmem:[%s11708_s16 + $0x3a8] sm:$0xff] }
 0x2b2   : > { %v9631_v46 = vcombine.high %v475_v39, %v483_v41  ;;  %v9630_v52 = vcombine.low %v475_v39, %v483_v41  ;;  %v9632_v54 = vcombine.low %v476_v53, %v484_v42  ;;  %v580_v39 = vld [vmem:[%s11708_s16 + $0x6e8] sm:$0xff] }
 0x2b3   : > { %7129 = vmatmul.mubr.bf16.vlgmr.msra.gmra.mrb[4].mxu0 %v12040_v12  ;;  %7293 = vmatmul.mubr.bf16.vlgmr.msra.gmra.mrb[4].mxu1 %v12040_v12 }
 0x2b4   : > { %7302 = vmatpush1.bf16.msra.mxu0 %v9518_v47  ;;  %7466 = vmatpush1.bf16.msra.mxu1 %v9520_v48  ;;  %v9633_v47 = vcombine.high %v476_v53, %v484_v42  ;;  %v491_v48 = vld [vmem:[%s11708_s16 + $0x420] sm:$0xff] }
 0x2b5   : > { %7303 = vmatprep.subr.bf16.mxu0 %v9535_v49  ;;  %7467 = vmatprep.subr.bf16.mxu1 %v9537_v50  ;;  %v499_v49 = vld [vmem:[%s11708_s16 + $0x460] sm:$0xff]  ;;  %v492_v50 = vld [vmem:[%s11708_s16 + $0x428] sm:$0xff] }
 0x2b6   : > { %7333 = vmatprep.mubr.bf16.mxu0 %v11769_v9  ;;  %7497 = vmatprep.mubr.bf16.mxu1 %v11769_v9  ;;  %v9647_v55 = vcombine.high %v491_v48, %v499_v49  ;;  %v9646_v0 = vcombine.low %v491_v48, %v499_v49  ;;  %v9648_v1 = vcombine.low %v492_v50, %v500_v51  ;;  %v596_v48 = vld [vmem:[%s11708_s16 + $0x768] sm:$0xff] }
 0x2b8   : > { %7304 = vmatpush1.bf16.msra.mxu0 %v9534_v56  ;;  %7468 = vmatpush1.bf16.msra.mxu1 %v9536_v57  ;;  %v9649_v56 = vcombine.high %v492_v50, %v500_v51  ;;  %v507_v57 = vld [vmem:[%s11708_s16 + $0x4a0] sm:$0xff] }
 0x2b9   : > { %7305 = vmatprep.subr.bf16.mxu0 %v9551_v58  ;;  %7469 = vmatprep.subr.bf16.mxu1 %v9553_v60  ;;  %v515_v58 = vld [vmem:[%s11708_s16 + $0x4e0] sm:$0xff]  ;;  %v508_v60 = vld [vmem:[%s11708_s16 + $0x4a8] sm:$0xff] }
 0x2ba   : > { %v9663_v3 = vcombine.high %v507_v57, %v515_v58  ;;  %v9662_v14 = vcombine.low %v507_v57, %v515_v58  ;;  %v9664_v15 = vcombine.low %v508_v60, %v516_v61  ;;  %v612_v57 = vld [vmem:[%s11708_s16 + $0x7e8] sm:$0xff] }
 0x2bc   : > { %7306 = vmatpush1.bf16.msra.mxu0 %v9550_v6  ;;  %7470 = vmatpush1.bf16.msra.mxu1 %v9552_v7  ;;  %v9665_v6 = vcombine.high %v508_v60, %v516_v61  ;;  %v523_v7 = vld [vmem:[%s11708_s16 + $0x520] sm:$0xff] }
 0x2bd   : > { %7307 = vmatprep.subr.bf16.mxu0 %v9567_v10  ;;  %7471 = vmatprep.subr.bf16.mxu1 %v9569_v11  ;;  %v531_v10 = vld [vmem:[%s11708_s16 + $0x560] sm:$0xff]  ;;  %v524_v11 = vld [vmem:[%s11708_s16 + $0x528] sm:$0xff] }
 0x2be   : > { %v9679_v16 = vcombine.high %v523_v7, %v531_v10  ;;  %v9678_v22 = vcombine.low %v523_v7, %v531_v10  ;;  %v9680_v23 = vcombine.low %v524_v11, %v532_v13  ;;  %v628_v7 = vld [vmem:[%s11708_s16 + $0x868] sm:$0xff] }
 0x2c0   : > { %7308 = vmatpush1.bf16.msra.mxu0 %v9566_v17  ;;  %7472 = vmatpush1.bf16.msra.mxu1 %v9568_v18  ;;  %v9681_v17 = vcombine.high %v524_v11, %v532_v13  ;;  %v539_v18 = vld [vmem:[%s11708_s16 + $0x5a0] sm:$0xff] }
 0x2c1   : > { %7309 = vmatprep.subr.bf16.mxu0 %v9583_v19  ;;  %7473 = vmatprep.subr.bf16.mxu1 %v9585_v20  ;;  %v547_v19 = vld [vmem:[%s11708_s16 + $0x5e0] sm:$0xff]  ;;  %v540_v20 = vld [vmem:[%s11708_s16 + $0x5a8] sm:$0xff] }
 0x2c2   : > { %v9695_v24 = vcombine.high %v539_v18, %v547_v19  ;;  %v9694_v30 = vcombine.low %v539_v18, %v547_v19  ;;  %v9696_v31 = vcombine.low %v540_v20, %v548_v21  ;;  %v644_v18 = vld [vmem:[%s11708_s16 + $0x8e8] sm:$0xff] }
 0x2c4   : > { %7310 = vmatpush1.bf16.msra.mxu0 %v9582_v26  ;;  %7474 = vmatpush1.bf16.msra.mxu1 %v9584_v27  ;;  %v9697_v26 = vcombine.high %v540_v20, %v548_v21  ;;  %v555_v27 = vld [vmem:[%s11708_s16 + $0x620] sm:$0xff] }
 0x2c5   : > { %7311 = vmatprep.subr.bf16.mxu0 %v9599_v59  ;;  %7475 = vmatprep.subr.bf16.mxu1 %v9601_v28  ;;  %v563_v59 = vld [vmem:[%s11708_s16 + $0x660] sm:$0xff]  ;;  %v556_v28 = vld [vmem:[%s11708_s16 + $0x628] sm:$0xff] }
 0x2c6   : > { %v9711_v32 = vcombine.high %v555_v27, %v563_v59  ;;  %v9710_v41 = vcombine.low %v555_v27, %v563_v59  ;;  %v9712_v53 = vcombine.low %v556_v28, %v564_v29  ;;  %v660_v27 = vld [vmem:[%s11708_s16 + $0x968] sm:$0xff] }
 0x2c8   : > { %7312 = vmatpush1.bf16.msra.mxu0 %v9598_v33  ;;  %7476 = vmatpush1.bf16.msra.mxu1 %v9600_v36  ;;  %v9713_v33 = vcombine.high %v556_v28, %v564_v29  ;;  %v571_v36 = vld [vmem:[%s11708_s16 + $0x6a0] sm:$0xff] }
 0x2c9   : > { %7313 = vmatprep.subr.bf16.mxu0 %v9615_v37  ;;  %7477 = vmatprep.subr.bf16.mxu1 %v9617_v38  ;;  %v579_v37 = vld [vmem:[%s11708_s16 + $0x6e0] sm:$0xff]  ;;  %v572_v38 = vld [vmem:[%s11708_s16 + $0x6a8] sm:$0xff] }
 0x2ca   : > { %v9727_v42 = vcombine.high %v571_v36, %v579_v37  ;;  %v9726_v49 = vcombine.low %v571_v36, %v579_v37  ;;  %v9728_v50 = vcombine.low %v572_v38, %v580_v39  ;;  %v676_v36 = vld [vmem:[%s11708_s16 + $0x9e8] sm:$0xff] }
 0x2cc   : > { %7314 = vmatpush1.bf16.msra.mxu0 %v9614_v44  ;;  %7478 = vmatpush1.bf16.msra.mxu1 %v9616_v45  ;;  %v9729_v44 = vcombine.high %v572_v38, %v580_v39  ;;  %v587_v45 = vld [vmem:[%s11708_s16 + $0x720] sm:$0xff] }
 0x2cd   : > { %7315 = vmatprep.subr.bf16.mxu0 %v9631_v46  ;;  %7479 = vmatprep.subr.bf16.mxu1 %v9633_v47  ;;  %v595_v46 = vld [vmem:[%s11708_s16 + $0x760] sm:$0xff]  ;;  %v588_v47 = vld [vmem:[%s11708_s16 + $0x728] sm:$0xff] }
 0x2ce   : > { %v9743_v51 = vcombine.high %v587_v45, %v595_v46  ;;  %v9742_v58 = vcombine.low %v587_v45, %v595_v46  ;;  %v9744_v60 = vcombine.low %v588_v47, %v596_v48  ;;  %v692_v45 = vld [vmem:[%s11708_s16 + $0xa68] sm:$0xff] }
 0x2d0   : > { %7316 = vmatpush1.bf16.msra.mxu0 %v9630_v52  ;;  %7480 = vmatpush1.bf16.msra.mxu1 %v9632_v54  ;;  %v9745_v52 = vcombine.high %v588_v47, %v596_v48  ;;  %v603_v54 = vld [vmem:[%s11708_s16 + $0x7a0] sm:$0xff] }
 0x2d1   : > { %7317 = vmatprep.subr.bf16.mxu0 %v9647_v55  ;;  %7481 = vmatprep.subr.bf16.mxu1 %v9649_v56  ;;  %v611_v55 = vld [vmem:[%s11708_s16 + $0x7e0] sm:$0xff]  ;;  %v604_v56 = vld [vmem:[%s11708_s16 + $0x7a8] sm:$0xff] }
 0x2d2   : > { %v9759_v61 = vcombine.high %v603_v54, %v611_v55  ;;  %v9758_v10 = vcombine.low %v603_v54, %v611_v55  ;;  %v9760_v11 = vcombine.low %v604_v56, %v612_v57  ;;  %v708_v54 = vld [vmem:[%s11708_s16 + $0xae8] sm:$0xff] }
 0x2d4   : > { %7318 = vmatpush1.bf16.msra.mxu0 %v9646_v0  ;;  %7482 = vmatpush1.bf16.msra.mxu1 %v9648_v1  ;;  %v9761_v0 = vcombine.high %v604_v56, %v612_v57  ;;  %v619_v1 = vld [vmem:[%s11708_s16 + $0x820] sm:$0xff] }
 0x2d5   : > { %7319 = vmatprep.subr.bf16.mxu0 %v9663_v3  ;;  %7483 = vmatprep.subr.bf16.mxu1 %v9665_v6  ;;  %v627_v3 = vld [vmem:[%s11708_s16 + $0x860] sm:$0xff]  ;;  %v620_v6 = vld [vmem:[%s11708_s16 + $0x828] sm:$0xff] }
 0x2d6   : > { %v9775_v13 = vcombine.high %v619_v1, %v627_v3  ;;  %v9774_v19 = vcombine.low %v619_v1, %v627_v3  ;;  %v9776_v20 = vcombine.low %v620_v6, %v628_v7  ;;  %v724_v1 = vld [vmem:[%s11708_s16 + $0xb68] sm:$0xff] }
 0x2d8   : > { %7320 = vmatpush1.bf16.msra.mxu0 %v9662_v14  ;;  %7484 = vmatpush1.bf16.msra.mxu1 %v9664_v15  ;;  %v9777_v14 = vcombine.high %v620_v6, %v628_v7  ;;  %v635_v15 = vld [vmem:[%s11708_s16 + $0x8a0] sm:$0xff] }
 0x2d9   : > { %7321 = vmatprep.subr.bf16.mxu0 %v9679_v16  ;;  %7485 = vmatprep.subr.bf16.mxu1 %v9681_v17  ;;  %v643_v16 = vld [vmem:[%s11708_s16 + $0x8e0] sm:$0xff]  ;;  %v636_v17 = vld [vmem:[%s11708_s16 + $0x8a8] sm:$0xff] }
 0x2da   : > { %v9791_v21 = vcombine.high %v635_v15, %v643_v16  ;;  %v9790_v59 = vcombine.low %v635_v15, %v643_v16  ;;  %v9792_v28 = vcombine.low %v636_v17, %v644_v18  ;;  %v740_v15 = vld [vmem:[%s11708_s16 + $0xbe8] sm:$0xff] }
 0x2dc   : > { %7322 = vmatpush1.bf16.msra.mxu0 %v9678_v22  ;;  %7486 = vmatpush1.bf16.msra.mxu1 %v9680_v23  ;;  %v9793_v22 = vcombine.high %v636_v17, %v644_v18  ;;  %v651_v23 = vld [vmem:[%s11708_s16 + $0x920] sm:$0xff] }
 0x2dd   : > { %7323 = vmatprep.subr.bf16.mxu0 %v9695_v24  ;;  %7487 = vmatprep.subr.bf16.mxu1 %v9697_v26  ;;  %v659_v24 = vld [vmem:[%s11708_s16 + $0x960] sm:$0xff]  ;;  %v652_v26 = vld [vmem:[%s11708_s16 + $0x928] sm:$0xff] }
 0x2de   : > { %v9807_v29 = vcombine.high %v651_v23, %v659_v24  ;;  %v9806_v37 = vcombine.low %v651_v23, %v659_v24  ;;  %v9808_v38 = vcombine.low %v652_v26, %v660_v27  ;;  %v756_v23 = vld [vmem:[%s11708_s16 + $0xc68] sm:$0xff] }
 0x2e0   : > { %7324 = vmatpush1.bf16.msra.mxu0 %v9694_v30  ;;  %7488 = vmatpush1.bf16.msra.mxu1 %v9696_v31  ;;  %v9809_v30 = vcombine.high %v652_v26, %v660_v27  ;;  %v667_v31 = vld [vmem:[%s11708_s16 + $0x9a0] sm:$0xff] }
 0x2e1   : > { %7325 = vmatprep.subr.bf16.mxu0 %v9711_v32  ;;  %7489 = vmatprep.subr.bf16.mxu1 %v9713_v33  ;;  %v675_v32 = vld [vmem:[%s11708_s16 + $0x9e0] sm:$0xff]  ;;  %v668_v33 = vld [vmem:[%s11708_s16 + $0x9a8] sm:$0xff] }
 0x2e2   : > { %v9823_v39 = vcombine.high %v667_v31, %v675_v32  ;;  %v9822_v46 = vcombine.low %v667_v31, %v675_v32  ;;  %v9824_v47 = vcombine.low %v668_v33, %v676_v36  ;;  %v772_v31 = vld [vmem:[%s11708_s16 + $0xce8] sm:$0xff] }
 0x2e4   : > { %7326 = vmatpush1.bf16.msra.mxu0 %v9710_v41  ;;  %7490 = vmatpush1.bf16.msra.mxu1 %v9712_v53  ;;  %v9825_v41 = vcombine.high %v668_v33, %v676_v36  ;;  %v683_v53 = vld [vmem:[%s11708_s16 + $0xa20] sm:$0xff] }
 0x2e5   : > { %7327 = vmatprep.subr.bf16.mxu0 %v9727_v42  ;;  %7491 = vmatprep.subr.bf16.mxu1 %v9729_v44  ;;  %v691_v42 = vld [vmem:[%s11708_s16 + $0xa60] sm:$0xff]  ;;  %v684_v44 = vld [vmem:[%s11708_s16 + $0xa28] sm:$0xff] }
 0x2e6   : > { %v9839_v48 = vcombine.high %v683_v53, %v691_v42  ;;  %v9838_v55 = vcombine.low %v683_v53, %v691_v42  ;;  %v9840_v56 = vcombine.low %v684_v44, %v692_v45  ;;  %v788_v53 = vld [vmem:[%s11708_s16 + $0xd68] sm:$0xff] }
 0x2e8   : > { %7328 = vmatpush1.bf16.msra.mxu0 %v9726_v49  ;;  %7492 = vmatpush1.bf16.msra.mxu1 %v9728_v50  ;;  %v9841_v49 = vcombine.high %v684_v44, %v692_v45  ;;  %v699_v50 = vld [vmem:[%s11708_s16 + $0xaa0] sm:$0xff] }
 0x2e9   : > { %7329 = vmatprep.subr.bf16.mxu0 %v9743_v51  ;;  %7493 = vmatprep.subr.bf16.mxu1 %v9745_v52  ;;  %v707_v51 = vld [vmem:[%s11708_s16 + $0xae0] sm:$0xff]  ;;  %v700_v52 = vld [vmem:[%s11708_s16 + $0xaa8] sm:$0xff] }
 0x2ea   : > { %v9855_v57 = vcombine.high %v699_v50, %v707_v51  ;;  %v9854_v3 = vcombine.low %v699_v50, %v707_v51  ;;  %v9856_v6 = vcombine.low %v700_v52, %v708_v54  ;;  %v804_v50 = vld [vmem:[%s11708_s16 + $0xde8] sm:$0xff] }
 0x2ec   : > { %7330 = vmatpush1.bf16.msra.mxu0 %v9742_v58  ;;  %7494 = vmatpush1.bf16.msra.mxu1 %v9744_v60  ;;  %v9857_v58 = vcombine.high %v700_v52, %v708_v54  ;;  %v715_v60 = vld [vmem:[%s11708_s16 + $0xb20] sm:$0xff] }
 0x2ed   : > { %7331 = vmatprep.subr.bf16.mxu0 %v9759_v61  ;;  %7495 = vmatprep.subr.bf16.mxu1 %v9761_v0  ;;  %v723_v61 = vld [vmem:[%s11708_s16 + $0xb60] sm:$0xff]  ;;  %v716_v0 = vld [vmem:[%s11708_s16 + $0xb28] sm:$0xff] }
 0x2ee   : > { %v9871_v7 = vcombine.high %v715_v60, %v723_v61  ;;  %v9870_v16 = vcombine.low %v715_v60, %v723_v61  ;;  %v9872_v17 = vcombine.low %v716_v0, %v724_v1  ;;  %v820_v60 = vld [vmem:[%s11708_s16 + $0xe68] sm:$0xff] }
 0x2f0   : > { %7332 = vmatpush1.bf16.msra.mxu0 %v9758_v10  ;;  %7496 = vmatpush1.bf16.msra.mxu1 %v9760_v11  ;;  %v9873_v10 = vcombine.high %v716_v0, %v724_v1  ;;  %v731_v11 = vld [vmem:[%s11708_s16 + $0xba0] sm:$0xff] }
 0x2f1   : > { %7342 = vmatprep.subr.bf16.mxu0 %v9775_v13  ;;  %7506 = vmatprep.subr.bf16.mxu1 %v9777_v14  ;;  %v739_v13 = vld [vmem:[%s11708_s16 + $0xbe0] sm:$0xff]  ;;  %v732_v14 = vld [vmem:[%s11708_s16 + $0xba8] sm:$0xff] }
 0x2f2   : > { %v9887_v18 = vcombine.high %v731_v11, %v739_v13  ;;  %v9886_v24 = vcombine.low %v731_v11, %v739_v13  ;;  %v9888_v26 = vcombine.low %v732_v14, %v740_v15  ;;  %v836_v11 = vld [vmem:[%s11708_s16 + $0xee8] sm:$0xff] }
 0x2f3   : > { %7334 = vmatmul.mubr.bf16.vlgmr.msra.gmra.mrb[8].mxu0 %v11814_v25  ;;  %7498 = vmatmul.mubr.bf16.vlgmr.msra.gmra.mrb[8].mxu1 %v11814_v25 }
 0x2f4   : > { %7343 = vmatpush1.bf16.msra.mxu0 %v9774_v19  ;;  %7507 = vmatpush1.bf16.msra.mxu1 %v9776_v20  ;;  %v9889_v19 = vcombine.high %v732_v14, %v740_v15  ;;  %v747_v20 = vld [vmem:[%s11708_s16 + $0xc20] sm:$0xff] }
 0x2f5   : > { %7344 = vmatprep.subr.bf16.mxu0 %v9791_v21  ;;  %7508 = vmatprep.subr.bf16.mxu1 %v9793_v22  ;;  %v755_v21 = vld [vmem:[%s11708_s16 + $0xc60] sm:$0xff]  ;;  %v748_v22 = vld [vmem:[%s11708_s16 + $0xc28] sm:$0xff] }
 0x2f6   : > { %7374 = vmatprep.mubr.bf16.mxu0 %v11822_v63  ;;  %7538 = vmatprep.mubr.bf16.mxu1 %v11822_v63  ;;  %v9903_v27 = vcombine.high %v747_v20, %v755_v21  ;;  %v9902_v32 = vcombine.low %v747_v20, %v755_v21  ;;  %v9904_v33 = vcombine.low %v748_v22, %v756_v23  ;;  %v852_v20 = vld [vmem:[%s11708_s16 + $0xf68] sm:$0xff] }
 0x2f8   : > { %7345 = vmatpush1.bf16.msra.mxu0 %v9790_v59  ;;  %7509 = vmatpush1.bf16.msra.mxu1 %v9792_v28  ;;  %v9905_v59 = vcombine.high %v748_v22, %v756_v23  ;;  %v763_v28 = vld [vmem:[%s11708_s16 + $0xca0] sm:$0xff] }
 0x2f9   : > { %7346 = vmatprep.subr.bf16.mxu0 %v9807_v29  ;;  %7510 = vmatprep.subr.bf16.mxu1 %v9809_v30  ;;  %v771_v29 = vld [vmem:[%s11708_s16 + $0xce0] sm:$0xff]  ;;  %v764_v30 = vld [vmem:[%s11708_s16 + $0xca8] sm:$0xff] }
 0x2fa   : > { %v9919_v36 = vcombine.high %v763_v28, %v771_v29  ;;  %v9918_v42 = vcombine.low %v763_v28, %v771_v29  ;;  %v9920_v44 = vcombine.low %v764_v30, %v772_v31  ;;  %v868_v28 = vld [vmem:[%s11708_s16 + $0xfe8] sm:$0xff] }
 0x2fc   : > { %7347 = vmatpush1.bf16.msra.mxu0 %v9806_v37  ;;  %7511 = vmatpush1.bf16.msra.mxu1 %v9808_v38  ;;  %v9921_v37 = vcombine.high %v764_v30, %v772_v31  ;;  %v779_v38 = vld [vmem:[%s11708_s16 + $0xd20] sm:$0xff] }
 0x2fd   : > { %7348 = vmatprep.subr.bf16.mxu0 %v9823_v39  ;;  %7512 = vmatprep.subr.bf16.mxu1 %v9825_v41  ;;  %v787_v39 = vld [vmem:[%s11708_s16 + $0xd60] sm:$0xff]  ;;  %v780_v41 = vld [vmem:[%s11708_s16 + $0xd28] sm:$0xff] }
 0x2fe   : > { %v9935_v45 = vcombine.high %v779_v38, %v787_v39  ;;  %v9934_v51 = vcombine.low %v779_v38, %v787_v39  ;;  %v9936_v52 = vcombine.low %v780_v41, %v788_v53  ;;  %v884_v38 = vld [vmem:[%s11708_s16 + $0x1068] sm:$0xff] }
 0x300   : > { %7349 = vmatpush1.bf16.msra.mxu0 %v9822_v46  ;;  %7513 = vmatpush1.bf16.msra.mxu1 %v9824_v47  ;;  %v9937_v46 = vcombine.high %v780_v41, %v788_v53  ;;  %v795_v47 = vld [vmem:[%s11708_s16 + $0xda0] sm:$0xff] }
 0x301   : > { %7350 = vmatprep.subr.bf16.mxu0 %v9839_v48  ;;  %7514 = vmatprep.subr.bf16.mxu1 %v9841_v49  ;;  %v803_v48 = vld [vmem:[%s11708_s16 + $0xde0] sm:$0xff]  ;;  %v796_v49 = vld [vmem:[%s11708_s16 + $0xda8] sm:$0xff] }
 0x302   : > { %v9951_v54 = vcombine.high %v795_v47, %v803_v48  ;;  %v9950_v61 = vcombine.low %v795_v47, %v803_v48  ;;  %v9952_v0 = vcombine.low %v796_v49, %v804_v50  ;;  %v900_v47 = vld [vmem:[%s11708_s16 + $0x10e8] sm:$0xff] }
 0x304   : > { %7351 = vmatpush1.bf16.msra.mxu0 %v9838_v55  ;;  %7515 = vmatpush1.bf16.msra.mxu1 %v9840_v56  ;;  %v9953_v55 = vcombine.high %v796_v49, %v804_v50  ;;  %v811_v56 = vld [vmem:[%s11708_s16 + $0xe20] sm:$0xff] }
 0x305   : > { %7352 = vmatprep.subr.bf16.mxu0 %v9855_v57  ;;  %7516 = vmatprep.subr.bf16.mxu1 %v9857_v58  ;;  %v819_v57 = vld [vmem:[%s11708_s16 + $0xe60] sm:$0xff]  ;;  %v812_v58 = vld [vmem:[%s11708_s16 + $0xe28] sm:$0xff] }
 0x306   : > { %v9967_v1 = vcombine.high %v811_v56, %v819_v57  ;;  %v9966_v13 = vcombine.low %v811_v56, %v819_v57  ;;  %v9968_v14 = vcombine.low %v812_v58, %v820_v60  ;;  %v916_v56 = vld [vmem:[%s11708_s16 + $0x1168] sm:$0xff] }
 0x308   : > { %7353 = vmatpush1.bf16.msra.mxu0 %v9854_v3  ;;  %7517 = vmatpush1.bf16.msra.mxu1 %v9856_v6  ;;  %v9969_v3 = vcombine.high %v812_v58, %v820_v60  ;;  %v827_v6 = vld [vmem:[%s11708_s16 + $0xea0] sm:$0xff] }
 0x309   : > { %7354 = vmatprep.subr.bf16.mxu0 %v9871_v7  ;;  %7518 = vmatprep.subr.bf16.mxu1 %v9873_v10  ;;  %v835_v7 = vld [vmem:[%s11708_s16 + $0xee0] sm:$0xff]  ;;  %v828_v10 = vld [vmem:[%s11708_s16 + $0xea8] sm:$0xff] }
 0x30a   : > { %v9983_v15 = vcombine.high %v827_v6, %v835_v7  ;;  %v9982_v21 = vcombine.low %v827_v6, %v835_v7  ;;  %v9984_v22 = vcombine.low %v828_v10, %v836_v11  ;;  %v932_v6 = vld [vmem:[%s11708_s16 + $0x11e8] sm:$0xff] }
 0x30c   : > { %7355 = vmatpush1.bf16.msra.mxu0 %v9870_v16  ;;  %7519 = vmatpush1.bf16.msra.mxu1 %v9872_v17  ;;  %v9985_v16 = vcombine.high %v828_v10, %v836_v11  ;;  %v843_v17 = vld [vmem:[%s11708_s16 + $0xf20] sm:$0xff] }
 0x30d   : > { %7356 = vmatprep.subr.bf16.mxu0 %v9887_v18  ;;  %7520 = vmatprep.subr.bf16.mxu1 %v9889_v19  ;;  %v851_v18 = vld [vmem:[%s11708_s16 + $0xf60] sm:$0xff]  ;;  %v844_v19 = vld [vmem:[%s11708_s16 + $0xf28] sm:$0xff] }
 0x30e   : > { %v9999_v23 = vcombine.high %v843_v17, %v851_v18  ;;  %v9998_v29 = vcombine.low %v843_v17, %v851_v18  ;;  %v10000_v30 = vcombine.low %v844_v19, %v852_v20  ;;  %v948_v17 = vld [vmem:[%s11708_s16 + $0x1268] sm:$0xff] }
 0x310   : > { %7357 = vmatpush1.bf16.msra.mxu0 %v9886_v24  ;;  %7521 = vmatpush1.bf16.msra.mxu1 %v9888_v26  ;;  %v10001_v24 = vcombine.high %v844_v19, %v852_v20  ;;  %v859_v26 = vld [vmem:[%s11708_s16 + $0xfa0] sm:$0xff] }
 0x311   : > { %7358 = vmatprep.subr.bf16.mxu0 %v9903_v27  ;;  %7522 = vmatprep.subr.bf16.mxu1 %v9905_v59  ;;  %v867_v27 = vld [vmem:[%s11708_s16 + $0xfe0] sm:$0xff]  ;;  %v860_v59 = vld [vmem:[%s11708_s16 + $0xfa8] sm:$0xff] }
 0x312   : > { %v10015_v31 = vcombine.high %v859_v26, %v867_v27  ;;  %v10014_v39 = vcombine.low %v859_v26, %v867_v27  ;;  %v10016_v41 = vcombine.low %v860_v59, %v868_v28  ;;  %v964_v26 = vld [vmem:[%s11708_s16 + $0x12e8] sm:$0xff] }
 0x314   : > { %7359 = vmatpush1.bf16.msra.mxu0 %v9902_v32  ;;  %7523 = vmatpush1.bf16.msra.mxu1 %v9904_v33  ;;  %v10017_v32 = vcombine.high %v860_v59, %v868_v28  ;;  %v875_v33 = vld [vmem:[%s11708_s16 + $0x1020] sm:$0xff] }
 0x315   : > { %7360 = vmatprep.subr.bf16.mxu0 %v9919_v36  ;;  %7524 = vmatprep.subr.bf16.mxu1 %v9921_v37  ;;  %v883_v36 = vld [vmem:[%s11708_s16 + $0x1060] sm:$0xff]  ;;  %v876_v37 = vld [vmem:[%s11708_s16 + $0x1028] sm:$0xff] }
 0x316   : > { %v10031_v53 = vcombine.high %v875_v33, %v883_v36  ;;  %v10030_v48 = vcombine.low %v875_v33, %v883_v36  ;;  %v10032_v49 = vcombine.low %v876_v37, %v884_v38  ;;  %v980_v33 = vld [vmem:[%s11708_s16 + $0x1368] sm:$0xff] }
 0x318   : > { %7361 = vmatpush1.bf16.msra.mxu0 %v9918_v42  ;;  %7525 = vmatpush1.bf16.msra.mxu1 %v9920_v44  ;;  %v10033_v42 = vcombine.high %v876_v37, %v884_v38  ;;  %v891_v44 = vld [vmem:[%s11708_s16 + $0x10a0] sm:$0xff] }
 0x319   : > { %7362 = vmatprep.subr.bf16.mxu0 %v9935_v45  ;;  %7526 = vmatprep.subr.bf16.mxu1 %v9937_v46  ;;  %v899_v45 = vld [vmem:[%s11708_s16 + $0x10e0] sm:$0xff]  ;;  %v892_v46 = vld [vmem:[%s11708_s16 + $0x10a8] sm:$0xff] }
 0x31a   : > { %v10047_v50 = vcombine.high %v891_v44, %v899_v45  ;;  %v10046_v57 = vcombine.low %v891_v44, %v899_v45  ;;  %v10048_v58 = vcombine.low %v892_v46, %v900_v47  ;;  %v996_v44 = vld [vmem:[%s11708_s16 + $0x13e8] sm:$0xff] }
 0x31c   : > { %7363 = vmatpush1.bf16.msra.mxu0 %v9934_v51  ;;  %7527 = vmatpush1.bf16.msra.mxu1 %v9936_v52  ;;  %v10049_v51 = vcombine.high %v892_v46, %v900_v47  ;;  %v907_v52 = vld [vmem:[%s11708_s16 + $0x1120] sm:$0xff] }
 0x31d   : > { %7364 = vmatprep.subr.bf16.mxu0 %v9951_v54  ;;  %7528 = vmatprep.subr.bf16.mxu1 %v9953_v55  ;;  %v915_v54 = vld [vmem:[%s11708_s16 + $0x1160] sm:$0xff]  ;;  %v908_v55 = vld [vmem:[%s11708_s16 + $0x1128] sm:$0xff] }
 0x31e   : > { %v10063_v60 = vcombine.high %v907_v52, %v915_v54  ;;  %v10062_v7 = vcombine.low %v907_v52, %v915_v54  ;;  %v10064_v10 = vcombine.low %v908_v55, %v916_v56  ;;  %v1012_v52 = vld [vmem:[%s11708_s16 + $0x1468] sm:$0xff] }
 0x320   : > { %7365 = vmatpush1.bf16.msra.mxu0 %v9950_v61  ;;  %7529 = vmatpush1.bf16.msra.mxu1 %v9952_v0  ;;  %v10065_v61 = vcombine.high %v908_v55, %v916_v56  ;;  %v923_v0 = vld [vmem:[%s11708_s16 + $0x11a0] sm:$0xff] }
 0x321   : > { %7366 = vmatprep.subr.bf16.mxu0 %v9967_v1  ;;  %7530 = vmatprep.subr.bf16.mxu1 %v9969_v3  ;;  %v931_v1 = vld [vmem:[%s11708_s16 + $0x11e0] sm:$0xff]  ;;  %v924_v3 = vld [vmem:[%s11708_s16 + $0x11a8] sm:$0xff] }
 0x322   : > { %v10079_v11 = vcombine.high %v923_v0, %v931_v1  ;;  %v10078_v18 = vcombine.low %v923_v0, %v931_v1  ;;  %v10080_v19 = vcombine.low %v924_v3, %v932_v6  ;;  %v1028_v0 = vld [vmem:[%s11708_s16 + $0x14e8] sm:$0xff] }
 0x324   : > { %7367 = vmatpush1.bf16.msra.mxu0 %v9966_v13  ;;  %7531 = vmatpush1.bf16.msra.mxu1 %v9968_v14  ;;  %v10081_v13 = vcombine.high %v924_v3, %v932_v6  ;;  %v939_v14 = vld [vmem:[%s11708_s16 + $0x1220] sm:$0xff] }
 0x325   : > { %7368 = vmatprep.subr.bf16.mxu0 %v9983_v15  ;;  %7532 = vmatprep.subr.bf16.mxu1 %v9985_v16  ;;  %v947_v15 = vld [vmem:[%s11708_s16 + $0x1260] sm:$0xff]  ;;  %v940_v16 = vld [vmem:[%s11708_s16 + $0x1228] sm:$0xff] }
 0x326   : > { %v10095_v20 = vcombine.high %v939_v14, %v947_v15  ;;  %v10094_v27 = vcombine.low %v939_v14, %v947_v15  ;;  %v10096_v59 = vcombine.low %v940_v16, %v948_v17  ;;  %v1044_v14 = vld [vmem:[%s11708_s16 + $0x1568] sm:$0xff] }
 0x328   : > { %7369 = vmatpush1.bf16.msra.mxu0 %v9982_v21  ;;  %7533 = vmatpush1.bf16.msra.mxu1 %v9984_v22  ;;  %v10097_v21 = vcombine.high %v940_v16, %v948_v17  ;;  %v955_v22 = vld [vmem:[%s11708_s16 + $0x12a0] sm:$0xff] }
 0x329   : > { %7370 = vmatprep.subr.bf16.mxu0 %v9999_v23  ;;  %7534 = vmatprep.subr.bf16.mxu1 %v10001_v24  ;;  %v963_v23 = vld [vmem:[%s11708_s16 + $0x12e0] sm:$0xff]  ;;  %v956_v24 = vld [vmem:[%s11708_s16 + $0x12a8] sm:$0xff] }
 0x32a   : > { %v10111_v28 = vcombine.high %v955_v22, %v963_v23  ;;  %v10110_v36 = vcombine.low %v955_v22, %v963_v23  ;;  %v10112_v37 = vcombine.low %v956_v24, %v964_v26  ;;  %v1060_v22 = vld [vmem:[%s11708_s16 + $0x15e8] sm:$0xff] }
 0x32c   : > { %7371 = vmatpush1.bf16.msra.mxu0 %v9998_v29  ;;  %7535 = vmatpush1.bf16.msra.mxu1 %v10000_v30  ;;  %v10113_v29 = vcombine.high %v956_v24, %v964_v26  ;;  %v971_v30 = vld [vmem:[%s11708_s16 + $0x1320] sm:$0xff] }
 0x32d   : > { %7372 = vmatprep.subr.bf16.mxu0 %v10015_v31  ;;  %7536 = vmatprep.subr.bf16.mxu1 %v10017_v32  ;;  %v979_v31 = vld [vmem:[%s11708_s16 + $0x1360] sm:$0xff]  ;;  %v972_v32 = vld [vmem:[%s11708_s16 + $0x1328] sm:$0xff] }
 0x32e   : > { %v10127_v38 = vcombine.high %v971_v30, %v979_v31  ;;  %v10126_v45 = vcombine.low %v971_v30, %v979_v31  ;;  %v10128_v46 = vcombine.low %v972_v32, %v980_v33  ;;  %v1076_v30 = vld [vmem:[%s11708_s16 + $0x1668] sm:$0xff] }
 0x330   : > { %7373 = vmatpush1.bf16.msra.mxu0 %v10014_v39  ;;  %7537 = vmatpush1.bf16.msra.mxu1 %v10016_v41  ;;  %v10129_v39 = vcombine.high %v972_v32, %v980_v33  ;;  %v987_v41 = vld [vmem:[%s11708_s16 + $0x13a0] sm:$0xff] }
 0x331   : > { %7383 = vmatprep.subr.bf16.mxu0 %v10031_v53  ;;  %7547 = vmatprep.subr.bf16.mxu1 %v10033_v42  ;;  %v995_v53 = vld [vmem:[%s11708_s16 + $0x13e0] sm:$0xff]  ;;  %v988_v42 = vld [vmem:[%s11708_s16 + $0x13a8] sm:$0xff] }
 0x332   : > { %v10143_v47 = vcombine.high %v987_v41, %v995_v53  ;;  %v10142_v54 = vcombine.low %v987_v41, %v995_v53  ;;  %v10144_v55 = vcombine.low %v988_v42, %v996_v44  ;;  %v1092_v41 = vld [vmem:[%s11708_s16 + $0x16e8] sm:$0xff] }
 0x333   : > { %7375 = vmatmul.mubr.bf16.vlgmr.msra.gmra.mrb[8].mxu0 %v11896_v40  ;;  %7539 = vmatmul.mubr.bf16.vlgmr.msra.gmra.mrb[8].mxu1 %v11896_v40 }
 0x334   : > { %7384 = vmatpush1.bf16.msra.mxu0 %v10030_v48  ;;  %7548 = vmatpush1.bf16.msra.mxu1 %v10032_v49  ;;  %v10145_v48 = vcombine.high %v988_v42, %v996_v44  ;;  %v1003_v49 = vld [vmem:[%s11708_s16 + $0x1420] sm:$0xff] }
 0x335   : > { %7385 = vmatprep.subr.bf16.mxu0 %v10047_v50  ;;  %7549 = vmatprep.subr.bf16.mxu1 %v10049_v51  ;;  %v1011_v50 = vld [vmem:[%s11708_s16 + $0x1460] sm:$0xff]  ;;  %v1004_v51 = vld [vmem:[%s11708_s16 + $0x1428] sm:$0xff] }
 0x336   : > { %7415 = vmatprep.mubr.bf16.mxu0 %v11825_v34  ;;  %7579 = vmatprep.mubr.bf16.mxu1 %v11825_v34  ;;  %v10159_v56 = vcombine.high %v1003_v49, %v1011_v50  ;;  %v10158_v1 = vcombine.low %v1003_v49, %v1011_v50  ;;  %v10160_v3 = vcombine.low %v1004_v51, %v1012_v52  ;;  %v1108_v49 = vld [vmem:[%s11708_s16 + $0x1768] sm:$0xff] }
 0x338   : > { %7386 = vmatpush1.bf16.msra.mxu0 %v10046_v57  ;;  %7550 = vmatpush1.bf16.msra.mxu1 %v10048_v58  ;;  %v10161_v57 = vcombine.high %v1004_v51, %v1012_v52  ;;  %v1019_v58 = vld [vmem:[%s11708_s16 + $0x14a0] sm:$0xff] }
 0x339   : > { %7387 = vmatprep.subr.bf16.mxu0 %v10063_v60  ;;  %7551 = vmatprep.subr.bf16.mxu1 %v10065_v61  ;;  %v1027_v60 = vld [vmem:[%s11708_s16 + $0x14e0] sm:$0xff]  ;;  %v1020_v61 = vld [vmem:[%s11708_s16 + $0x14a8] sm:$0xff] }
 0x33a   : > { %v10175_v6 = vcombine.high %v1019_v58, %v1027_v60  ;;  %v10174_v15 = vcombine.low %v1019_v58, %v1027_v60  ;;  %v10176_v16 = vcombine.low %v1020_v61, %v1028_v0  ;;  %v1124_v58 = vld [vmem:[%s11708_s16 + $0x17e8] sm:$0xff] }
 0x33c   : > { %7388 = vmatpush1.bf16.msra.mxu0 %v10062_v7  ;;  %7552 = vmatpush1.bf16.msra.mxu1 %v10064_v10  ;;  %v10177_v7 = vcombine.high %v1020_v61, %v1028_v0  ;;  %v1035_v10 = vld [vmem:[%s11708_s16 + $0x1520] sm:$0xff] }
 0x33d   : > { %7389 = vmatprep.subr.bf16.mxu0 %v10079_v11  ;;  %7553 = vmatprep.subr.bf16.mxu1 %v10081_v13  ;;  %v1043_v11 = vld [vmem:[%s11708_s16 + $0x1560] sm:$0xff]  ;;  %v1036_v13 = vld [vmem:[%s11708_s16 + $0x1528] sm:$0xff] }
 0x33e   : > { %v10191_v17 = vcombine.high %v1035_v10, %v1043_v11  ;;  %v10190_v23 = vcombine.low %v1035_v10, %v1043_v11  ;;  %v10192_v24 = vcombine.low %v1036_v13, %v1044_v14  ;;  %v1140_v10 = vld [vmem:[%s11708_s16 + $0x1868] sm:$0xff] }
 0x340   : > { %7390 = vmatpush1.bf16.msra.mxu0 %v10078_v18  ;;  %7554 = vmatpush1.bf16.msra.mxu1 %v10080_v19  ;;  %v10193_v18 = vcombine.high %v1036_v13, %v1044_v14  ;;  %v1051_v19 = vld [vmem:[%s11708_s16 + $0x15a0] sm:$0xff] }
 0x341   : > { %7391 = vmatprep.subr.bf16.mxu0 %v10095_v20  ;;  %7555 = vmatprep.subr.bf16.mxu1 %v10097_v21  ;;  %v1059_v20 = vld [vmem:[%s11708_s16 + $0x15e0] sm:$0xff]  ;;  %v1052_v21 = vld [vmem:[%s11708_s16 + $0x15a8] sm:$0xff] }
 0x342   : > { %v10207_v26 = vcombine.high %v1051_v19, %v1059_v20  ;;  %v10206_v31 = vcombine.low %v1051_v19, %v1059_v20  ;;  %v10208_v32 = vcombine.low %v1052_v21, %v1060_v22  ;;  %v1156_v19 = vld [vmem:[%s11708_s16 + $0x18e8] sm:$0xff] }
 0x344   : > { %7392 = vmatpush1.bf16.msra.mxu0 %v10094_v27  ;;  %7556 = vmatpush1.bf16.msra.mxu1 %v10096_v59  ;;  %v10209_v27 = vcombine.high %v1052_v21, %v1060_v22  ;;  %v1067_v59 = vld [vmem:[%s11708_s16 + $0x1620] sm:$0xff] }
 0x345   : > { %7393 = vmatprep.subr.bf16.mxu0 %v10111_v28  ;;  %7557 = vmatprep.subr.bf16.mxu1 %v10113_v29  ;;  %v1075_v28 = vld [vmem:[%s11708_s16 + $0x1660] sm:$0xff]  ;;  %v1068_v29 = vld [vmem:[%s11708_s16 + $0x1628] sm:$0xff] }
 0x346   : > { %v10223_v33 = vcombine.high %v1067_v59, %v1075_v28  ;;  %v10222_v53 = vcombine.low %v1067_v59, %v1075_v28  ;;  %v10224_v42 = vcombine.low %v1068_v29, %v1076_v30  ;;  %v1172_v59 = vld [vmem:[%s11708_s16 + $0x1968] sm:$0xff] }
 0x348   : > { %7394 = vmatpush1.bf16.msra.mxu0 %v10110_v36  ;;  %7558 = vmatpush1.bf16.msra.mxu1 %v10112_v37  ;;  %v10225_v36 = vcombine.high %v1068_v29, %v1076_v30  ;;  %v1083_v37 = vld [vmem:[%s11708_s16 + $0x16a0] sm:$0xff] }
 0x349   : > { %7395 = vmatprep.subr.bf16.mxu0 %v10127_v38  ;;  %7559 = vmatprep.subr.bf16.mxu1 %v10129_v39  ;;  %v1091_v38 = vld [vmem:[%s11708_s16 + $0x16e0] sm:$0xff]  ;;  %v1084_v39 = vld [vmem:[%s11708_s16 + $0x16a8] sm:$0xff] }
 0x34a   : > { %v10239_v44 = vcombine.high %v1083_v37, %v1091_v38  ;;  %v10238_v50 = vcombine.low %v1083_v37, %v1091_v38  ;;  %v10240_v51 = vcombine.low %v1084_v39, %v1092_v41  ;;  %v1188_v37 = vld [vmem:[%s11708_s16 + $0x19e8] sm:$0xff] }
 0x34c   : > { %7396 = vmatpush1.bf16.msra.mxu0 %v10126_v45  ;;  %7560 = vmatpush1.bf16.msra.mxu1 %v10128_v46  ;;  %v10241_v45 = vcombine.high %v1084_v39, %v1092_v41  ;;  %v1099_v46 = vld [vmem:[%s11708_s16 + $0x1720] sm:$0xff] }
 0x34d   : > { %7397 = vmatprep.subr.bf16.mxu0 %v10143_v47  ;;  %7561 = vmatprep.subr.bf16.mxu1 %v10145_v48  ;;  %v1107_v47 = vld [vmem:[%s11708_s16 + $0x1760] sm:$0xff]  ;;  %v1100_v48 = vld [vmem:[%s11708_s16 + $0x1728] sm:$0xff] }
 0x34e   : > { %v10255_v52 = vcombine.high %v1099_v46, %v1107_v47  ;;  %v10254_v60 = vcombine.low %v1099_v46, %v1107_v47  ;;  %v10256_v61 = vcombine.low %v1100_v48, %v1108_v49  ;;  %v1204_v46 = vld [vmem:[%s11708_s16 + $0x1a68] sm:$0xff] }
 0x350   : > { %7398 = vmatpush1.bf16.msra.mxu0 %v10142_v54  ;;  %7562 = vmatpush1.bf16.msra.mxu1 %v10144_v55  ;;  %v10257_v54 = vcombine.high %v1100_v48, %v1108_v49  ;;  %v1115_v55 = vld [vmem:[%s11708_s16 + $0x17a0] sm:$0xff] }
 0x351   : > { %7399 = vmatprep.subr.bf16.mxu0 %v10159_v56  ;;  %7563 = vmatprep.subr.bf16.mxu1 %v10161_v57  ;;  %v1123_v56 = vld [vmem:[%s11708_s16 + $0x17e0] sm:$0xff]  ;;  %v1116_v57 = vld [vmem:[%s11708_s16 + $0x17a8] sm:$0xff] }
 0x352   : > { %v10271_v0 = vcombine.high %v1115_v55, %v1123_v56  ;;  %v10270_v11 = vcombine.low %v1115_v55, %v1123_v56  ;;  %v10272_v13 = vcombine.low %v1116_v57, %v1124_v58  ;;  %v1220_v55 = vld [vmem:[%s11708_s16 + $0x1ae8] sm:$0xff] }
 0x354   : > { %7400 = vmatpush1.bf16.msra.mxu0 %v10158_v1  ;;  %7564 = vmatpush1.bf16.msra.mxu1 %v10160_v3  ;;  %v10273_v1 = vcombine.high %v1116_v57, %v1124_v58  ;;  %v1131_v3 = vld [vmem:[%s11708_s16 + $0x1820] sm:$0xff] }
 0x355   : > { %7401 = vmatprep.subr.bf16.mxu0 %v10175_v6  ;;  %7565 = vmatprep.subr.bf16.mxu1 %v10177_v7  ;;  %v1139_v6 = vld [vmem:[%s11708_s16 + $0x1860] sm:$0xff]  ;;  %v1132_v7 = vld [vmem:[%s11708_s16 + $0x1828] sm:$0xff] }
 0x356   : > { %v10287_v14 = vcombine.high %v1131_v3, %v1139_v6  ;;  %v10286_v20 = vcombine.low %v1131_v3, %v1139_v6  ;;  %v10288_v21 = vcombine.low %v1132_v7, %v1140_v10  ;;  %v1236_v3 = vld [vmem:[%s11708_s16 + $0x1b68] sm:$0xff] }
 0x358   : > { %7402 = vmatpush1.bf16.msra.mxu0 %v10174_v15  ;;  %7566 = vmatpush1.bf16.msra.mxu1 %v10176_v16  ;;  %v10289_v15 = vcombine.high %v1132_v7, %v1140_v10  ;;  %v1147_v16 = vld [vmem:[%s11708_s16 + $0x18a0] sm:$0xff] }
 0x359   : > { %7403 = vmatprep.subr.bf16.mxu0 %v10191_v17  ;;  %7567 = vmatprep.subr.bf16.mxu1 %v10193_v18  ;;  %v1155_v17 = vld [vmem:[%s11708_s16 + $0x18e0] sm:$0xff]  ;;  %v1148_v18 = vld [vmem:[%s11708_s16 + $0x18a8] sm:$0xff] }
 0x35a   : > { %v10303_v22 = vcombine.high %v1147_v16, %v1155_v17  ;;  %v10302_v28 = vcombine.low %v1147_v16, %v1155_v17  ;;  %v10304_v29 = vcombine.low %v1148_v18, %v1156_v19 }
 0x35c   : > { %7404 = vmatpush1.bf16.msra.mxu0 %v10190_v23  ;;  %7568 = vmatpush1.bf16.msra.mxu1 %v10192_v24  ;;  %v10305_v23 = vcombine.high %v1148_v18, %v1156_v19  ;;  %v1163_v24 = vld [vmem:[%s11708_s16 + $0x1920] sm:$0xff]  ;;  %v1244_v18 = vld [vmem:[%s11708_s16 + $0x1ba8] sm:$0xff] }
 0x35d   : > { %7405 = vmatprep.subr.bf16.mxu0 %v10207_v26  ;;  %7569 = vmatprep.subr.bf16.mxu1 %v10209_v27  ;;  %v1171_v26 = vld [vmem:[%s11708_s16 + $0x1960] sm:$0xff]  ;;  %v1164_v27 = vld [vmem:[%s11708_s16 + $0x1928] sm:$0xff] }
 0x35e   : > { %v10319_v30 = vcombine.high %v1163_v24, %v1171_v26  ;;  %v10318_v38 = vcombine.low %v1163_v24, %v1171_v26  ;;  %v10320_v39 = vcombine.low %v1164_v27, %v1172_v59  ;;  %v1252_v19 = vld [vmem:[%s11708_s16 + $0x1be8] sm:$0xff] }
 0x360   : > { %7406 = vmatpush1.bf16.msra.mxu0 %v10206_v31  ;;  %7570 = vmatpush1.bf16.msra.mxu1 %v10208_v32  ;;  %v10321_v31 = vcombine.high %v1164_v27, %v1172_v59  ;;  %v1179_v32 = vld [vmem:[%s11708_s16 + $0x19a0] sm:$0xff] }
 0x361   : > { %7407 = vmatprep.subr.bf16.mxu0 %v10223_v33  ;;  %7571 = vmatprep.subr.bf16.mxu1 %v10225_v36  ;;  %v1187_v33 = vld [vmem:[%s11708_s16 + $0x19e0] sm:$0xff]  ;;  %v1180_v36 = vld [vmem:[%s11708_s16 + $0x19a8] sm:$0xff] }
 0x362   : > { %v10335_v41 = vcombine.high %v1179_v32, %v1187_v33  ;;  %v10334_v47 = vcombine.low %v1179_v32, %v1187_v33  ;;  %v10336_v48 = vcombine.low %v1180_v36, %v1188_v37  ;;  %v1268_v32 = vld [vmem:[%s11708_s16 + $0x1c68] sm:$0xff] }
 0x364   : > { %7408 = vmatpush1.bf16.msra.mxu0 %v10222_v53  ;;  %7572 = vmatpush1.bf16.msra.mxu1 %v10224_v42  ;;  %v10337_v53 = vcombine.high %v1180_v36, %v1188_v37  ;;  %v1195_v42 = vld [vmem:[%s11708_s16 + $0x1a20] sm:$0xff]  ;;  %v10400_v36 = vcombine.low %v1244_v18, %v1252_v19 }
 0x365   : > { %7409 = vmatprep.subr.bf16.mxu0 %v10239_v44  ;;  %7573 = vmatprep.subr.bf16.mxu1 %v10241_v45  ;;  %v1203_v44 = vld [vmem:[%s11708_s16 + $0x1a60] sm:$0xff]  ;;  %v1196_v45 = vld [vmem:[%s11708_s16 + $0x1a28] sm:$0xff] }
 0x366   : > { %v10351_v49 = vcombine.high %v1195_v42, %v1203_v44  ;;  %v10350_v56 = vcombine.low %v1195_v42, %v1203_v44  ;;  %v10352_v57 = vcombine.low %v1196_v45, %v1204_v46  ;;  %v1284_v42 = vld [vmem:[%s11708_s16 + $0x1ce8] sm:$0xff] }
 0x368   : > { %7410 = vmatpush1.bf16.msra.mxu0 %v10238_v50  ;;  %7574 = vmatpush1.bf16.msra.mxu1 %v10240_v51  ;;  %v10353_v50 = vcombine.high %v1196_v45, %v1204_v46  ;;  %v1211_v51 = vld [vmem:[%s11708_s16 + $0x1aa0] sm:$0xff] }
 0x369   : > { %7411 = vmatprep.subr.bf16.mxu0 %v10255_v52  ;;  %7575 = vmatprep.subr.bf16.mxu1 %v10257_v54  ;;  %v1219_v52 = vld [vmem:[%s11708_s16 + $0x1ae0] sm:$0xff]  ;;  %v1212_v54 = vld [vmem:[%s11708_s16 + $0x1aa8] sm:$0xff] }
 0x36a   : > { %v10367_v58 = vcombine.high %v1211_v51, %v1219_v52  ;;  %v10366_v6 = vcombine.low %v1211_v51, %v1219_v52  ;;  %v10368_v7 = vcombine.low %v1212_v54, %v1220_v55  ;;  %v1300_v51 = vld [vmem:[%s11708_s16 + $0x1d68] sm:$0xff] }
 0x36c   : > { %7412 = vmatpush1.bf16.msra.mxu0 %v10254_v60  ;;  %7576 = vmatpush1.bf16.msra.mxu1 %v10256_v61  ;;  %v10369_v60 = vcombine.high %v1212_v54, %v1220_v55  ;;  %v1227_v61 = vld [vmem:[%s11708_s16 + $0x1b20] sm:$0xff] }
 0x36d   : > { %7413 = vmatprep.subr.bf16.mxu0 %v10271_v0  ;;  %7577 = vmatprep.subr.bf16.mxu1 %v10273_v1  ;;  %v1235_v0 = vld [vmem:[%s11708_s16 + $0x1b60] sm:$0xff]  ;;  %v1228_v1 = vld [vmem:[%s11708_s16 + $0x1b28] sm:$0xff] }
 0x36e   : > { %v10383_v10 = vcombine.high %v1227_v61, %v1235_v0  ;;  %v10384_v26 = vcombine.low %v1228_v1, %v1236_v3 }
 0x370   : > { %7414 = vmatpush1.bf16.msra.mxu0 %v10270_v11  ;;  %7578 = vmatpush1.bf16.msra.mxu1 %v10272_v13  ;;  %v10385_v13 = vcombine.high %v1228_v1, %v1236_v3 }
 0x371   : > { %7424 = vmatprep.subr.bf16.mxu0 %v10287_v14  ;;  %7588 = vmatprep.subr.bf16.mxu1 %v10289_v15  ;;  %v1243_v14 = vld [vmem:[%s11708_s16 + $0x1ba0] sm:$0xff] }
 0x372   : > { %v1251_v15 = vld [vmem:[%s11708_s16 + $0x1be0] sm:$0xff] }
 0x373   : > { %7416 = vmatmul.mubr.bf16.vlgmr.msra.gmra.mrb[8].mxu0 %v11828_v35  ;;  %7580 = vmatmul.mubr.bf16.vlgmr.msra.gmra.mrb[8].mxu1 %v11828_v35  ;;  %v10399_v27 = vcombine.high %v1243_v14, %v1251_v15  ;;  %v10398_v33 = vcombine.low %v1243_v14, %v1251_v15  ;;  %v1332_v14 = vld [vmem:[%s11708_s16 + $0x1e68] sm:$0xff] }
 0x374   : > { %7425 = vmatpush1.bf16.msra.mxu0 %v10286_v20  ;;  %7589 = vmatpush1.bf16.msra.mxu1 %v10288_v21 }
 0x375   : > { %7426 = vmatprep.subr.bf16.mxu0 %v10303_v22  ;;  %7590 = vmatprep.subr.bf16.mxu1 %v10305_v23  ;;  %v10382_v22 = vcombine.low %v1227_v61, %v1235_v0  ;;  %v1316_v61 = vld [vmem:[%s11708_s16 + $0x1de8] sm:$0xff] }
 0x376   : > { %7456 = vmatprep.mubr.bf16.mxu0 %v11972_v2  ;;  %7620 = vmatprep.mubr.bf16.mxu1 %v11972_v2 }
 0x378   : > { %7427 = vmatpush1.bf16.msra.mxu0 %v10302_v28  ;;  %7591 = vmatpush1.bf16.msra.mxu1 %v10304_v29  ;;  %v10401_v28 = vcombine.high %v1244_v18, %v1252_v19  ;;  %v1259_v29 = vld [vmem:[%s11708_s16 + $0x1c20] sm:$0xff] }
 0x379   : > { %7428 = vmatprep.subr.bf16.mxu0 %v10319_v30  ;;  %7592 = vmatprep.subr.bf16.mxu1 %v10321_v31  ;;  %v1267_v30 = vld [vmem:[%s11708_s16 + $0x1c60] sm:$0xff]  ;;  %v1260_v31 = vld [vmem:[%s11708_s16 + $0x1c28] sm:$0xff] }
 0x37a   : > { %v10415_v37 = vcombine.high %v1259_v29, %v1267_v30  ;;  %v10414_v44 = vcombine.low %v1259_v29, %v1267_v30  ;;  %v10416_v45 = vcombine.low %v1260_v31, %v1268_v32  ;;  %v1355_v30 = vld [vmem:[%s11708_s16 + $0x1f20] sm:$0xff] }
 0x37c   : > { %7429 = vmatpush1.bf16.msra.mxu0 %v10318_v38  ;;  %7593 = vmatpush1.bf16.msra.mxu1 %v10320_v39  ;;  %v10417_v38 = vcombine.high %v1260_v31, %v1268_v32  ;;  %v1275_v39 = vld [vmem:[%s11708_s16 + $0x1ca0] sm:$0xff]  ;;  %v1356_v32 = vld [vmem:[%s11708_s16 + $0x1f28] sm:$0xff] }
 0x37d   : > { %7430 = vmatprep.subr.bf16.mxu0 %v10335_v41  ;;  %7594 = vmatprep.subr.bf16.mxu1 %v10337_v53  ;;  %v1283_v41 = vld [vmem:[%s11708_s16 + $0x1ce0] sm:$0xff]  ;;  %v1276_v53 = vld [vmem:[%s11708_s16 + $0x1ca8] sm:$0xff] }
 0x37e   : > { %v10431_v46 = vcombine.high %v1275_v39, %v1283_v41  ;;  %v10430_v52 = vcombine.low %v1275_v39, %v1283_v41  ;;  %v10432_v54 = vcombine.low %v1276_v53, %v1284_v42  ;;  %v1363_v31 = vld [vmem:[%s11708_s16 + $0x1f60] sm:$0xff] }
 0x37f   : > { %v1371_v41 = vld [vmem:[%s11708_s16 + $0x1fa0] sm:$0xff] }
 0x380   : > { %7431 = vmatpush1.bf16.msra.mxu0 %v10334_v47  ;;  %7595 = vmatpush1.bf16.msra.mxu1 %v10336_v48  ;;  %v10433_v47 = vcombine.high %v1276_v53, %v1284_v42  ;;  %v1291_v48 = vld [vmem:[%s11708_s16 + $0x1d20] sm:$0xff]  ;;  %v1372_v42 = vld [vmem:[%s11708_s16 + $0x1fa8] sm:$0xff] }
 0x381   : > { %7432 = vmatprep.subr.bf16.mxu0 %v10351_v49  ;;  %7596 = vmatprep.subr.bf16.mxu1 %v10353_v50  ;;  %v1299_v49 = vld [vmem:[%s11708_s16 + $0x1d60] sm:$0xff]  ;;  %v1292_v50 = vld [vmem:[%s11708_s16 + $0x1d28] sm:$0xff] }
 0x382   : > { %v10447_v55 = vcombine.high %v1291_v48, %v1299_v49  ;;  %v10446_v0 = vcombine.low %v1291_v48, %v1299_v49  ;;  %v10448_v1 = vcombine.low %v1292_v50, %v1300_v51  ;;  %v1379_v53 = vld [vmem:[%s11708_s16 + $0x1fe0] sm:$0xff]  ;;  %v365_v49 = vld [vmem:[%s11708_s16 + $0x30] sm:$0xff] }
 0x384   : > { %7433 = vmatpush1.bf16.msra.mxu0 %v10350_v56  ;;  %7597 = vmatpush1.bf16.msra.mxu1 %v10352_v57  ;;  %v10449_v56 = vcombine.high %v1292_v50, %v1300_v51  ;;  %v1307_v57 = vld [vmem:[%s11708_s16 + $0x1da0] sm:$0xff]  ;;  %v373_v50 = vld [vmem:[%s11708_s16 + $0x70] sm:$0xff]  ;;  %v366_v51 = vld [vmem:[%s11708_s16 + $0x38] sm:$0xff] }
 0x385   : > { %7434 = vmatprep.subr.bf16.mxu0 %v10367_v58  ;;  %7598 = vmatprep.subr.bf16.mxu1 %v10369_v60  ;;  %v1315_v58 = vld [vmem:[%s11708_s16 + $0x1de0] sm:$0xff]  ;;  %v1308_v60 = vld [vmem:[%s11708_s16 + $0x1da8] sm:$0xff] }
 0x386   : > { %v12552_v11 = vpop.f32.mrb[4].mxu0  ;;  %v12556_v16 = vpop.f32.mrb[4].mxu1  ;;  %v10463_v3 = vcombine.high %v1307_v57, %v1315_v58  ;;  %v10462_v15 = vcombine.low %v1307_v57, %v1315_v58  ;;  %v10464_v18 = vcombine.low %v1308_v60, %v1316_v61  ;;  %v381_v58 = vld [vmem:[%s11708_s16 + $0xb0] sm:$0xff] }
 0x387   : > { %v12558_v17 = vpop.f32.mrb[5].mxu0  ;;  %v12562_v20 = vpop.f32.mrb[5].mxu1 }
 0x388   : > { %v7134_v21 = vpop.f32.mrb[6].mxu0  ;;  %7435 = vmatpush1.bf16.msra.mxu0 %v10366_v6  ;;  %v7298_v23 = vpop.f32.mrb[6].mxu1  ;;  %7599 = vmatpush1.bf16.msra.mxu1 %v10368_v7  ;;  %v10465_v6 = vcombine.high %v1308_v60, %v1316_v61  ;;  %v1323_v7 = vld [vmem:[%s11708_s16 + $0x1e20] sm:$0xff]  ;;  %v389_v60 = vld [vmem:[%s11708_s16 + $0xf0] sm:$0xff]  ;;  %v382_v61 = vld [vmem:[%s11708_s16 + $0xb8] sm:$0xff] }
 0x389   : > { %v7135_v24 = vpop.f32.mrb[7].mxu0  ;;  %7436 = vmatprep.subr.bf16.mxu0 %v10383_v10  ;;  %v7299_v59 = vpop.f32.mrb[7].mxu1  ;;  %7600 = vmatprep.subr.bf16.mxu1 %v10385_v13  ;;  %v1331_v10 = vld [vmem:[%s11708_s16 + $0x1e60] sm:$0xff]  ;;  %v1324_v13 = vld [vmem:[%s11708_s16 + $0x1e28] sm:$0xff] }
 0x38a   : > { %v10479_v19 = vcombine.high %v1323_v7, %v1331_v10  ;;  %v10481_v21 = vcombine.high %v1324_v13, %v1332_v14  ;;  %v1347_v23 = vld [vmem:[%s11708_s16 + $0x1ee0] sm:$0xff]  ;;  %v1340_v24 = vld [vmem:[%s11708_s16 + $0x1ea8] sm:$0xff]  ;;  %v10480_v59 = vcombine.low %v1324_v13, %v1332_v14  ;;  %v405_v13 = vld [vmem:[%s11708_s16 + $0x170] sm:$0xff] }
 0x38b   : > { %v398_v14 = vld [vmem:[%s11708_s16 + $0x138] sm:$0xff] }
 0x38c   : > { %7437 = vmatpush1.bf16.msra.mxu0 %v10382_v22  ;;  %7601 = vmatpush1.bf16.msra.mxu1 %v10384_v26  ;;  %v1339_v22 = vld [vmem:[%s11708_s16 + $0x1ea0] sm:$0xff]  ;;  %v1348_v26 = vld [vmem:[%s11708_s16 + $0x1ee8] sm:$0xff] }
 0x38d   : > { %7438 = vmatprep.subr.bf16.mxu0 %v10399_v27  ;;  %7602 = vmatprep.subr.bf16.mxu1 %v10401_v28  ;;  %v10478_v27 = vcombine.low %v1323_v7, %v1331_v10  ;;  %v10495_v28 = vcombine.high %v1339_v22, %v1347_v23  ;;  %v10497_v29 = vcombine.high %v1340_v24, %v1348_v26  ;;  %v397_v10 = vld [vmem:[%s11708_s16 + $0x130] sm:$0xff] }
 0x390   : > { %7439 = vmatpush1.bf16.msra.mxu0 %v10398_v33  ;;  %7603 = vmatpush1.bf16.msra.mxu1 %v10400_v36  ;;  %v1364_v33 = vld [vmem:[%s11708_s16 + $0x1f68] sm:$0xff]  ;;  %v10494_v36 = vcombine.low %v1339_v22, %v1347_v23  ;;  %v413_v23 = vld [vmem:[%s11708_s16 + $0x1b0] sm:$0xff] }
 0x391   : > { %7440 = vmatprep.subr.bf16.mxu0 %v10415_v37  ;;  %7604 = vmatprep.subr.bf16.mxu1 %v10417_v38  ;;  %v10496_v37 = vcombine.low %v1340_v24, %v1348_v26  ;;  %v10511_v38 = vcombine.high %v1355_v30, %v1363_v31  ;;  %v10513_v39 = vcombine.high %v1356_v32, %v1364_v33  ;;  %v421_v24 = vld [vmem:[%s11708_s16 + $0x1f0] sm:$0xff]  ;;  %v414_v26 = vld [vmem:[%s11708_s16 + $0x1b8] sm:$0xff] }
 0x394   : > { %7441 = vmatpush1.bf16.msra.mxu0 %v10414_v44  ;;  %7605 = vmatpush1.bf16.msra.mxu1 %v10416_v45  ;;  %v1380_v44 = vld [vmem:[%s11708_s16 + $0x1fe8] sm:$0xff]  ;;  %v10510_v45 = vcombine.low %v1355_v30, %v1363_v31  ;;  %v429_v31 = vld [vmem:[%s11708_s16 + $0x230] sm:$0xff] }
 0x395   : > { %7442 = vmatprep.subr.bf16.mxu0 %v10431_v46  ;;  %7606 = vmatprep.subr.bf16.mxu1 %v10433_v47  ;;  %v10512_v46 = vcombine.low %v1356_v32, %v1364_v33  ;;  %v10527_v47 = vcombine.high %v1371_v41, %v1379_v53  ;;  %v10529_v48 = vcombine.high %v1372_v42, %v1380_v44  ;;  %v437_v32 = vld [vmem:[%s11708_s16 + $0x270] sm:$0xff]  ;;  %v430_v33 = vld [vmem:[%s11708_s16 + $0x238] sm:$0xff] }
 0x398   : > { %7443 = vmatpush1.bf16.msra.mxu0 %v10430_v52  ;;  %7607 = vmatpush1.bf16.msra.mxu1 %v10432_v54  ;;  %v374_v52 = vld [vmem:[%s11708_s16 + $0x78] sm:$0xff]  ;;  %v10526_v54 = vcombine.low %v1371_v41, %v1379_v53  ;;  %v445_v41 = vld [vmem:[%s11708_s16 + $0x2b0] sm:$0xff] }
 0x399   : > { %7444 = vmatprep.subr.bf16.mxu0 %v10447_v55  ;;  %7608 = vmatprep.subr.bf16.mxu1 %v10449_v56  ;;  %v10528_v55 = vcombine.low %v1372_v42, %v1380_v44  ;;  %v9523_v56 = vcombine.high %v365_v49, %v373_v50  ;;  %v9525_v57 = vcombine.high %v366_v51, %v374_v52  ;;  %v453_v53 = vld [vmem:[%s11708_s16 + $0x2f0] sm:$0xff]  ;;  %v446_v42 = vld [vmem:[%s11708_s16 + $0x2b8] sm:$0xff] }
 0x39a   : > { %v454_v44 = vld [vmem:[%s11708_s16 + $0x2f8] sm:$0xff] }
 0x39c   : > { %7445 = vmatpush1.bf16.msra.mxu0 %v10446_v0  ;;  %7609 = vmatpush1.bf16.msra.mxu1 %v10448_v1  ;;  %v390_v0 = vld [vmem:[%s11708_s16 + $0xf8] sm:$0xff]  ;;  %v9522_v1 = vcombine.low %v365_v49, %v373_v50  ;;  %v461_v49 = vld [vmem:[%s11708_s16 + $0x330] sm:$0xff] }
 0x39d   : > { %7446 = vmatprep.subr.bf16.mxu0 %v10463_v3  ;;  %7610 = vmatprep.subr.bf16.mxu1 %v10465_v6  ;;  %v9524_v3 = vcombine.low %v366_v51, %v374_v52  ;;  %v9539_v6 = vcombine.high %v381_v58, %v389_v60  ;;  %v9541_v7 = vcombine.high %v382_v61, %v390_v0  ;;  %v469_v50 = vld [vmem:[%s11708_s16 + $0x370] sm:$0xff]  ;;  %v462_v51 = vld [vmem:[%s11708_s16 + $0x338] sm:$0xff] }
 0x39e   : > { %v470_v52 = vld [vmem:[%s11708_s16 + $0x378] sm:$0xff] }
 0x3a0   : > { %7447 = vmatpush1.bf16.msra.mxu0 %v10462_v15  ;;  %7611 = vmatpush1.bf16.msra.mxu1 %v10464_v18  ;;  %v406_v15 = vld [vmem:[%s11708_s16 + $0x178] sm:$0xff]  ;;  %v9538_v18 = vcombine.low %v381_v58, %v389_v60  ;;  %v477_v58 = vld [vmem:[%s11708_s16 + $0x3b0] sm:$0xff] }
 0x3a1   : > { %7448 = vmatprep.subr.bf16.mxu0 %v10479_v19  ;;  %7612 = vmatprep.subr.bf16.mxu1 %v10481_v21  ;;  %v9540_v19 = vcombine.low %v382_v61, %v390_v0  ;;  %v9555_v21 = vcombine.high %v397_v10, %v405_v13  ;;  %v9557_v22 = vcombine.high %v398_v14, %v406_v15  ;;  %v485_v60 = vld [vmem:[%s11708_s16 + $0x3f0] sm:$0xff]  ;;  %v478_v61 = vld [vmem:[%s11708_s16 + $0x3b8] sm:$0xff] }
 0x3a2   : > { %v486_v0 = vld [vmem:[%s11708_s16 + $0x3f8] sm:$0xff] }
 0x3a4   : > { %7449 = vmatpush1.bf16.msra.mxu0 %v10478_v27  ;;  %7613 = vmatpush1.bf16.msra.mxu1 %v10480_v59  ;;  %v422_v27 = vld [vmem:[%s11708_s16 + $0x1f8] sm:$0xff]  ;;  %v9554_v59 = vcombine.low %v397_v10, %v405_v13  ;;  %v493_v10 = vld [vmem:[%s11708_s16 + $0x430] sm:$0xff] }
 0x3a5   : > { %7450 = vmatprep.subr.bf16.mxu0 %v10495_v28  ;;  %7614 = vmatprep.subr.bf16.mxu1 %v10497_v29  ;;  %v9556_v28 = vcombine.low %v398_v14, %v406_v15  ;;  %v9571_v29 = vcombine.high %v413_v23, %v421_v24  ;;  %v9573_v30 = vcombine.high %v414_v26, %v422_v27  ;;  %v501_v13 = vld [vmem:[%s11708_s16 + $0x470] sm:$0xff]  ;;  %v494_v14 = vld [vmem:[%s11708_s16 + $0x438] sm:$0xff] }
 0x3a6   : > { %v502_v15 = vld [vmem:[%s11708_s16 + $0x478] sm:$0xff] }
 0x3a8   : > { %7451 = vmatpush1.bf16.msra.mxu0 %v10494_v36  ;;  %7615 = vmatpush1.bf16.msra.mxu1 %v10496_v37  ;;  %v438_v36 = vld [vmem:[%s11708_s16 + $0x278] sm:$0xff]  ;;  %v9570_v37 = vcombine.low %v413_v23, %v421_v24  ;;  %v509_v23 = vld [vmem:[%s11708_s16 + $0x4b0] sm:$0xff] }
 0x3a9   : > { %7452 = vmatprep.subr.bf16.mxu0 %v10511_v38  ;;  %7616 = vmatprep.subr.bf16.mxu1 %v10513_v39  ;;  %v9587_v38 = vcombine.high %v429_v31, %v437_v32  ;;  %v9589_v39 = vcombine.high %v430_v33, %v438_v36  ;;  %v517_v24 = vld [vmem:[%s11708_s16 + $0x4f0] sm:$0xff] }
 0x3ac   : > { %7453 = vmatpush1.bf16.msra.mxu0 %v10510_v45  ;;  %7617 = vmatpush1.bf16.msra.mxu1 %v10512_v46  ;;  %v9586_v45 = vcombine.low %v429_v31, %v437_v32  ;;  %v9588_v46 = vcombine.low %v430_v33, %v438_v36  ;;  %v525_v31 = vld [vmem:[%s11708_s16 + $0x530] sm:$0xff]  ;;  %v526_v33 = vld [vmem:[%s11708_s16 + $0x538] sm:$0xff] }
 0x3ad   : > { %7454 = vmatprep.subr.bf16.mxu0 %v10527_v47  ;;  %7618 = vmatprep.subr.bf16.mxu1 %v10529_v48  ;;  %v9603_v47 = vcombine.high %v445_v41, %v453_v53  ;;  %v9605_v48 = vcombine.high %v446_v42, %v454_v44  ;;  %v533_v32 = vld [vmem:[%s11708_s16 + $0x570] sm:$0xff]  ;;  %v534_v36 = vld [vmem:[%s11708_s16 + $0x578] sm:$0xff] }
 0x3b0   : > { %7455 = vmatpush1.bf16.msra.mxu0 %v10526_v54  ;;  %7619 = vmatpush1.bf16.msra.mxu1 %v10528_v55  ;;  %v9602_v54 = vcombine.low %v445_v41, %v453_v53  ;;  %v9604_v55 = vcombine.low %v446_v42, %v454_v44  ;;  %v541_v41 = vld [vmem:[%s11708_s16 + $0x5b0] sm:$0xff]  ;;  %v542_v42 = vld [vmem:[%s11708_s16 + $0x5b8] sm:$0xff] }
 0x3b1   : > { %7629 = vmatprep.subr.bf16.mxu0 %v9523_v56  ;;  %7793 = vmatprep.subr.bf16.mxu1 %v9525_v57  ;;  %v9619_v56 = vcombine.high %v461_v49, %v469_v50  ;;  %v9621_v57 = vcombine.high %v462_v51, %v470_v52  ;;  %v549_v53 = vld [vmem:[%s11708_s16 + $0x5f0] sm:$0xff]  ;;  %v550_v44 = vld [vmem:[%s11708_s16 + $0x5f8] sm:$0xff] }
 0x3b3   : > { %7457 = vmatmul.mubr.bf16.vlgmr.msra.gmra.mrb[8].mxu0 %v12040_v12  ;;  %7621 = vmatmul.mubr.bf16.vlgmr.msra.gmra.mrb[8].mxu1 %v12040_v12 }
 0x3b4   : > { %7630 = vmatpush1.bf16.msra.mxu0 %v9522_v1  ;;  %7794 = vmatpush1.bf16.msra.mxu1 %v9524_v3  ;;  %v9618_v1 = vcombine.low %v461_v49, %v469_v50  ;;  %v9620_v3 = vcombine.low %v462_v51, %v470_v52  ;;  %v557_v49 = vld [vmem:[%s11708_s16 + $0x630] sm:$0xff]  ;;  %v558_v51 = vld [vmem:[%s11708_s16 + $0x638] sm:$0xff] }
 0x3b5   : > { %7631 = vmatprep.subr.bf16.mxu0 %v9539_v6  ;;  %7795 = vmatprep.subr.bf16.mxu1 %v9541_v7  ;;  %v9635_v6 = vcombine.high %v477_v58, %v485_v60  ;;  %v9637_v7 = vcombine.high %v478_v61, %v486_v0  ;;  %v565_v50 = vld [vmem:[%s11708_s16 + $0x670] sm:$0xff]  ;;  %v566_v52 = vld [vmem:[%s11708_s16 + $0x678] sm:$0xff] }
 0x3b6   : > { %7661 = vmatprep.mubr.bf16.mxu0 %v11769_v9  ;;  %7825 = vmatprep.mubr.bf16.mxu1 %v11769_v9  ;;  %v9572_v9 = vcombine.low %v414_v26, %v422_v27  ;;  %v510_v26 = vld [vmem:[%s11708_s16 + $0x4b8] sm:$0xff] }
 0x3b7   : > { %v518_v27 = vld [vmem:[%s11708_s16 + $0x4f8] sm:$0xff] }
 0x3b8   : > { %7632 = vmatpush1.bf16.msra.mxu0 %v9538_v18  ;;  %7796 = vmatpush1.bf16.msra.mxu1 %v9540_v19  ;;  %v9634_v18 = vcombine.low %v477_v58, %v485_v60  ;;  %v9636_v19 = vcombine.low %v478_v61, %v486_v0  ;;  %v573_v58 = vld [vmem:[%s11708_s16 + $0x6b0] sm:$0xff]  ;;  %v574_v61 = vld [vmem:[%s11708_s16 + $0x6b8] sm:$0xff] }
 0x3b9   : > { %7633 = vmatprep.subr.bf16.mxu0 %v9555_v21  ;;  %7797 = vmatprep.subr.bf16.mxu1 %v9557_v22  ;;  %v9651_v21 = vcombine.high %v493_v10, %v501_v13  ;;  %v9653_v22 = vcombine.high %v494_v14, %v502_v15  ;;  %v581_v60 = vld [vmem:[%s11708_s16 + $0x6f0] sm:$0xff]  ;;  %v582_v0 = vld [vmem:[%s11708_s16 + $0x6f8] sm:$0xff] }
 0x3bc   : > { %7634 = vmatpush1.bf16.msra.mxu0 %v9554_v59  ;;  %7798 = vmatpush1.bf16.msra.mxu1 %v9556_v28  ;;  %v9650_v59 = vcombine.low %v493_v10, %v501_v13  ;;  %v9652_v28 = vcombine.low %v494_v14, %v502_v15  ;;  %v589_v10 = vld [vmem:[%s11708_s16 + $0x730] sm:$0xff]  ;;  %v590_v14 = vld [vmem:[%s11708_s16 + $0x738] sm:$0xff] }
 0x3bd   : > { %7635 = vmatprep.subr.bf16.mxu0 %v9571_v29  ;;  %7799 = vmatprep.subr.bf16.mxu1 %v9573_v30  ;;  %v9667_v29 = vcombine.high %v509_v23, %v517_v24  ;;  %v9669_v30 = vcombine.high %v510_v26, %v518_v27  ;;  %v597_v13 = vld [vmem:[%s11708_s16 + $0x770] sm:$0xff]  ;;  %v598_v15 = vld [vmem:[%s11708_s16 + $0x778] sm:$0xff] }
 0x3c0   : > { %7636 = vmatpush1.bf16.msra.mxu0 %v9570_v37  ;;  %7800 = vmatpush1.bf16.msra.mxu1 %v9572_v9  ;;  %v9666_v37 = vcombine.low %v509_v23, %v517_v24  ;;  %v9668_v9 = vcombine.low %v510_v26, %v518_v27  ;;  %v605_v23 = vld [vmem:[%s11708_s16 + $0x7b0] sm:$0xff]  ;;  %v606_v26 = vld [vmem:[%s11708_s16 + $0x7b8] sm:$0xff] }
 0x3c1   : > { %7637 = vmatprep.subr.bf16.mxu0 %v9587_v38  ;;  %7801 = vmatprep.subr.bf16.mxu1 %v9589_v39  ;;  %v9683_v38 = vcombine.high %v525_v31, %v533_v32  ;;  %v9685_v39 = vcombine.high %v526_v33, %v534_v36  ;;  %v613_v24 = vld [vmem:[%s11708_s16 + $0x7f0] sm:$0xff]  ;;  %v614_v27 = vld [vmem:[%s11708_s16 + $0x7f8] sm:$0xff] }
 0x3c4   : > { %7638 = vmatpush1.bf16.msra.mxu0 %v9586_v45  ;;  %7802 = vmatpush1.bf16.msra.mxu1 %v9588_v46  ;;  %v9682_v45 = vcombine.low %v525_v31, %v533_v32  ;;  %v9684_v46 = vcombine.low %v526_v33, %v534_v36  ;;  %v621_v31 = vld [vmem:[%s11708_s16 + $0x830] sm:$0xff]  ;;  %v622_v33 = vld [vmem:[%s11708_s16 + $0x838] sm:$0xff] }
 0x3c5   : > { %7639 = vmatprep.subr.bf16.mxu0 %v9603_v47  ;;  %7803 = vmatprep.subr.bf16.mxu1 %v9605_v48  ;;  %v9699_v47 = vcombine.high %v541_v41, %v549_v53  ;;  %v9701_v48 = vcombine.high %v542_v42, %v550_v44  ;;  %v629_v32 = vld [vmem:[%s11708_s16 + $0x870] sm:$0xff]  ;;  %v630_v36 = vld [vmem:[%s11708_s16 + $0x878] sm:$0xff] }
 0x3c8   : > { %7640 = vmatpush1.bf16.msra.mxu0 %v9602_v54  ;;  %7804 = vmatpush1.bf16.msra.mxu1 %v9604_v55  ;;  %v9698_v54 = vcombine.low %v541_v41, %v549_v53  ;;  %v9700_v55 = vcombine.low %v542_v42, %v550_v44  ;;  %v637_v41 = vld [vmem:[%s11708_s16 + $0x8b0] sm:$0xff]  ;;  %v638_v42 = vld [vmem:[%s11708_s16 + $0x8b8] sm:$0xff] }
 0x3c9   : > { %7641 = vmatprep.subr.bf16.mxu0 %v9619_v56  ;;  %7805 = vmatprep.subr.bf16.mxu1 %v9621_v57  ;;  %v9715_v56 = vcombine.high %v557_v49, %v565_v50  ;;  %v9717_v57 = vcombine.high %v558_v51, %v566_v52  ;;  %v645_v53 = vld [vmem:[%s11708_s16 + $0x8f0] sm:$0xff]  ;;  %v646_v44 = vld [vmem:[%s11708_s16 + $0x8f8] sm:$0xff] }
 0x3cc   : > { %7642 = vmatpush1.bf16.msra.mxu0 %v9618_v1  ;;  %7806 = vmatpush1.bf16.msra.mxu1 %v9620_v3  ;;  %v9714_v1 = vcombine.low %v557_v49, %v565_v50  ;;  %v9716_v3 = vcombine.low %v558_v51, %v566_v52  ;;  %v653_v49 = vld [vmem:[%s11708_s16 + $0x930] sm:$0xff]  ;;  %v654_v51 = vld [vmem:[%s11708_s16 + $0x938] sm:$0xff] }
 0x3cd   : > { %7643 = vmatprep.subr.bf16.mxu0 %v9635_v6  ;;  %7807 = vmatprep.subr.bf16.mxu1 %v9637_v7  ;;  %v9731_v6 = vcombine.high %v573_v58, %v581_v60  ;;  %v9733_v7 = vcombine.high %v574_v61, %v582_v0  ;;  %v661_v50 = vld [vmem:[%s11708_s16 + $0x970] sm:$0xff]  ;;  %v662_v52 = vld [vmem:[%s11708_s16 + $0x978] sm:$0xff] }
 0x3d0   : > { %7644 = vmatpush1.bf16.msra.mxu0 %v9634_v18  ;;  %7808 = vmatpush1.bf16.msra.mxu1 %v9636_v19  ;;  %v9730_v18 = vcombine.low %v573_v58, %v581_v60  ;;  %v9732_v19 = vcombine.low %v574_v61, %v582_v0  ;;  %v669_v58 = vld [vmem:[%s11708_s16 + $0x9b0] sm:$0xff]  ;;  %v670_v61 = vld [vmem:[%s11708_s16 + $0x9b8] sm:$0xff] }
 0x3d1   : > { %7645 = vmatprep.subr.bf16.mxu0 %v9651_v21  ;;  %7809 = vmatprep.subr.bf16.mxu1 %v9653_v22  ;;  %v9747_v21 = vcombine.high %v589_v10, %v597_v13  ;;  %v9749_v22 = vcombine.high %v590_v14, %v598_v15  ;;  %v677_v60 = vld [vmem:[%s11708_s16 + $0x9f0] sm:$0xff]  ;;  %v678_v0 = vld [vmem:[%s11708_s16 + $0x9f8] sm:$0xff] }
 0x3d4   : > { %7646 = vmatpush1.bf16.msra.mxu0 %v9650_v59  ;;  %7810 = vmatpush1.bf16.msra.mxu1 %v9652_v28  ;;  %v9746_v59 = vcombine.low %v589_v10, %v597_v13  ;;  %v9748_v28 = vcombine.low %v590_v14, %v598_v15  ;;  %v693_v10 = vld [vmem:[%s11708_s16 + $0xa70] sm:$0xff]  ;;  %v686_v13 = vld [vmem:[%s11708_s16 + $0xa38] sm:$0xff]  ;;  %v9826_v15 = vcombine.low %v669_v58, %v677_v60 }
 0x3d5   : > { %7647 = vmatprep.subr.bf16.mxu0 %v9667_v29  ;;  %7811 = vmatprep.subr.bf16.mxu1 %v9669_v30  ;;  %v9763_v29 = vcombine.high %v605_v23, %v613_v24  ;;  %v9765_v30 = vcombine.high %v606_v26, %v614_v27  ;;  %v694_v14 = vld [vmem:[%s11708_s16 + $0xa78] sm:$0xff] }
 0x3d8   : > { %7648 = vmatpush1.bf16.msra.mxu0 %v9666_v37  ;;  %7812 = vmatpush1.bf16.msra.mxu1 %v9668_v9  ;;  %v9762_v37 = vcombine.low %v605_v23, %v613_v24  ;;  %v9764_v9 = vcombine.low %v606_v26, %v614_v27  ;;  %v702_v23 = vld [vmem:[%s11708_s16 + $0xab8] sm:$0xff]  ;;  %v9844_v27 = vcombine.low %v686_v13, %v694_v14 }
 0x3d9   : > { %7649 = vmatprep.subr.bf16.mxu0 %v9683_v38  ;;  %7813 = vmatprep.subr.bf16.mxu1 %v9685_v39  ;;  %v9779_v38 = vcombine.high %v621_v31, %v629_v32  ;;  %v9781_v39 = vcombine.high %v622_v33, %v630_v36  ;;  %v710_v24 = vld [vmem:[%s11708_s16 + $0xaf8] sm:$0xff] }
 0x3dc   : > { %7650 = vmatpush1.bf16.msra.mxu0 %v9682_v45  ;;  %7814 = vmatpush1.bf16.msra.mxu1 %v9684_v46  ;;  %v9778_v45 = vcombine.low %v621_v31, %v629_v32  ;;  %v9780_v46 = vcombine.low %v622_v33, %v630_v36  ;;  %v718_v31 = vld [vmem:[%s11708_s16 + $0xb38] sm:$0xff]  ;;  %v9860_v36 = vcombine.low %v702_v23, %v710_v24 }
 0x3dd   : > { %7651 = vmatprep.subr.bf16.mxu0 %v9699_v47  ;;  %7815 = vmatprep.subr.bf16.mxu1 %v9701_v48  ;;  %v9795_v47 = vcombine.high %v637_v41, %v645_v53  ;;  %v9797_v48 = vcombine.high %v638_v42, %v646_v44  ;;  %v726_v32 = vld [vmem:[%s11708_s16 + $0xb78] sm:$0xff] }
 0x3e0   : > { %7652 = vmatpush1.bf16.msra.mxu0 %v9698_v54  ;;  %7816 = vmatpush1.bf16.msra.mxu1 %v9700_v55  ;;  %v9794_v54 = vcombine.low %v637_v41, %v645_v53  ;;  %v9796_v55 = vcombine.low %v638_v42, %v646_v44  ;;  %v734_v41 = vld [vmem:[%s11708_s16 + $0xbb8] sm:$0xff]  ;;  %v9876_v44 = vcombine.low %v718_v31, %v726_v32 }
 0x3e1   : > { %7653 = vmatprep.subr.bf16.mxu0 %v9715_v56  ;;  %7817 = vmatprep.subr.bf16.mxu1 %v9717_v57  ;;  %v9811_v56 = vcombine.high %v653_v49, %v661_v50  ;;  %v9813_v57 = vcombine.high %v654_v51, %v662_v52  ;;  %v742_v53 = vld [vmem:[%s11708_s16 + $0xbf8] sm:$0xff] }
 0x3e4   : > { %7654 = vmatpush1.bf16.msra.mxu0 %v9714_v1  ;;  %7818 = vmatpush1.bf16.msra.mxu1 %v9716_v3  ;;  %v9812_v1 = vcombine.low %v654_v51, %v662_v52  ;;  %v9827_v3 = vcombine.high %v669_v58, %v677_v60  ;;  %v9892_v52 = vcombine.low %v734_v41, %v742_v53  ;;  %v766_v58 = vld [vmem:[%s11708_s16 + $0xcb8] sm:$0xff] }
 0x3e5   : > { %7655 = vmatprep.subr.bf16.mxu0 %v9731_v6  ;;  %7819 = vmatprep.subr.bf16.mxu1 %v9733_v7  ;;  %v9829_v6 = vcombine.high %v670_v61, %v678_v0  ;;  %v685_v7 = vld [vmem:[%s11708_s16 + $0xa30] sm:$0xff]  ;;  %v774_v60 = vld [vmem:[%s11708_s16 + $0xcf8] sm:$0xff] }
 0x3e6   : > { %v9842_v26 = vcombine.low %v685_v7, %v693_v10 }
 0x3e8   : > { %7656 = vmatpush1.bf16.msra.mxu0 %v9730_v18  ;;  %7820 = vmatpush1.bf16.msra.mxu1 %v9732_v19  ;;  %v9843_v18 = vcombine.high %v685_v7, %v693_v10  ;;  %v9845_v19 = vcombine.high %v686_v13, %v694_v14  ;;  %v782_v7 = vld [vmem:[%s11708_s16 + $0xd38] sm:$0xff]  ;;  %v9924_v14 = vcombine.low %v766_v58, %v774_v60 }
 0x3e9   : > { %7657 = vmatprep.subr.bf16.mxu0 %v9747_v21  ;;  %7821 = vmatprep.subr.bf16.mxu1 %v9749_v22  ;;  %v701_v21 = vld [vmem:[%s11708_s16 + $0xab0] sm:$0xff]  ;;  %v790_v10 = vld [vmem:[%s11708_s16 + $0xd78] sm:$0xff] }
 0x3ea   : > { %v709_v22 = vld [vmem:[%s11708_s16 + $0xaf0] sm:$0xff] }
 0x3eb   : > { %v9858_v33 = vcombine.low %v701_v21, %v709_v22 }
 0x3ec   : > { %7658 = vmatpush1.bf16.msra.mxu0 %v9746_v59  ;;  %7822 = vmatpush1.bf16.msra.mxu1 %v9748_v28  ;;  %v9859_v59 = vcombine.high %v701_v21, %v709_v22  ;;  %v9861_v28 = vcombine.high %v702_v23, %v710_v24  ;;  %v798_v21 = vld [vmem:[%s11708_s16 + $0xdb8] sm:$0xff]  ;;  %v9940_v24 = vcombine.low %v782_v7, %v790_v10 }
 0x3ed   : > { %7659 = vmatprep.subr.bf16.mxu0 %v9763_v29  ;;  %7823 = vmatprep.subr.bf16.mxu1 %v9765_v30  ;;  %v717_v29 = vld [vmem:[%s11708_s16 + $0xb30] sm:$0xff]  ;;  %v806_v22 = vld [vmem:[%s11708_s16 + $0xdf8] sm:$0xff] }
 0x3ee   : > { %v725_v30 = vld [vmem:[%s11708_s16 + $0xb70] sm:$0xff] }
 0x3ef   : > { %v9874_v42 = vcombine.low %v717_v29, %v725_v30 }
 0x3f0   : > { %7660 = vmatpush1.bf16.msra.mxu0 %v9762_v37  ;;  %7824 = vmatpush1.bf16.msra.mxu1 %v9764_v9  ;;  %v9875_v37 = vcombine.high %v717_v29, %v725_v30  ;;  %v9877_v9 = vcombine.high %v718_v31, %v726_v32  ;;  %v814_v29 = vld [vmem:[%s11708_s16 + $0xe38] sm:$0xff]  ;;  %v9956_v32 = vcombine.low %v798_v21, %v806_v22 }
 0x3f1   : > { %7670 = vmatprep.subr.bf16.mxu0 %v9779_v38  ;;  %7834 = vmatprep.subr.bf16.mxu1 %v9781_v39  ;;  %v733_v38 = vld [vmem:[%s11708_s16 + $0xbb0] sm:$0xff]  ;;  %v822_v30 = vld [vmem:[%s11708_s16 + $0xe78] sm:$0xff] }
 0x3f2   : > { %v741_v39 = vld [vmem:[%s11708_s16 + $0xbf0] sm:$0xff] }
 0x3f3   : > { %7662 = vmatmul.mubr.bf16.vlgmr.msra.gmra.mrb[12].mxu0 %v11814_v25  ;;  %7826 = vmatmul.mubr.bf16.vlgmr.msra.gmra.mrb[12].mxu1 %v11814_v25  ;;  %v9810_v25 = vcombine.low %v653_v49, %v661_v50  ;;  %v750_v49 = vld [vmem:[%s11708_s16 + $0xc38] sm:$0xff]  ;;  %v9890_v51 = vcombine.low %v733_v38, %v741_v39 }
 0x3f4   : > { %7671 = vmatpush1.bf16.msra.mxu0 %v9778_v45  ;;  %7835 = vmatpush1.bf16.msra.mxu1 %v9780_v46  ;;  %v9891_v45 = vcombine.high %v733_v38, %v741_v39  ;;  %v9893_v46 = vcombine.high %v734_v41, %v742_v53  ;;  %v758_v50 = vld [vmem:[%s11708_s16 + $0xc78] sm:$0xff]  ;;  %v9972_v53 = vcombine.low %v814_v29, %v822_v30 }
 0x3f5   : > { %7672 = vmatprep.subr.bf16.mxu0 %v9795_v47  ;;  %7836 = vmatprep.subr.bf16.mxu1 %v9797_v48  ;;  %v749_v47 = vld [vmem:[%s11708_s16 + $0xc30] sm:$0xff]  ;;  %v830_v38 = vld [vmem:[%s11708_s16 + $0xeb8] sm:$0xff] }
 0x3f6   : > { %7702 = vmatprep.mubr.bf16.mxu0 %v11822_v63  ;;  %7866 = vmatprep.mubr.bf16.mxu1 %v11822_v63  ;;  %v9828_v63 = vcombine.low %v670_v61, %v678_v0  ;;  %v757_v48 = vld [vmem:[%s11708_s16 + $0xc70] sm:$0xff]  ;;  %v9908_v0 = vcombine.low %v750_v49, %v758_v50  ;;  %v838_v39 = vld [vmem:[%s11708_s16 + $0xef8] sm:$0xff] }
 0x3f7   : > { %v9906_v61 = vcombine.low %v749_v47, %v757_v48 }
 0x3f8   : > { %7673 = vmatpush1.bf16.msra.mxu0 %v9794_v54  ;;  %7837 = vmatpush1.bf16.msra.mxu1 %v9796_v55  ;;  %v9907_v54 = vcombine.high %v749_v47, %v757_v48  ;;  %v9909_v55 = vcombine.high %v750_v49, %v758_v50  ;;  %v846_v47 = vld [vmem:[%s11708_s16 + $0xf38] sm:$0xff]  ;;  %v9988_v50 = vcombine.low %v830_v38, %v838_v39 }
 0x3f9   : > { %7674 = vmatprep.subr.bf16.mxu0 %v9811_v56  ;;  %7838 = vmatprep.subr.bf16.mxu1 %v9813_v57  ;;  %v765_v56 = vld [vmem:[%s11708_s16 + $0xcb0] sm:$0xff]  ;;  %v854_v48 = vld [vmem:[%s11708_s16 + $0xf78] sm:$0xff] }
 0x3fa   : > { %v773_v57 = vld [vmem:[%s11708_s16 + $0xcf0] sm:$0xff] }
 0x3fb   : > { %v9922_v13 = vcombine.low %v765_v56, %v773_v57 }
 0x3fc   : > { %7675 = vmatpush1.bf16.msra.mxu0 %v9810_v25  ;;  %7839 = vmatpush1.bf16.msra.mxu1 %v9812_v1  ;;  %v9923_v25 = vcombine.high %v765_v56, %v773_v57  ;;  %v9925_v1 = vcombine.high %v766_v58, %v774_v60  ;;  %v862_v56 = vld [vmem:[%s11708_s16 + $0xfb8] sm:$0xff]  ;;  %v10004_v60 = vcombine.low %v846_v47, %v854_v48 }
 0x3fd   : > { %7676 = vmatprep.subr.bf16.mxu0 %v9827_v3  ;;  %7840 = vmatprep.subr.bf16.mxu1 %v9829_v6  ;;  %v781_v3 = vld [vmem:[%s11708_s16 + $0xd30] sm:$0xff]  ;;  %v870_v57 = vld [vmem:[%s11708_s16 + $0xff8] sm:$0xff] }
 0x3fe   : > { %v789_v6 = vld [vmem:[%s11708_s16 + $0xd70] sm:$0xff] }
 0x3ff   : > { %v9938_v23 = vcombine.low %v781_v3, %v789_v6 }
 0x400   : > { %7677 = vmatpush1.bf16.msra.mxu0 %v9826_v15  ;;  %7841 = vmatpush1.bf16.msra.mxu1 %v9828_v63  ;;  %v9939_v15 = vcombine.high %v781_v3, %v789_v6  ;;  %v9941_v63 = vcombine.high %v782_v7, %v790_v10  ;;  %v878_v3 = vld [vmem:[%s11708_s16 + $0x1038] sm:$0xff]  ;;  %v10020_v10 = vcombine.low %v862_v56, %v870_v57 }
 0x401   : > { %7678 = vmatprep.subr.bf16.mxu0 %v9843_v18  ;;  %7842 = vmatprep.subr.bf16.mxu1 %v9845_v19  ;;  %v797_v18 = vld [vmem:[%s11708_s16 + $0xdb0] sm:$0xff]  ;;  %v886_v6 = vld [vmem:[%s11708_s16 + $0x1078] sm:$0xff] }
 0x402   : > { %v805_v19 = vld [vmem:[%s11708_s16 + $0xdf0] sm:$0xff] }
 0x403   : > { %v9954_v31 = vcombine.low %v797_v18, %v805_v19 }
 0x404   : > { %7679 = vmatpush1.bf16.msra.mxu0 %v9842_v26  ;;  %7843 = vmatpush1.bf16.msra.mxu1 %v9844_v27  ;;  %v9955_v26 = vcombine.high %v797_v18, %v805_v19  ;;  %v9957_v27 = vcombine.high %v798_v21, %v806_v22  ;;  %v894_v18 = vld [vmem:[%s11708_s16 + $0x10b8] sm:$0xff]  ;;  %v10036_v22 = vcombine.low %v878_v3, %v886_v6 }
 0x405   : > { %7680 = vmatprep.subr.bf16.mxu0 %v9859_v59  ;;  %7844 = vmatprep.subr.bf16.mxu1 %v9861_v28  ;;  %v813_v59 = vld [vmem:[%s11708_s16 + $0xe30] sm:$0xff]  ;;  %v902_v19 = vld [vmem:[%s11708_s16 + $0x10f8] sm:$0xff] }
 0x406   : > { %v821_v28 = vld [vmem:[%s11708_s16 + $0xe70] sm:$0xff] }
 0x407   : > { %v9970_v41 = vcombine.low %v813_v59, %v821_v28 }
 0x408   : > { %7681 = vmatpush1.bf16.msra.mxu0 %v9858_v33  ;;  %7845 = vmatpush1.bf16.msra.mxu1 %v9860_v36  ;;  %v9971_v33 = vcombine.high %v813_v59, %v821_v28  ;;  %v9973_v36 = vcombine.high %v814_v29, %v822_v30  ;;  %v910_v59 = vld [vmem:[%s11708_s16 + $0x1138] sm:$0xff]  ;;  %v925_v30 = vld [vmem:[%s11708_s16 + $0x11b0] sm:$0xff] }
 0x409   : > { %7682 = vmatprep.subr.bf16.mxu0 %v9875_v37  ;;  %7846 = vmatprep.subr.bf16.mxu1 %v9877_v9  ;;  %v829_v37 = vld [vmem:[%s11708_s16 + $0xeb0] sm:$0xff]  ;;  %v918_v28 = vld [vmem:[%s11708_s16 + $0x1178] sm:$0xff] }
 0x40a   : > { %v837_v9 = vld [vmem:[%s11708_s16 + $0xef0] sm:$0xff] }
 0x40b   : > { %v9986_v49 = vcombine.low %v829_v37, %v837_v9 }
 0x40c   : > { %7683 = vmatpush1.bf16.msra.mxu0 %v9874_v42  ;;  %7847 = vmatpush1.bf16.msra.mxu1 %v9876_v44  ;;  %v9987_v42 = vcombine.high %v829_v37, %v837_v9  ;;  %v9989_v44 = vcombine.high %v830_v38, %v838_v39  ;;  %v926_v37 = vld [vmem:[%s11708_s16 + $0x11b8] sm:$0xff]  ;;  %v941_v38 = vld [vmem:[%s11708_s16 + $0x1230] sm:$0xff]  ;;  %v10068_v39 = vcombine.low %v910_v59, %v918_v28 }
 0x40d   : > { %7684 = vmatprep.subr.bf16.mxu0 %v9891_v45  ;;  %7848 = vmatprep.subr.bf16.mxu1 %v9893_v46  ;;  %v845_v45 = vld [vmem:[%s11708_s16 + $0xf30] sm:$0xff]  ;;  %v934_v9 = vld [vmem:[%s11708_s16 + $0x11f8] sm:$0xff] }
 0x40e   : > { %v853_v46 = vld [vmem:[%s11708_s16 + $0xf70] sm:$0xff] }
 0x40f   : > { %v10002_v58 = vcombine.low %v845_v45, %v853_v46 }
 0x410   : > { %7685 = vmatpush1.bf16.msra.mxu0 %v9890_v51  ;;  %7849 = vmatpush1.bf16.msra.mxu1 %v9892_v52  ;;  %v10003_v51 = vcombine.high %v845_v45, %v853_v46  ;;  %v10005_v52 = vcombine.high %v846_v47, %v854_v48  ;;  %v950_v45 = vld [vmem:[%s11708_s16 + $0x1278] sm:$0xff]  ;;  %v957_v47 = vld [vmem:[%s11708_s16 + $0x12b0] sm:$0xff] }
 0x411   : > { %7686 = vmatprep.subr.bf16.mxu0 %v9907_v54  ;;  %7850 = vmatprep.subr.bf16.mxu1 %v9909_v55  ;;  %v861_v54 = vld [vmem:[%s11708_s16 + $0xfb0] sm:$0xff] }
 0x412   : > { %v869_v55 = vld [vmem:[%s11708_s16 + $0xff0] sm:$0xff] }
 0x413   : > { %v10018_v7 = vcombine.low %v861_v54, %v869_v55 }
 0x414   : > { %7687 = vmatpush1.bf16.msra.mxu0 %v9906_v61  ;;  %7851 = vmatpush1.bf16.msra.mxu1 %v9908_v0  ;;  %v10019_v61 = vcombine.high %v861_v54, %v869_v55  ;;  %v10021_v0 = vcombine.high %v862_v56, %v870_v57  ;;  %v973_v55 = vld [vmem:[%s11708_s16 + $0x1330] sm:$0xff] }
 0x415   : > { %7688 = vmatprep.subr.bf16.mxu0 %v9923_v25  ;;  %7852 = vmatprep.subr.bf16.mxu1 %v9925_v1  ;;  %v877_v25 = vld [vmem:[%s11708_s16 + $0x1030] sm:$0xff] }
 0x416   : > { %v885_v1 = vld [vmem:[%s11708_s16 + $0x1070] sm:$0xff] }
 0x417   : > { %v10034_v21 = vcombine.low %v877_v25, %v885_v1 }
 0x418   : > { %7689 = vmatpush1.bf16.msra.mxu0 %v9922_v13  ;;  %7853 = vmatpush1.bf16.msra.mxu1 %v9924_v14  ;;  %v10035_v13 = vcombine.high %v877_v25, %v885_v1  ;;  %v10037_v14 = vcombine.high %v878_v3, %v886_v6  ;;  %v989_v1 = vld [vmem:[%s11708_s16 + $0x13b0] sm:$0xff] }
 0x419   : > { %7690 = vmatprep.subr.bf16.mxu0 %v9939_v15  ;;  %7854 = vmatprep.subr.bf16.mxu1 %v9941_v63  ;;  %v893_v15 = vld [vmem:[%s11708_s16 + $0x10b0] sm:$0xff] }
 0x41a   : > { %v901_v63 = vld [vmem:[%s11708_s16 + $0x10f0] sm:$0xff] }
 0x41b   : > { %v10050_v29 = vcombine.low %v893_v15, %v901_v63 }
 0x41c   : > { %7691 = vmatpush1.bf16.msra.mxu0 %v9938_v23  ;;  %7855 = vmatpush1.bf16.msra.mxu1 %v9940_v24  ;;  %v10051_v23 = vcombine.high %v893_v15, %v901_v63  ;;  %v909_v24 = vld [vmem:[%s11708_s16 + $0x1130] sm:$0xff] }
 0x41d   : > { %7692 = vmatprep.subr.bf16.mxu0 %v9955_v26  ;;  %7856 = vmatprep.subr.bf16.mxu1 %v9957_v27  ;;  %v917_v26 = vld [vmem:[%s11708_s16 + $0x1170] sm:$0xff]  ;;  %v10053_v27 = vcombine.high %v894_v18, %v902_v19 }
 0x41e   : > { %v1005_v63 = vld [vmem:[%s11708_s16 + $0x1430] sm:$0xff] }
 0x420   : > { %7693 = vmatpush1.bf16.msra.mxu0 %v9954_v31  ;;  %7857 = vmatpush1.bf16.msra.mxu1 %v9956_v32  ;;  %v10052_v31 = vcombine.low %v894_v18, %v902_v19  ;;  %v10067_v32 = vcombine.high %v909_v24, %v917_v26 }
 0x421   : > { %7694 = vmatprep.subr.bf16.mxu0 %v9971_v33  ;;  %7858 = vmatprep.subr.bf16.mxu1 %v9973_v36  ;;  %v933_v33 = vld [vmem:[%s11708_s16 + $0x11f0] sm:$0xff]  ;;  %v10069_v36 = vcombine.high %v910_v59, %v918_v28 }
 0x422   : > { %v10082_v46 = vcombine.low %v925_v30, %v933_v33 }
 0x424   : > { %7695 = vmatpush1.bf16.msra.mxu0 %v9970_v41  ;;  %7859 = vmatpush1.bf16.msra.mxu1 %v9972_v53  ;;  %v10083_v41 = vcombine.high %v925_v30, %v933_v33  ;;  %v949_v53 = vld [vmem:[%s11708_s16 + $0x1270] sm:$0xff] }
 0x425   : > { %7696 = vmatprep.subr.bf16.mxu0 %v9987_v42  ;;  %7860 = vmatprep.subr.bf16.mxu1 %v9989_v44  ;;  %v10085_v42 = vcombine.high %v926_v37, %v934_v9  ;;  %v942_v44 = vld [vmem:[%s11708_s16 + $0x1238] sm:$0xff]  ;;  %v10099_v48 = vcombine.high %v941_v38, %v949_v53  ;;  %v10098_v54 = vcombine.low %v941_v38, %v949_v53 }
 0x426   : > { %v10100_v56 = vcombine.low %v942_v44, %v950_v45 }
 0x428   : > { %7697 = vmatpush1.bf16.msra.mxu0 %v9986_v49  ;;  %7861 = vmatpush1.bf16.msra.mxu1 %v9988_v50  ;;  %v965_v49 = vld [vmem:[%s11708_s16 + $0x12f0] sm:$0xff]  ;;  %v10101_v50 = vcombine.high %v942_v44, %v950_v45 }
 0x429   : > { %7698 = vmatprep.subr.bf16.mxu0 %v10003_v51  ;;  %7862 = vmatprep.subr.bf16.mxu1 %v10005_v52  ;;  %v958_v51 = vld [vmem:[%s11708_s16 + $0x12b8] sm:$0xff]  ;;  %v10115_v57 = vcombine.high %v957_v47, %v965_v49  ;;  %v10114_v25 = vcombine.low %v957_v47, %v965_v49 }
 0x42a   : > { %v966_v52 = vld [vmem:[%s11708_s16 + $0x12f8] sm:$0xff] }
 0x42b   : > { %v10116_v3 = vcombine.low %v958_v51, %v966_v52 }
 0x42c   : > { %7699 = vmatpush1.bf16.msra.mxu0 %v10002_v58  ;;  %7863 = vmatpush1.bf16.msra.mxu1 %v10004_v60  ;;  %v981_v58 = vld [vmem:[%s11708_s16 + $0x1370] sm:$0xff]  ;;  %v10117_v60 = vcombine.high %v958_v51, %v966_v52 }
 0x42d   : > { %7700 = vmatprep.subr.bf16.mxu0 %v10019_v61  ;;  %7864 = vmatprep.subr.bf16.mxu1 %v10021_v0  ;;  %v974_v61 = vld [vmem:[%s11708_s16 + $0x1338] sm:$0xff]  ;;  %v10131_v6 = vcombine.high %v973_v55, %v981_v58  ;;  %v10130_v15 = vcombine.low %v973_v55, %v981_v58 }
 0x42e   : > { %v982_v0 = vld [vmem:[%s11708_s16 + $0x1378] sm:$0xff] }
 0x42f   : > { %v10132_v18 = vcombine.low %v974_v61, %v982_v0 }
 0x430   : > { %7701 = vmatpush1.bf16.msra.mxu0 %v10018_v7  ;;  %7865 = vmatpush1.bf16.msra.mxu1 %v10020_v10  ;;  %v997_v7 = vld [vmem:[%s11708_s16 + $0x13f0] sm:$0xff]  ;;  %v10133_v10 = vcombine.high %v974_v61, %v982_v0 }
 0x431   : > { %7711 = vmatprep.subr.bf16.mxu0 %v10035_v13  ;;  %7875 = vmatprep.subr.bf16.mxu1 %v10037_v14  ;;  %v990_v13 = vld [vmem:[%s11708_s16 + $0x13b8] sm:$0xff]  ;;  %v10147_v19 = vcombine.high %v989_v1, %v997_v7 }
 0x432   : > { %v998_v14 = vld [vmem:[%s11708_s16 + $0x13f8] sm:$0xff] }
 0x433   : > { %7703 = vmatmul.mubr.bf16.vlgmr.msra.gmra.mrb[12].mxu0 %v11896_v40  ;;  %7867 = vmatmul.mubr.bf16.vlgmr.msra.gmra.mrb[12].mxu1 %v11896_v40  ;;  %v10066_v40 = vcombine.low %v909_v24, %v917_v26  ;;  %v1014_v24 = vld [vmem:[%s11708_s16 + $0x1478] sm:$0xff]  ;;  %v10146_v26 = vcombine.low %v989_v1, %v997_v7  ;;  %v10148_v59 = vcombine.low %v990_v13, %v998_v14 }
 0x434   : > { %7712 = vmatpush1.bf16.msra.mxu0 %v10034_v21  ;;  %7876 = vmatpush1.bf16.msra.mxu1 %v10036_v22  ;;  %v1013_v21 = vld [vmem:[%s11708_s16 + $0x1470] sm:$0xff]  ;;  %v10149_v22 = vcombine.high %v990_v13, %v998_v14 }
 0x435   : > { %7713 = vmatprep.subr.bf16.mxu0 %v10051_v23  ;;  %7877 = vmatprep.subr.bf16.mxu1 %v10053_v27  ;;  %v1006_v23 = vld [vmem:[%s11708_s16 + $0x1438] sm:$0xff]  ;;  %v1021_v27 = vld [vmem:[%s11708_s16 + $0x14b0] sm:$0xff]  ;;  %v10163_v28 = vcombine.high %v1005_v63, %v1013_v21  ;;  %v10162_v33 = vcombine.low %v1005_v63, %v1013_v21 }
 0x436   : > { %7743 = vmatprep.mubr.bf16.mxu0 %v11825_v34  ;;  %7907 = vmatprep.mubr.bf16.mxu1 %v11825_v34  ;;  %v10084_v34 = vcombine.low %v926_v37, %v934_v9  ;;  %v10165_v30 = vcombine.high %v1006_v23, %v1014_v24  ;;  %v10164_v37 = vcombine.low %v1006_v23, %v1014_v24 }
 0x438   : > { %7714 = vmatpush1.bf16.msra.mxu0 %v10050_v29  ;;  %7878 = vmatpush1.bf16.msra.mxu1 %v10052_v31  ;;  %v1029_v29 = vld [vmem:[%s11708_s16 + $0x14f0] sm:$0xff]  ;;  %v1022_v31 = vld [vmem:[%s11708_s16 + $0x14b8] sm:$0xff] }
 0x439   : > { %7715 = vmatprep.subr.bf16.mxu0 %v10067_v32  ;;  %7879 = vmatprep.subr.bf16.mxu1 %v10069_v36  ;;  %v1030_v32 = vld [vmem:[%s11708_s16 + $0x14f8] sm:$0xff]  ;;  %v1037_v36 = vld [vmem:[%s11708_s16 + $0x1530] sm:$0xff]  ;;  %v10179_v9 = vcombine.high %v1021_v27, %v1029_v29  ;;  %v10178_v53 = vcombine.low %v1021_v27, %v1029_v29 }
 0x43a   : > { %v10181_v38 = vcombine.high %v1022_v31, %v1030_v32  ;;  %v10180_v44 = vcombine.low %v1022_v31, %v1030_v32 }
 0x43c   : > { %7716 = vmatpush1.bf16.msra.mxu0 %v10066_v40  ;;  %7880 = vmatpush1.bf16.msra.mxu1 %v10068_v39  ;;  %v1045_v40 = vld [vmem:[%s11708_s16 + $0x1570] sm:$0xff]  ;;  %v1038_v39 = vld [vmem:[%s11708_s16 + $0x1538] sm:$0xff] }
 0x43d   : > { %7717 = vmatprep.subr.bf16.mxu0 %v10083_v41  ;;  %7881 = vmatprep.subr.bf16.mxu1 %v10085_v42  ;;  %v1046_v41 = vld [vmem:[%s11708_s16 + $0x1578] sm:$0xff]  ;;  %v1053_v42 = vld [vmem:[%s11708_s16 + $0x15b0] sm:$0xff]  ;;  %v10195_v45 = vcombine.high %v1037_v36, %v1045_v40  ;;  %v10194_v49 = vcombine.low %v1037_v36, %v1045_v40 }
 0x43e   : > { %v10197_v47 = vcombine.high %v1038_v39, %v1046_v41  ;;  %v10196_v51 = vcombine.low %v1038_v39, %v1046_v41 }
 0x440   : > { %7718 = vmatpush1.bf16.msra.mxu0 %v10082_v46  ;;  %7882 = vmatpush1.bf16.msra.mxu1 %v10084_v34  ;;  %v1061_v46 = vld [vmem:[%s11708_s16 + $0x15f0] sm:$0xff]  ;;  %v1054_v34 = vld [vmem:[%s11708_s16 + $0x15b8] sm:$0xff] }
 0x441   : > { %7719 = vmatprep.subr.bf16.mxu0 %v10099_v48  ;;  %7883 = vmatprep.subr.bf16.mxu1 %v10101_v50  ;;  %v1062_v48 = vld [vmem:[%s11708_s16 + $0x15f8] sm:$0xff]  ;;  %v1069_v50 = vld [vmem:[%s11708_s16 + $0x1630] sm:$0xff]  ;;  %v10211_v52 = vcombine.high %v1053_v42, %v1061_v46  ;;  %v10210_v58 = vcombine.low %v1053_v42, %v1061_v46 }
 0x442   : > { %v10213_v55 = vcombine.high %v1054_v34, %v1062_v48  ;;  %v10212_v61 = vcombine.low %v1054_v34, %v1062_v48 }
 0x444   : > { %7720 = vmatpush1.bf16.msra.mxu0 %v10098_v54  ;;  %7884 = vmatpush1.bf16.msra.mxu1 %v10100_v56  ;;  %v1077_v54 = vld [vmem:[%s11708_s16 + $0x1670] sm:$0xff]  ;;  %v1070_v56 = vld [vmem:[%s11708_s16 + $0x1638] sm:$0xff] }
 0x445   : > { %7721 = vmatprep.subr.bf16.mxu0 %v10115_v57  ;;  %7885 = vmatprep.subr.bf16.mxu1 %v10117_v60  ;;  %v1078_v57 = vld [vmem:[%s11708_s16 + $0x1678] sm:$0xff]  ;;  %v1085_v60 = vld [vmem:[%s11708_s16 + $0x16b0] sm:$0xff]  ;;  %v10227_v0 = vcombine.high %v1069_v50, %v1077_v54  ;;  %v10226_v7 = vcombine.low %v1069_v50, %v1077_v54 }
 0x446   : > { %v10229_v1 = vcombine.high %v1070_v56, %v1078_v57  ;;  %v10228_v13 = vcombine.low %v1070_v56, %v1078_v57 }
 0x448   : > { %7722 = vmatpush1.bf16.msra.mxu0 %v10114_v25  ;;  %7886 = vmatpush1.bf16.msra.mxu1 %v10116_v3  ;;  %v1093_v25 = vld [vmem:[%s11708_s16 + $0x16f0] sm:$0xff]  ;;  %v1086_v3 = vld [vmem:[%s11708_s16 + $0x16b8] sm:$0xff] }
 0x449   : > { %7723 = vmatprep.subr.bf16.mxu0 %v10131_v6  ;;  %7887 = vmatprep.subr.bf16.mxu1 %v10133_v10  ;;  %v1094_v6 = vld [vmem:[%s11708_s16 + $0x16f8] sm:$0xff]  ;;  %v1101_v10 = vld [vmem:[%s11708_s16 + $0x1730] sm:$0xff]  ;;  %v10243_v14 = vcombine.high %v1085_v60, %v1093_v25  ;;  %v10242_v21 = vcombine.low %v1085_v60, %v1093_v25 }
 0x44a   : > { %v10245_v63 = vcombine.high %v1086_v3, %v1094_v6  ;;  %v10244_v23 = vcombine.low %v1086_v3, %v1094_v6  ;;  %v1197_v25 = vld [vmem:[%s11708_s16 + $0x1a30] sm:$0xff] }
 0x44b   : > { %v1205_v6 = vld [vmem:[%s11708_s16 + $0x1a70] sm:$0xff] }
 0x44c   : > { %7724 = vmatpush1.bf16.msra.mxu0 %v10130_v15  ;;  %7888 = vmatpush1.bf16.msra.mxu1 %v10132_v18  ;;  %v1109_v15 = vld [vmem:[%s11708_s16 + $0x1770] sm:$0xff]  ;;  %v1102_v18 = vld [vmem:[%s11708_s16 + $0x1738] sm:$0xff] }
 0x44d   : > { %7725 = vmatprep.subr.bf16.mxu0 %v10147_v19  ;;  %7889 = vmatprep.subr.bf16.mxu1 %v10149_v22  ;;  %v1110_v19 = vld [vmem:[%s11708_s16 + $0x1778] sm:$0xff]  ;;  %v1117_v22 = vld [vmem:[%s11708_s16 + $0x17b0] sm:$0xff]  ;;  %v10259_v24 = vcombine.high %v1101_v10, %v1109_v15  ;;  %v10258_v29 = vcombine.low %v1101_v10, %v1109_v15 }
 0x44e   : > { %v10261_v27 = vcombine.high %v1102_v18, %v1110_v19  ;;  %v10260_v31 = vcombine.low %v1102_v18, %v1110_v19  ;;  %v1198_v10 = vld [vmem:[%s11708_s16 + $0x1a38] sm:$0xff]  ;;  %v1221_v18 = vld [vmem:[%s11708_s16 + $0x1af0] sm:$0xff] }
 0x450   : > { %7726 = vmatpush1.bf16.msra.mxu0 %v10146_v26  ;;  %7890 = vmatpush1.bf16.msra.mxu1 %v10148_v59  ;;  %v1125_v26 = vld [vmem:[%s11708_s16 + $0x17f0] sm:$0xff]  ;;  %v1118_v59 = vld [vmem:[%s11708_s16 + $0x17b8] sm:$0xff] }
 0x451   : > { %7727 = vmatprep.subr.bf16.mxu0 %v10163_v28  ;;  %7891 = vmatprep.subr.bf16.mxu1 %v10165_v30  ;;  %v1126_v28 = vld [vmem:[%s11708_s16 + $0x17f8] sm:$0xff]  ;;  %v1133_v30 = vld [vmem:[%s11708_s16 + $0x1830] sm:$0xff]  ;;  %v10275_v32 = vcombine.high %v1117_v22, %v1125_v26  ;;  %v10274_v40 = vcombine.low %v1117_v22, %v1125_v26  ;;  %v10354_v26 = vcombine.low %v1197_v25, %v1205_v6 }
 0x452   : > { %v10277_v36 = vcombine.high %v1118_v59, %v1126_v28  ;;  %v10276_v39 = vcombine.low %v1118_v59, %v1126_v28  ;;  %v1214_v22 = vld [vmem:[%s11708_s16 + $0x1ab8] sm:$0xff]  ;;  %v1397_v59 = vsub.s32 2, %v11743_v43 }
 0x454   : > { %7728 = vmatpush1.bf16.msra.mxu0 %v10162_v33  ;;  %7892 = vmatpush1.bf16.msra.mxu1 %v10164_v37  ;;  %v1141_v33 = vld [vmem:[%s11708_s16 + $0x1870] sm:$0xff]  ;;  %v1134_v37 = vld [vmem:[%s11708_s16 + $0x1838] sm:$0xff] }
 0x455   : > { %7729 = vmatprep.subr.bf16.mxu0 %v10179_v9  ;;  %7893 = vmatprep.subr.bf16.mxu1 %v10181_v38  ;;  %v1142_v9 = vld [vmem:[%s11708_s16 + $0x1878] sm:$0xff]  ;;  %v1149_v38 = vld [vmem:[%s11708_s16 + $0x18b0] sm:$0xff]  ;;  %v10291_v41 = vcombine.high %v1133_v30, %v1141_v33  ;;  %v10290_v46 = vcombine.low %v1133_v30, %v1141_v33 }
 0x456   : > { %v10293_v42 = vcombine.high %v1134_v37, %v1142_v9  ;;  %v10292_v34 = vcombine.low %v1134_v37, %v1142_v9  ;;  %v1237_v30 = vld [vmem:[%s11708_s16 + $0x1b70] sm:$0xff]  ;;  %v1230_v33 = vld [vmem:[%s11708_s16 + $0x1b38] sm:$0xff] }
 0x457   : > { %v1238_v9 = vld [vmem:[%s11708_s16 + $0x1b78] sm:$0xff] }
 0x458   : > { %7730 = vmatpush1.bf16.msra.mxu0 %v10178_v53  ;;  %7894 = vmatpush1.bf16.msra.mxu1 %v10180_v44  ;;  %v1157_v53 = vld [vmem:[%s11708_s16 + $0x18f0] sm:$0xff]  ;;  %v1150_v44 = vld [vmem:[%s11708_s16 + $0x18b8] sm:$0xff] }
 0x459   : > { %7731 = vmatprep.subr.bf16.mxu0 %v10195_v45  ;;  %7895 = vmatprep.subr.bf16.mxu1 %v10197_v47  ;;  %v1158_v45 = vld [vmem:[%s11708_s16 + $0x18f8] sm:$0xff]  ;;  %v1165_v47 = vld [vmem:[%s11708_s16 + $0x1930] sm:$0xff]  ;;  %v10307_v48 = vcombine.high %v1149_v38, %v1157_v53  ;;  %v10306_v54 = vcombine.low %v1149_v38, %v1157_v53 }
 0x45a   : > { %v10309_v50 = vcombine.high %v1150_v44, %v1158_v45  ;;  %v10308_v56 = vcombine.low %v1150_v44, %v1158_v45  ;;  %v1253_v53 = vld [vmem:[%s11708_s16 + $0x1bf0] sm:$0xff] }
 0x45c   : > { %7732 = vmatpush1.bf16.msra.mxu0 %v10194_v49  ;;  %7896 = vmatpush1.bf16.msra.mxu1 %v10196_v51  ;;  %v1173_v49 = vld [vmem:[%s11708_s16 + $0x1970] sm:$0xff]  ;;  %v1166_v51 = vld [vmem:[%s11708_s16 + $0x1938] sm:$0xff] }
 0x45d   : > { %7733 = vmatprep.subr.bf16.mxu0 %v10211_v52  ;;  %7897 = vmatprep.subr.bf16.mxu1 %v10213_v55  ;;  %v1174_v52 = vld [vmem:[%s11708_s16 + $0x1978] sm:$0xff]  ;;  %v1181_v55 = vld [vmem:[%s11708_s16 + $0x19b0] sm:$0xff]  ;;  %v10323_v57 = vcombine.high %v1165_v47, %v1173_v49 }
 0x45e   : > { %v10325_v60 = vcombine.high %v1166_v51, %v1174_v52 }
 0x460   : > { %7734 = vmatpush1.bf16.msra.mxu0 %v10210_v58  ;;  %7898 = vmatpush1.bf16.msra.mxu1 %v10212_v61  ;;  %v1189_v58 = vld [vmem:[%s11708_s16 + $0x19f0] sm:$0xff]  ;;  %v1182_v61 = vld [vmem:[%s11708_s16 + $0x19b8] sm:$0xff] }
 0x461   : > { %7735 = vmatprep.subr.bf16.mxu0 %v10227_v0  ;;  %7899 = vmatprep.subr.bf16.mxu1 %v10229_v1  ;;  %v1190_v0 = vld [vmem:[%s11708_s16 + $0x19f8] sm:$0xff]  ;;  %v10324_v1 = vcombine.low %v1166_v51, %v1174_v52  ;;  %v10339_v3 = vcombine.high %v1181_v55, %v1189_v58 }
 0x462   : > { %v10340_v15 = vcombine.low %v1182_v61, %v1190_v0 }
 0x464   : > { %7736 = vmatpush1.bf16.msra.mxu0 %v10226_v7  ;;  %7900 = vmatpush1.bf16.msra.mxu1 %v10228_v13  ;;  %v10341_v7 = vcombine.high %v1182_v61, %v1190_v0  ;;  %v1206_v13 = vld [vmem:[%s11708_s16 + $0x1a78] sm:$0xff]  ;;  %v10388_v0 = vcombine.low %v1230_v33, %v1238_v9 }
 0x465   : > { %7737 = vmatprep.subr.bf16.mxu0 %v10243_v14  ;;  %7901 = vmatprep.subr.bf16.mxu1 %v10245_v63  ;;  %v10338_v14 = vcombine.low %v1181_v55, %v1189_v58  ;;  %v10355_v63 = vcombine.high %v1197_v25, %v1205_v6  ;;  %v10357_v19 = vcombine.high %v1198_v10, %v1206_v13  ;;  %v1261_v25 = vld [vmem:[%s11708_s16 + $0x1c30] sm:$0xff] }
 0x466   : > { %v10356_v28 = vcombine.low %v1198_v10, %v1206_v13  ;;  %v1269_v6 = vld [vmem:[%s11708_s16 + $0x1c70] sm:$0xff]  ;;  %v1270_v10 = vld [vmem:[%s11708_s16 + $0x1c78] sm:$0xff] }
 0x468   : > { %7738 = vmatpush1.bf16.msra.mxu0 %v10242_v21  ;;  %7902 = vmatpush1.bf16.msra.mxu1 %v10244_v23  ;;  %v1384_v21 = vld [vmem:[%s11715_s12 + $0x8] sm:$0xff] }
 0x469   : > { %7739 = vmatprep.subr.bf16.mxu0 %v10259_v24  ;;  %7903 = vmatprep.subr.bf16.mxu1 %v10261_v27  ;;  %v1222_v23 = vld [vmem:[%s11708_s16 + $0x1af8] sm:$0xff]  ;;  %v1389_v24 = vsub.s32 0, %v11743_v43  ;;  %v1229_v27 = vld [vmem:[%s11708_s16 + $0x1b30] sm:$0xff] }
 0x46a   : > { %v10372_v44 = vcombine.low %v1214_v22, %v1222_v23  ;;  %v10387_v45 = vcombine.high %v1229_v27, %v1237_v30 }
 0x46b   : > { %v1422_v37 = vrot.slane %v1384_v21, %v1389_v24 }
 0x46c   : > { %7740 = vmatpush1.bf16.msra.mxu0 %v10258_v29  ;;  %7904 = vmatpush1.bf16.msra.mxu1 %v10260_v31  ;;  %v1393_v31 = vsub.s32 1, %v11743_v43 }
 0x46d   : > { %7741 = vmatprep.subr.bf16.mxu0 %v10275_v32  ;;  %7905 = vmatprep.subr.bf16.mxu1 %v10277_v36  ;;  %v10373_v32 = vcombine.high %v1214_v22, %v1222_v23  ;;  %v1401_v36 = vsub.s32 3, %v11743_v43  ;;  %v10418_v22 = vcombine.low %v1261_v25, %v1269_v6  ;;  %v1293_v23 = vld [vmem:[%s11708_s16 + $0x1d30] sm:$0xff] }
 0x46e   : > { %v1426_v38 = vrot.slane %v1384_v21, %v1393_v31 }
 0x470   : > { %7742 = vmatpush1.bf16.msra.mxu0 %v10274_v40  ;;  %7906 = vmatpush1.bf16.msra.mxu1 %v10276_v39  ;;  %v1430_v40 = vrot.slane %v1384_v21, %v1397_v59 }
 0x471   : > { %7752 = vmatprep.subr.bf16.mxu0 %v10291_v41  ;;  %7916 = vmatprep.subr.bf16.mxu1 %v10293_v42  ;;  %v1245_v41 = vld [vmem:[%s11708_s16 + $0x1bb0] sm:$0xff]  ;;  %v1434_v42 = vrot.slane %v1384_v21, %v1401_v36  ;;  %v1286_v21 = vld [vmem:[%s11708_s16 + $0x1cf8] sm:$0xff] }
 0x472   : > { %v10402_v13 = vcombine.low %v1245_v41, %v1253_v53 }
 0x473   : > { %7744 = vmatmul.mubr.bf16.vlgmr.msra.gmra.mrb[12].mxu0 %v11828_v35  ;;  %7908 = vmatmul.mubr.bf16.vlgmr.msra.gmra.mrb[12].mxu1 %v11828_v35  ;;  %v10322_v35 = vcombine.low %v1165_v47, %v1173_v49 }
 0x474   : > { %7753 = vmatpush1.bf16.msra.mxu0 %v10290_v46  ;;  %7917 = vmatpush1.bf16.msra.mxu1 %v10292_v34  ;;  %v1246_v46 = vld [vmem:[%s11708_s16 + $0x1bb8] sm:$0xff]  ;;  %v10389_v34 = vcombine.high %v1230_v33, %v1238_v9 }
 0x475   : > { %7754 = vmatprep.subr.bf16.mxu0 %v10307_v48  ;;  %7918 = vmatprep.subr.bf16.mxu1 %v10309_v50  ;;  %v1254_v48 = vld [vmem:[%s11708_s16 + $0x1bf8] sm:$0xff] }
 0x476   : > { %7784 = vmatprep.mubr.bf16.mxu0 %v11972_v2  ;;  %7948 = vmatprep.mubr.bf16.mxu1 %v11972_v2  ;;  %v1213_v2 = vld [vmem:[%s11708_s16 + $0x1ab0] sm:$0xff] }
 0x477   : > { %v10371_v29 = vcombine.high %v1213_v2, %v1221_v18  ;;  %v10370_v39 = vcombine.low %v1213_v2, %v1221_v18  ;;  %v10404_v2 = vcombine.low %v1246_v46, %v1254_v48 }
 0x478   : > { %7755 = vmatpush1.bf16.msra.mxu0 %v10306_v54  ;;  %7919 = vmatpush1.bf16.msra.mxu1 %v10308_v56 }
 0x479   : > { %7756 = vmatprep.subr.bf16.mxu0 %v10323_v57  ;;  %7920 = vmatprep.subr.bf16.mxu1 %v10325_v60  ;;  %v10386_v57 = vcombine.low %v1229_v27, %v1237_v30 }
 0x47c   : > { %7757 = vmatpush1.bf16.msra.mxu0 %v10322_v35  ;;  %7921 = vmatpush1.bf16.msra.mxu1 %v10324_v1  ;;  %v10403_v35 = vcombine.high %v1245_v41, %v1253_v53  ;;  %v1310_v41 = vld [vmem:[%s11708_s16 + $0x1db8] sm:$0xff] }
 0x47d   : > { %7758 = vmatprep.subr.bf16.mxu0 %v10339_v3  ;;  %7922 = vmatprep.subr.bf16.mxu1 %v10341_v7  ;;  %v10405_v3 = vcombine.high %v1246_v46, %v1254_v48  ;;  %v1262_v7 = vld [vmem:[%s11708_s16 + $0x1c38] sm:$0xff] }
 0x47e   : > { %v10421_v18 = vcombine.high %v1262_v7, %v1270_v10  ;;  %v10420_v27 = vcombine.low %v1262_v7, %v1270_v10  ;;  %v1318_v53 = vld [vmem:[%s11708_s16 + $0x1df8] sm:$0xff]  ;;  %v1365_v10 = vld [vmem:[%s11708_s16 + $0x1f70] sm:$0xff] }
 0x47f   : > { %v1326_v48 = vld [vmem:[%s11708_s16 + $0x1e38] sm:$0xff] }
 0x480   : > { %7759 = vmatpush1.bf16.msra.mxu0 %v10338_v14  ;;  %7923 = vmatpush1.bf16.msra.mxu1 %v10340_v15  ;;  %v1277_v14 = vld [vmem:[%s11708_s16 + $0x1cb0] sm:$0xff]  ;;  %v10419_v15 = vcombine.high %v1261_v25, %v1269_v6  ;;  %v1350_v25 = vld [vmem:[%s11708_s16 + $0x1ef8] sm:$0xff] }
 0x481   : > { %7760 = vmatprep.subr.bf16.mxu0 %v10355_v63  ;;  %7924 = vmatprep.subr.bf16.mxu1 %v10357_v19  ;;  %v1285_v63 = vld [vmem:[%s11708_s16 + $0x1cf0] sm:$0xff]  ;;  %v1278_v19 = vld [vmem:[%s11708_s16 + $0x1cb8] sm:$0xff] }
 0x482   : > { %v10437_v30 = vcombine.high %v1278_v19, %v1286_v21  ;;  %v10434_v33 = vcombine.low %v1277_v14, %v1285_v63  ;;  %v10436_v9 = vcombine.low %v1278_v19, %v1286_v21 }
 0x484   : > { %7761 = vmatpush1.bf16.msra.mxu0 %v10354_v26  ;;  %7925 = vmatpush1.bf16.msra.mxu1 %v10356_v28  ;;  %v1301_v26 = vld [vmem:[%s11708_s16 + $0x1d70] sm:$0xff]  ;;  %v10435_v28 = vcombine.high %v1277_v14, %v1285_v63 }
 0x485   : > { %7762 = vmatprep.subr.bf16.mxu0 %v10371_v29  ;;  %7926 = vmatprep.subr.bf16.mxu1 %v10373_v32  ;;  %v1294_v29 = vld [vmem:[%s11708_s16 + $0x1d38] sm:$0xff] }
 0x486   : > { %v7458_v47 = vpop.f32.mrb[8].mxu0  ;;  %v7622_v50 = vpop.f32.mrb[8].mxu1  ;;  %v1302_v32 = vld [vmem:[%s11708_s16 + $0x1d78] sm:$0xff] }
 0x487   : > { %v12852_v49 = vadd.f32 %v7458_v47, %v1422_v37  ;;  %v7460_v51 = vpop.f32.mrb[9].mxu0  ;;  %v12854_v52 = vadd.f32 %v7622_v50, %v1430_v40  ;;  %v7624_v55 = vpop.f32.mrb[9].mxu1  ;;  %v1309_v37 = vld [vmem:[%s11708_s16 + $0x1db0] sm:$0xff]  ;;  %v10451_v40 = vcombine.high %v1293_v23, %v1301_v26  ;;  %v1334_v50 = vld [vmem:[%s11708_s16 + $0x1e78] sm:$0xff] }
 0x488   : > { %v12856_v54 = vadd.f32 %v7460_v51, %v1426_v38  ;;  %v7462_v56 = vpop.f32.mrb[10].mxu0  ;;  %7763 = vmatpush1.bf16.msra.mxu0 %v10370_v39  ;;  %v12858_v58 = vadd.f32 %v7624_v55, %v1434_v42  ;;  %v7626_v60 = vpop.f32.mrb[10].mxu1  ;;  %7927 = vmatpush1.bf16.msra.mxu1 %v10372_v44  ;;  %v1317_v38 = vld [vmem:[%s11708_s16 + $0x1df0] sm:$0xff]  ;;  %v10453_v39 = vcombine.high %v1294_v29, %v1302_v32 }
 0x489   : > { %v7463_v61 = vpop.f32.mrb[11].mxu0  ;;  %7764 = vmatprep.subr.bf16.mxu0 %v10387_v45  ;;  %v7627_v1 = vpop.f32.mrb[11].mxu1  ;;  %7928 = vmatprep.subr.bf16.mxu1 %v10389_v34  ;;  %v10450_v42 = vcombine.low %v1293_v23, %v1301_v26  ;;  %v1325_v44 = vld [vmem:[%s11708_s16 + $0x1e30] sm:$0xff]  ;;  %v10452_v45 = vcombine.low %v1294_v29, %v1302_v32  ;;  %v10467_v46 = vcombine.high %v1309_v37, %v1317_v38 }
 0x48a   : > { %v1333_v47 = vld [vmem:[%s11708_s16 + $0x1e70] sm:$0xff]  ;;  %v10469_v34 = vcombine.high %v1310_v41, %v1318_v53  ;;  %v10466_v51 = vcombine.low %v1309_v37, %v1317_v38  ;;  %v10484_v6 = vcombine.low %v1326_v48, %v1334_v50  ;;  %v11062_v37 = vld [vmem:[%s12744_s8 + $0x40] sm:$0xff]  }
 0x48b   : > { %v1341_v55 = vld [vmem:[%s11708_s16 + $0x1eb0] sm:$0xff]  ;;  %v10483_v60 = vcombine.high %v1325_v44, %v1333_v47  ;;  %v10482_v1 = vcombine.low %v1325_v44, %v1333_v47  ;;  %v11063_v38 = vld [vmem:[%s12744_s8 + $0xc0] sm:$0xff]   ;;  %v11067_v44 = vld [vmem:[%s12744_s8 + $0xc8] sm:$0xff]  }
 0x48c   : > { %7765 = vmatpush1.bf16.msra.mxu0 %v10386_v57  ;;  %7929 = vmatpush1.bf16.msra.mxu1 %v10388_v0  ;;  %v12882_v56 = vld [vmem:[%s11715_s12] sm:$0xff]  ;;  %v10468_v57 = vcombine.low %v1310_v41, %v1318_v53  ;;  %v10485_v0 = vcombine.high %v1326_v48, %v1334_v50  ;;  %v11064_v41 = vld [vmem:[%s12744_s8] sm:$0xff]   ;;  %v11071_v48 = vld [vmem:[%s12744_s8 + $0xd0] sm:$0xff]  }
 0x48d   : > { %7766 = vmatprep.subr.bf16.mxu0 %v10403_v35  ;;  %7930 = vmatprep.subr.bf16.mxu1 %v10405_v3  ;;  %v1349_v61 = vld [vmem:[%s11708_s16 + $0x1ef0] sm:$0xff]  ;;  %v1342_v35 = vld [vmem:[%s11708_s16 + $0x1eb8] sm:$0xff]  ;;  %v11069_v47 = vld [vmem:[%s12744_s8 + $0x88] sm:$0xff]  }
 0x48e   : > { %v1357_v3 = vld [vmem:[%s11708_s16 + $0x1f30] sm:$0xff]  ;;  %v10499_v7 = vcombine.high %v1341_v55, %v1349_v61  ;;  %v10501_v14 = vcombine.high %v1342_v35, %v1350_v25  ;;  %v10498_v63 = vcombine.low %v1341_v55, %v1349_v61  ;;  %v10500_v19 = vcombine.low %v1342_v35, %v1350_v25  ;;  %v11065_v53 = vld [vmem:[%s12744_s8 + $0x80] sm:$0xff]   ;;  %v11072_v50 = vld [vmem:[%s12744_s8 + $0x10] sm:$0xff]  }
 0x48f   : > { %v10515_v21 = vcombine.high %v1357_v3, %v1365_v10  ;;  %v10514_v29 = vcombine.low %v1357_v3, %v1365_v10  ;;  %v11075_v55 = vld [vmem:[%s12744_s8 + $0xd8] sm:$0xff]   ;;  %v11078_v61 = vld [vmem:[%s12744_s8 + $0x60] sm:$0xff]   ;;  %v11083_v3 = vld [vmem:[%s12744_s8 + $0xe8] sm:$0xff]  }
 0x490   : > { %7767 = vmatpush1.bf16.msra.mxu0 %v10402_v13  ;;  %7931 = vmatpush1.bf16.msra.mxu1 %v10404_v2  ;;  %v1394_v13 = vrot.slane %v12882_v56, %v1393_v31  ;;  %v1358_v2 = vld [vmem:[%s11708_s16 + $0x1f38] sm:$0xff]  ;;  %v11084_v10 = vld [vmem:[%s12744_s8 + $0x28] sm:$0xff]  }
 0x491   : > { %7768 = vmatprep.subr.bf16.mxu0 %v10419_v15  ;;  %7932 = vmatprep.subr.bf16.mxu1 %v10421_v18  ;;  %v1366_v15 = vld [vmem:[%s11708_s16 + $0x1f78] sm:$0xff]  ;;  %v1373_v18 = vld [vmem:[%s11708_s16 + $0x1fb0] sm:$0xff] }
 0x492   : > { %v10847_v23 = vadd.f32 %v12278_v5, %v1394_v13  ;;  %v10517_v26 = vcombine.high %v1358_v2, %v1366_v15  ;;  %v1374_v31 = vld [vmem:[%s11708_s16 + $0x1fb8] sm:$0xff]  ;;  %v1390_v13 = vrot.slane %v12882_v56, %v1389_v24 }
 0x493   : > { %v11080_v35 = vld [vmem:[%s12744_s8 + $0x20] sm:$0xff]  }
 0x494   : > { %7769 = vmatpush1.bf16.msra.mxu0 %v10418_v22  ;;  %7933 = vmatpush1.bf16.msra.mxu1 %v10420_v27  ;;  %v1381_v22 = vld [vmem:[%s11708_s16 + $0x1ff0] sm:$0xff]  ;;  %v1382_v27 = vld [vmem:[%s11708_s16 + $0x1ff8] sm:$0xff]  ;;  %s11335_s16 = scalar_lea.vmem %s13087_s14, 32 }
 0x495   : > { %7770 = vmatprep.subr.bf16.mxu0 %v10435_v28  ;;  %7934 = vmatprep.subr.bf16.mxu1 %v10437_v30  ;;  %v1402_v28 = vrot.slane %v12882_v56, %v1401_v36  ;;  %v10516_v30 = vcombine.low %v1358_v2, %v1366_v15  ;;  %v10531_v32 = vcombine.high %v1373_v18, %v1381_v22  ;;  %v11081_v25 = vld [vmem:[%s12744_s8 + $0xa0] sm:$0xff]   ;;  %v11086_v2 = vld [vmem:[%s12744_s8 + $0x70] sm:$0xff]   ;;  %p11336_p6 = scmp.ne.s32.totalorder %s13087_s14, %s11335_s16 }
 0x496   : > { %v10533_v5 = vcombine.high %v1374_v31, %v1382_v27  ;;  %v10532_v36 = vcombine.low %v1374_v31, %v1382_v27  ;;  %v1398_v15 = vrot.slane %v12882_v56, %v1397_v59  ;;  %v11089_v59 = vld [vmem:[%s12744_s8 + $0xb0] sm:$0xff]  }
 0x497   : > { %p11337_p11 = pnand %p11336_p6, %p13188_p13 }
 0x498   : > { %7771 = vmatpush1.bf16.msra.mxu0 %v10434_v33  ;;  %7935 = vmatpush1.bf16.msra.mxu1 %v10436_v9  ;;  %v7958_v33 = vmax.f32 %v10847_v23, 0.0  ;;  %v10849_v9 = vadd.f32 %v12282_v8, %v1402_v28  ;;  %v11066_v8 = vld [vmem:[%s12744_s8 + $0x48] sm:$0xff]   ;;  %v10848_v23 = vadd.f32 %v12276_v4, %v1398_v15  ;;  %v11092_v28 = vld [vmem:[%s12744_s8 + $0x38] sm:$0xff]   ;;  %v11095_v4 = vld [vmem:[%s12744_s8 + $0x1c0] sm:$0xff]  }
 0x499   : > { %7772 = vmatprep.subr.bf16.mxu0 %v10451_v40  ;;  %7936 = vmatprep.subr.bf16.mxu1 %v10453_v39  ;;  %v10530_v40 = vcombine.low %v1373_v18, %v1381_v22  ;;  %v11090_v22 = vld [vmem:[%s12744_s8 + $0x78] sm:$0xff]   ;;  %v11121_v15 = vld [vmem:[%s12744_s8 + $0x1b0] sm:$0xff]   ;;  %p11338_p4 = pneg %p11337_p11 }
 0x49a   : > { %v7960_v39 = vmax.f32 %v10849_v9, 0.0 }
 0x49c   : > { %7773 = vmatpush1.bf16.msra.mxu0 %v10450_v42  ;;  %7937 = vmatpush1.bf16.msra.mxu1 %v10452_v45  ;;  %v8237_v42 = vpack.c.bf16 %v7958_v33, %v7958_v33  ;;  %v8239_v45 = vpack.c.bf16 %v7960_v39, %v7960_v39 }
 0x49d   : > { %7774 = vmatprep.subr.bf16.mxu0 %v10467_v46  ;;  %7938 = vmatprep.subr.bf16.mxu1 %v10469_v34  ;;  %v11068_v46 = vld [vmem:[%s12744_s8 + $0x8] sm:$0xff]   ;;  %v11070_v34 = vld [vmem:[%s12744_s8 + $0x50] sm:$0xff]  }
 0x4a0   : > { %7775 = vmatpush1.bf16.msra.mxu0 %v10466_v51  ;;  %7939 = vmatpush1.bf16.msra.mxu1 %v10468_v57  ;;  %v11074_v51 = vld [vmem:[%s12744_s8 + $0x58] sm:$0xff]  }
 0x4a1   : > { %7776 = vmatprep.subr.bf16.mxu0 %v10483_v60  ;;  %7940 = vmatprep.subr.bf16.mxu1 %v10485_v0  ;;  %v11076_v57 = vld [vmem:[%s12744_s8 + $0x18] sm:$0xff]   ;;  %v11079_v0 = vld [vmem:[%s12744_s8 + $0xe0] sm:$0xff]  }
 0x4a2   : > { %v11077_v60 = vld [vmem:[%s12744_s8 + $0x98] sm:$0xff]  }
 0x4a4   : > { %7777 = vmatpush1.bf16.msra.mxu0 %v10482_v1  ;;  %7941 = vmatpush1.bf16.msra.mxu1 %v10484_v6  ;;  %v11082_v1 = vld [vmem:[%s12744_s8 + $0x68] sm:$0xff]   ;;  %v1409_v6 = vsub.s32 5, %v11743_v43 }
 0x4a5   : > { %7778 = vmatprep.subr.bf16.mxu0 %v10499_v7  ;;  %7942 = vmatprep.subr.bf16.mxu1 %v10501_v14  ;;  %v1417_v7 = vsub.s32 7, %v11743_v43  ;;  %v11085_v14 = vld [vmem:[%s12744_s8 + $0xa8] sm:$0xff]  }
 0x4a6   : > { %v1410_v18 = vrot.slane %v12882_v56, %v1409_v6 }
 0x4a7   : > { %v1418_v24 = vrot.slane %v12882_v56, %v1417_v7 }
 0x4a8   : > { %7779 = vmatpush1.bf16.msra.mxu0 %v10498_v63  ;;  %7943 = vmatpush1.bf16.msra.mxu1 %v10500_v19  ;;  %v11087_v63 = vld [vmem:[%s12744_s8 + $0xf0] sm:$0xff]   ;;  %v10851_v31 = vadd.f32 %v12558_v17, %v1410_v18  ;;  %v11096_v17 = vld [vmem:[%s12744_s8 + $0x100] sm:$0xff]  }
 0x4a9   : > { %7780 = vmatprep.subr.bf16.mxu0 %v10515_v21  ;;  %7944 = vmatprep.subr.bf16.mxu1 %v10517_v26  ;;  %v11088_v19 = vld [vmem:[%s12744_s8 + $0x30] sm:$0xff]   ;;  %v10846_v21 = vadd.f32 %v12272_v62, %v1390_v13  ;;  %v11091_v26 = vld [vmem:[%s12744_s8 + $0xf8] sm:$0xff]   ;;  %v10853_v27 = vadd.f32 %v12562_v20, %v1418_v24  ;;  %v11097_v20 = vld [vmem:[%s12744_s8 + $0x180] sm:$0xff]  }
 0x4aa   : > { %v11093_v62 = vld [vmem:[%s12744_s8 + $0xb8] sm:$0xff]   ;;  %v7962_v33 = vmax.f32 %v10851_v31, 0.0  ;;  %v11119_v13 = vld [vmem:[%s12744_s8 + $0x1f0] sm:$0xff]  }
 0x4ab   : > { %v11123_v24 = vld [vmem:[%s12744_s8 + $0x1f8] sm:$0xff]  }
 0x4ac   : > { %7781 = vmatpush1.bf16.msra.mxu0 %v10514_v29  ;;  %7945 = vmatpush1.bf16.msra.mxu1 %v10516_v30  ;;  %v7957_v29 = vmax.f32 %v10846_v21, 0.0  ;;  %v11094_v30 = vld [vmem:[%s12744_s8 + $0x140] sm:$0xff]   ;;  %v11125_v21 = vld [vmem:[%s12744_s8 + $0x1b8] sm:$0xff]  }
 0x4ad   : > { %7782 = vmatprep.subr.bf16.mxu0 %v10531_v32  ;;  %7946 = vmatprep.subr.bf16.mxu1 %v10533_v5  ;;  %v7959_v32 = vmax.f32 %v10848_v23, 0.0  ;;  %v7964_v5 = vmax.f32 %v10853_v27, 0.0  ;;  %v7966_v23 = vmax.f32 %v12856_v54, 0.0  ;;  %v11129_v27 = vld [vmem:[%s12744_s8 + $0x280] sm:$0xff]  }
 0x4af   : > { %v8238_v9 = vpack.c.bf16 %v7959_v32, %v7959_v32  ;;  %v8243_v39 = vpack.c.bf16 %v7964_v5, %v7964_v5  ;;  %v11133_v32 = vld [vmem:[%s12744_s8 + $0x288] sm:$0xff]   ;;  %v11136_v5 = vld [vmem:[%s12744_s8 + $0x210] sm:$0xff]  }
 0x4b0   : > { %7783 = vmatpush1.bf16.msra.mxu0 %v10530_v40  ;;  %7947 = vmatpush1.bf16.msra.mxu1 %v10532_v36  ;;  %v11098_v40 = vld [vmem:[%s12744_s8 + $0x148] sm:$0xff]  }
 0x4b1   : > { %10670 = vmatprep.subr.bf16.mxu0 %v11062_v37  ;;  %10692 = vmatprep.subr.bf16.mxu1 %v11063_v38  ;;  %v8236_v37 = vpack.c.bf16 %v7957_v29, %v7957_v29  ;;  %v8241_v38 = vpack.c.bf16 %v7962_v33, %v7962_v33  ;;  %v11099_v36 = vld [vmem:[%s12744_s8 + $0x1c8] sm:$0xff]   ;;  %v11135_v33 = vld [vmem:[%s12744_s8 + $0x2d0] sm:$0xff]  }
 0x4b2   : > { %v11130_v29 = vld [vmem:[%s12744_s8 + $0x248] sm:$0xff]  }
 0x4b3   : > { %7785 = vmatmul.mubr.bf16.vlgmr.msra.gmra.mrb[12].mxu0 %v12040_v12  ;;  %7949 = vmatmul.mubr.bf16.vlgmr.msra.gmra.mrb[12].mxu1 %v12040_v12  ;;  %v11073_v12 = vld [vmem:[%s12744_s8 + $0x90] sm:$0xff]  }
 0x4b4   : > { %10671 = vmatpush3.bf16.msra.mxu0 %v11064_v41  ;;  %9052 = vmatprep.mubr.bf16.mxu0 %v8237_v42  ;;  %v11100_v41 = vld [vmem:[%s12744_s8 + $0x108] sm:$0xff]   ;;  %v11103_v42 = vld [vmem:[%s12744_s8 + $0x1d0] sm:$0xff]  }
 0x4b5   : > { %10693 = vmatpush3.bf16.msra.mxu1 %v11065_v53  ;;  %9092 = vmatprep.mubr.bf16.mxu1 %v8239_v45  ;;  %v11101_v53 = vld [vmem:[%s12744_s8 + $0x188] sm:$0xff]   ;;  %v11105_v45 = vld [vmem:[%s12744_s8 + $0x190] sm:$0xff]  }
 0x4b6   : > { %10672 = vmatprep.subr.bf16.mxu0 %v11066_v8  ;;  %10694 = vmatprep.subr.bf16.mxu1 %v11067_v44  ;;  %v11102_v8 = vld [vmem:[%s12744_s8 + $0x150] sm:$0xff]  }
 0x4b7   : > { %v11104_v44 = vld [vmem:[%s12744_s8 + $0x110] sm:$0xff]  }
 0x4b8   : > { %10673 = vmatpush3.bf16.msra.mxu0 %v11068_v46  ;;  %v11106_v46 = vld [vmem:[%s12744_s8 + $0x158] sm:$0xff]  }
 0x4b9   : > { %10695 = vmatpush3.bf16.msra.mxu1 %v11069_v47  ;;  %10674 = vmatprep.subr.bf16.mxu0 %v11070_v34  ;;  %v11107_v47 = vld [vmem:[%s12744_s8 + $0x1d8] sm:$0xff]  }
 0x4ba   : > { %10696 = vmatprep.subr.bf16.mxu1 %v11071_v48  ;;  %v11108_v34 = vld [vmem:[%s12744_s8 + $0x118] sm:$0xff]  }
 0x4bb   : > { %v11109_v48 = vld [vmem:[%s12744_s8 + $0x198] sm:$0xff]  }
 0x4bc   : > { %10675 = vmatpush3.bf16.msra.mxu0 %v11072_v50  ;;  %v11110_v50 = vld [vmem:[%s12744_s8 + $0x160] sm:$0xff]  }
 0x4bd   : > { %10697 = vmatpush3.bf16.msra.mxu1 %v11073_v12  ;;  %10676 = vmatprep.subr.bf16.mxu0 %v11074_v51  ;;  %v11111_v12 = vld [vmem:[%s12744_s8 + $0x1e0] sm:$0xff]  }
 0x4be   : > { %10698 = vmatprep.subr.bf16.mxu1 %v11075_v55  ;;  %v11112_v51 = vld [vmem:[%s12744_s8 + $0x120] sm:$0xff]   ;;  %v1405_v55 = vsub.s32 4, %v11743_v43 }
 0x4c0   : > { %10677 = vmatpush3.bf16.msra.mxu0 %v11076_v57  ;;  %v11113_v57 = vld [vmem:[%s12744_s8 + $0x1a0] sm:$0xff]  }
 0x4c1   : > { %10699 = vmatpush3.bf16.msra.mxu1 %v11077_v60  ;;  %10678 = vmatprep.subr.bf16.mxu0 %v11078_v61  ;;  %v11114_v60 = vld [vmem:[%s12744_s8 + $0x168] sm:$0xff]   ;;  %v1413_v61 = vsub.s32 6, %v11743_v43 }
 0x4c2   : > { %10700 = vmatprep.subr.bf16.mxu1 %v11079_v0  ;;  %v11115_v0 = vld [vmem:[%s12744_s8 + $0x1e8] sm:$0xff]  }
 0x4c4   : > { %10679 = vmatpush3.bf16.msra.mxu0 %v11080_v35  ;;  %v11116_v35 = vld [vmem:[%s12744_s8 + $0x128] sm:$0xff]  }
 0x4c5   : > { %10701 = vmatpush3.bf16.msra.mxu1 %v11081_v25  ;;  %10680 = vmatprep.subr.bf16.mxu0 %v11082_v1  ;;  %v1406_v25 = vrot.slane %v12882_v56, %v1405_v55  ;;  %v11117_v1 = vld [vmem:[%s12744_s8 + $0x1a8] sm:$0xff]  }
 0x4c6   : > { %10702 = vmatprep.subr.bf16.mxu1 %v11083_v3  ;;  %v11118_v3 = vld [vmem:[%s12744_s8 + $0x170] sm:$0xff]  }
 0x4c8   : > { %10681 = vmatpush3.bf16.msra.mxu0 %v11084_v10  ;;  %v1414_v10 = vrot.slane %v12882_v56, %v1413_v61  ;;  %v11124_v56 = vld [vmem:[%s12744_s8 + $0x138] sm:$0xff]  }
 0x4c9   : > { %10703 = vmatpush3.bf16.msra.mxu1 %v11085_v14  ;;  %10682 = vmatprep.subr.bf16.mxu0 %v11086_v2  ;;  %v11120_v14 = vld [vmem:[%s12744_s8 + $0x130] sm:$0xff]   ;;  %v10850_v2 = vadd.f32 %v12552_v11, %v1406_v25  ;;  %v11160_v25 = vld [vmem:[%s12744_s8 + $0x300] sm:$0xff]  }
 0x4ca   : > { %10704 = vmatprep.subr.bf16.mxu1 %v11087_v63  ;;  %v11122_v63 = vld [vmem:[%s12744_s8 + $0x178] sm:$0xff]   ;;  %v10852_v18 = vadd.f32 %v12556_v16, %v1414_v10  ;;  %v7968_v16 = vmax.f32 %v12858_v58, 0.0  ;;  %v11132_v58 = vld [vmem:[%s12744_s8 + $0x208] sm:$0xff]  }
 0x4cc   : > { %10683 = vmatpush3.bf16.msra.mxu0 %v11088_v19  ;;  %v7961_v19 = vmax.f32 %v10850_v2, 0.0  ;;  %v7963_v11 = vmax.f32 %v10852_v18, 0.0  ;;  %v8247_v54 = vpack.c.bf16 %v7968_v16, %v7968_v16  ;;  %v11166_v2 = vld [vmem:[%s12744_s8 + $0x350] sm:$0xff]   ;;  %v11178_v16 = vld [vmem:[%s12744_s8 + $0x368] sm:$0xff]  }
 0x4cd   : > { %10705 = vmatpush3.bf16.msra.mxu1 %v11089_v59  ;;  %10684 = vmatprep.subr.bf16.mxu0 %v11090_v22  ;;  %v11126_v59 = vld [vmem:[%s12744_s8 + $0x240] sm:$0xff]   ;;  %v11169_v18 = vld [vmem:[%s12744_s8 + $0x390] sm:$0xff]  }
 0x4ce   : > { %10706 = vmatprep.subr.bf16.mxu1 %v11091_v26  ;;  %v11127_v22 = vld [vmem:[%s12744_s8 + $0x2c0] sm:$0xff]   ;;  %v8240_v31 = vpack.c.bf16 %v7961_v19, %v7961_v19  ;;  %v11172_v19 = vld [vmem:[%s12744_s8 + $0x318] sm:$0xff]  }
 0x4cf   : > { %v11128_v26 = vld [vmem:[%s12744_s8 + $0x200] sm:$0xff]  }
 0x4d0   : > { %10685 = vmatpush3.bf16.msra.mxu0 %v11092_v28  ;;  %v8242_v28 = vpack.c.bf16 %v7963_v11, %v7963_v11  ;;  %v11175_v11 = vld [vmem:[%s12744_s8 + $0x3e0] sm:$0xff]  }
 0x4d1   : > { %10707 = vmatpush3.bf16.msra.mxu1 %v11093_v62  ;;  %10714 = vmatprep.subr.bf16.mxu0 %v11094_v30  ;;  %v8245_v62 = vpack.c.bf16 %v7966_v23, %v7966_v23  ;;  %v11131_v30 = vld [vmem:[%s12744_s8 + $0x2c8] sm:$0xff]   ;;  %v11177_v23 = vld [vmem:[%s12744_s8 + $0x3a0] sm:$0xff]  }
 0x4d2   : > { %10736 = vmatprep.subr.bf16.mxu1 %v11095_v4  ;;  %v11134_v4 = vld [vmem:[%s12744_s8 + $0x250] sm:$0xff]  }
 0x4d3   : > { %9053 = vmatmul.mubr.bf16.vlgmr.msra.gmra.mrb[16].mxu0 %v8236_v37  ;;  %v11138_v37 = vld [vmem:[%s12744_s8 + $0x258] sm:$0xff]  }
 0x4d4   : > { %9093 = vmatmul.mubr.bf16.vlgmr.msra.gmra.mrb[16].mxu1 %v8238_v9  ;;  %10715 = vmatpush3.bf16.msra.mxu0 %v11096_v17  ;;  %v11137_v17 = vld [vmem:[%s12744_s8 + $0x290] sm:$0xff]   ;;  %v11140_v9 = vld [vmem:[%s12744_s8 + $0x218] sm:$0xff]  }
 0x4d5   : > { %9132 = vmatprep.mubr.bf16.mxu0 %v8241_v38  ;;  %10737 = vmatpush3.bf16.msra.mxu1 %v11097_v20  ;;  %v11139_v20 = vld [vmem:[%s12744_s8 + $0x2d8] sm:$0xff]   ;;  %v11142_v38 = vld [vmem:[%s12744_s8 + $0x260] sm:$0xff]  }
 0x4d6   : > { %9172 = vmatprep.mubr.bf16.mxu1 %v8243_v39  ;;  %10716 = vmatprep.subr.bf16.mxu0 %v11098_v40  ;;  %v11141_v40 = vld [vmem:[%s12744_s8 + $0x298] sm:$0xff]   ;;  %v11144_v39 = vld [vmem:[%s12744_s8 + $0x220] sm:$0xff]  }
 0x4d7   : > { %10738 = vmatprep.subr.bf16.mxu1 %v11099_v36  ;;  %v11143_v36 = vld [vmem:[%s12744_s8 + $0x2e0] sm:$0xff]  }
 0x4d8   : > { %10717 = vmatpush3.bf16.msra.mxu0 %v11100_v41  ;;  %v11145_v41 = vld [vmem:[%s12744_s8 + $0x2a0] sm:$0xff]  }
 0x4d9   : > { %10739 = vmatpush3.bf16.msra.mxu1 %v11101_v53  ;;  %10718 = vmatprep.subr.bf16.mxu0 %v11102_v8  ;;  %v11146_v53 = vld [vmem:[%s12744_s8 + $0x268] sm:$0xff]  }
 0x4da   : > { %10740 = vmatprep.subr.bf16.mxu1 %v11103_v42  ;;  %v11147_v8 = vld [vmem:[%s12744_s8 + $0x2e8] sm:$0xff]  }
 0x4db   : > { %v11148_v42 = vld [vmem:[%s12744_s8 + $0x228] sm:$0xff]  }
 0x4dc   : > { %10719 = vmatpush3.bf16.msra.mxu0 %v11104_v44  ;;  %v11149_v44 = vld [vmem:[%s12744_s8 + $0x2a8] sm:$0xff]  }
 0x4dd   : > { %10741 = vmatpush3.bf16.msra.mxu1 %v11105_v45  ;;  %10720 = vmatprep.subr.bf16.mxu0 %v11106_v46  ;;  %v11150_v45 = vld [vmem:[%s12744_s8 + $0x270] sm:$0xff]  }
 0x4de   : > { %10742 = vmatprep.subr.bf16.mxu1 %v11107_v47  ;;  %v11151_v46 = vld [vmem:[%s12744_s8 + $0x2f0] sm:$0xff]  }
 0x4df   : > { %v11152_v47 = vld [vmem:[%s12744_s8 + $0x230] sm:$0xff]  }
 0x4e0   : > { %10721 = vmatpush3.bf16.msra.mxu0 %v11108_v34  ;;  %v11153_v34 = vld [vmem:[%s12744_s8 + $0x2b0] sm:$0xff]  }
 0x4e1   : > { %10743 = vmatpush3.bf16.msra.mxu1 %v11109_v48  ;;  %10722 = vmatprep.subr.bf16.mxu0 %v11110_v50  ;;  %v11154_v48 = vld [vmem:[%s12744_s8 + $0x278] sm:$0xff]  }
 0x4e2   : > { %10744 = vmatprep.subr.bf16.mxu1 %v11111_v12  ;;  %v11155_v50 = vld [vmem:[%s12744_s8 + $0x2f8] sm:$0xff]  }
 0x4e3   : > { %v11156_v12 = vld [vmem:[%s12744_s8 + $0x238] sm:$0xff]  }
 0x4e4   : > { %10723 = vmatpush3.bf16.msra.mxu0 %v11112_v51  ;;  %v7965_v51 = vmax.f32 %v12852_v49, 0.0  ;;  %v11162_v49 = vld [vmem:[%s12744_s8 + $0x348] sm:$0xff]  }
 0x4e5   : > { %10745 = vmatpush3.bf16.msra.mxu1 %v11113_v57  ;;  %10724 = vmatprep.subr.bf16.mxu0 %v11114_v60  ;;  %v11157_v57 = vld [vmem:[%s12744_s8 + $0x2b8] sm:$0xff]   ;;  %v11158_v60 = vld [vmem:[%s12744_s8 + $0x340] sm:$0xff]  }
 0x4e6   : > { %10746 = vmatprep.subr.bf16.mxu1 %v11115_v0  ;;  %v7967_v0 = vmax.f32 %v12854_v52, 0.0  ;;  %v11164_v52 = vld [vmem:[%s12744_s8 + $0x308] sm:$0xff]  }
 0x4e8   : > { %10725 = vmatpush3.bf16.msra.mxu0 %v11116_v35  ;;  %v11159_v35 = vld [vmem:[%s12744_s8 + $0x3c0] sm:$0xff]   ;;  %v8246_v10 = vpack.c.bf16 %v7967_v0, %v7967_v0 }
 0x4e9   : > { %10747 = vmatpush3.bf16.msra.mxu1 %v11117_v1  ;;  %10726 = vmatprep.subr.bf16.mxu0 %v11118_v3  ;;  %v8244_v1 = vpack.c.bf16 %v7965_v51, %v7965_v51  ;;  %v11161_v3 = vld [vmem:[%s12744_s8 + $0x380] sm:$0xff]  }
 0x4ea   : > { %10748 = vmatprep.subr.bf16.mxu1 %v11119_v13  ;;  %v11163_v13 = vld [vmem:[%s12744_s8 + $0x3c8] sm:$0xff]  }
 0x4ec   : > { %10727 = vmatpush3.bf16.msra.mxu0 %v11120_v14  ;;  %v11165_v14 = vld [vmem:[%s12744_s8 + $0x388] sm:$0xff]  }
 0x4ed   : > { %10749 = vmatpush3.bf16.msra.mxu1 %v11121_v15  ;;  %10728 = vmatprep.subr.bf16.mxu0 %v11122_v63  ;;  %v11167_v15 = vld [vmem:[%s12744_s8 + $0x3d0] sm:$0xff]  }
 0x4ee   : > { %10750 = vmatprep.subr.bf16.mxu1 %v11123_v24  ;;  %v11168_v63 = vld [vmem:[%s12744_s8 + $0x310] sm:$0xff]   ;;  %v11170_v24 = vld [vmem:[%s12744_s8 + $0x358] sm:$0xff]  }
 0x4f0   : > { %10729 = vmatpush3.bf16.msra.mxu0 %v11124_v56  ;;  %v11171_v56 = vld [vmem:[%s12744_s8 + $0x3d8] sm:$0xff]  }
 0x4f1   : > { %10751 = vmatpush3.bf16.msra.mxu1 %v11125_v21  ;;  %10758 = vmatprep.subr.bf16.mxu0 %v11126_v59  ;;  %v11173_v21 = vld [vmem:[%s12744_s8 + $0x398] sm:$0xff]   ;;  %v11174_v59 = vld [vmem:[%s12744_s8 + $0x360] sm:$0xff]  }
 0x4f2   : > { %10780 = vmatprep.subr.bf16.mxu1 %v11127_v22  ;;  %v11176_v22 = vld [vmem:[%s12744_s8 + $0x320] sm:$0xff]  }
 0x4f3   : > { %9133 = vmatmul.mubr.bf16.vlgmr.msra.gmra.mrb[20].mxu0 %v8240_v31  ;;  %v11180_v31 = vld [vmem:[%s12744_s8 + $0x328] sm:$0xff]  }
 0x4f4   : > { %9173 = vmatmul.mubr.bf16.vlgmr.msra.gmra.mrb[20].mxu1 %v8242_v28  ;;  %10759 = vmatpush3.bf16.msra.mxu0 %v11128_v26  ;;  %v11179_v26 = vld [vmem:[%s12744_s8 + $0x3e8] sm:$0xff]   ;;  %v11182_v28 = vld [vmem:[%s12744_s8 + $0x370] sm:$0xff]  }
 0x4f5   : > { %9212 = vmatprep.mubr.bf16.mxu0 %v8245_v62  ;;  %10781 = vmatpush3.bf16.msra.mxu1 %v11129_v27  ;;  %v11181_v27 = vld [vmem:[%s12744_s8 + $0x3a8] sm:$0xff]   ;;  %v11184_v62 = vld [vmem:[%s12744_s8 + $0x330] sm:$0xff]  }
 0x4f6   : > { %9252 = vmatprep.mubr.bf16.mxu1 %v8247_v54  ;;  %10760 = vmatprep.subr.bf16.mxu0 %v11130_v29  ;;  %v11183_v29 = vld [vmem:[%s12744_s8 + $0x3f0] sm:$0xff]   ;;  %v11186_v54 = vld [vmem:[%s12744_s8 + $0x378] sm:$0xff]  }
 0x4f7   : > { %10782 = vmatprep.subr.bf16.mxu1 %v11131_v30  ;;  %v11185_v30 = vld [vmem:[%s12744_s8 + $0x3b0] sm:$0xff]  }
 0x4f8   : > { %10761 = vmatpush3.bf16.msra.mxu0 %v11132_v58  ;;  %v11187_v58 = vld [vmem:[%s12744_s8 + $0x3f8] sm:$0xff]  }
 0x4f9   : > { %10783 = vmatpush3.bf16.msra.mxu1 %v11133_v32  ;;  %10762 = vmatprep.subr.bf16.mxu0 %v11134_v4  ;;  %v11188_v32 = vld [vmem:[%s12744_s8 + $0x338] sm:$0xff]  }
 0x4fa   : > { %10784 = vmatprep.subr.bf16.mxu1 %v11135_v33  ;;  %v11189_v4 = vld [vmem:[%s12744_s8 + $0x3b8] sm:$0xff]   ;;  %v11190_v33 = vld [vmem:[%s11715_s12 + $0x8] sm:$0xff]  ;;  %s11339_s12 = sshll.u32 %s11437_s6, 4  ;;  %s11340_s12 = int_to_ptr.vmem [resolvable:$false] %s11339_s12 }
 0x4fb   : > { %s11341_s24 = scalar_lea.vmem %s11340_s12, 64  ;;  %p11342_p12 = scmp.lt.s32.totalorder %s13087_s14, %s11340_s12 }
 0x4fc   : > { %10763 = vmatpush3.bf16.msra.mxu0 %v11136_v5  ;;  %v1438_v5 = vrot.slane %v11190_v33, %v1405_v55  ;;  %p11343_p2 = scmp.lt.s32.totalorder %s11341_s24, %s11335_s16 }
 0x4fd   : > { %10785 = vmatpush3.bf16.msra.mxu1 %v11137_v17  ;;  %10764 = vmatprep.subr.bf16.mxu0 %v11138_v37  ;;  %v1446_v17 = vrot.slane %v11190_v33, %v1413_v61  ;;  %v1442_v37 = vrot.slane %v11190_v33, %v1409_v6 }
 0x4fe   : > { %10786 = vmatprep.subr.bf16.mxu1 %v11139_v20  ;;  %v1450_v20 = vrot.slane %v11190_v33, %v1417_v7  ;;  %p11344_p10 = por %p11343_p2, %p11342_p12 }
 0x500   : > { %10765 = vmatpush3.bf16.msra.mxu0 %v11140_v9  ;;  %p11345_p1 = pnand %p11344_p10, %p11338_p4 }
 0x501   : > { %10787 = vmatpush3.bf16.msra.mxu1 %v11141_v40  ;;  %10766 = vmatprep.subr.bf16.mxu0 %v11142_v38 }
 0x502   : > { %10788 = vmatprep.subr.bf16.mxu1 %v11143_v36 }
 0x504   : > { %10767 = vmatpush3.bf16.msra.mxu0 %v11144_v39 }
 0x505   : > { %10789 = vmatpush3.bf16.msra.mxu1 %v11145_v41  ;;  %10768 = vmatprep.subr.bf16.mxu0 %v11146_v53 }
 0x506   : > { %10790 = vmatprep.subr.bf16.mxu1 %v11147_v8 }
 0x508   : > { %10769 = vmatpush3.bf16.msra.mxu0 %v11148_v42 }
 0x509   : > { %10791 = vmatpush3.bf16.msra.mxu1 %v11149_v44  ;;  %10770 = vmatprep.subr.bf16.mxu0 %v11150_v45 }
 0x50a   : > { %10792 = vmatprep.subr.bf16.mxu1 %v11151_v46 }
 0x50c   : > { %10771 = vmatpush3.bf16.msra.mxu0 %v11152_v47 }
 0x50d   : > { %10793 = vmatpush3.bf16.msra.mxu1 %v11153_v34  ;;  %10772 = vmatprep.subr.bf16.mxu0 %v11154_v48 }
 0x50e   : > { %10794 = vmatprep.subr.bf16.mxu1 %v11155_v50 }
 0x510   : > { %10773 = vmatpush3.bf16.msra.mxu0 %v11156_v12 }
 0x511   : > { %10795 = vmatpush3.bf16.msra.mxu1 %v11157_v57  ;;  %10802 = vmatprep.subr.bf16.mxu0 %v11158_v60 }
 0x512   : > { %10824 = vmatprep.subr.bf16.mxu1 %v11159_v35 }
 0x513   : > { %9213 = vmatmul.mubr.bf16.vlgmr.msra.gmra.mrb[24].mxu0 %v8244_v1 }
 0x514   : > { %9253 = vmatmul.mubr.bf16.vlgmr.msra.gmra.mrb[24].mxu1 %v8246_v10  ;;  %10803 = vmatpush3.bf16.msra.mxu0 %v11160_v25 }
 0x515   : > { %10825 = vmatpush3.bf16.msra.mxu1 %v11161_v3  ;;  %10804 = vmatprep.subr.bf16.mxu0 %v11162_v49 }
 0x516   : > { %10826 = vmatprep.subr.bf16.mxu1 %v11163_v13 }
 0x518   : > { %10805 = vmatpush3.bf16.msra.mxu0 %v11164_v52 }
 0x519   : > { %10827 = vmatpush3.bf16.msra.mxu1 %v11165_v14  ;;  %10806 = vmatprep.subr.bf16.mxu0 %v11166_v2 }
 0x51a   : > { %10828 = vmatprep.subr.bf16.mxu1 %v11167_v15 }
 0x51c   : > { %10807 = vmatpush3.bf16.msra.mxu0 %v11168_v63 }
 0x51d   : > { %10829 = vmatpush3.bf16.msra.mxu1 %v11169_v18  ;;  %10808 = vmatprep.subr.bf16.mxu0 %v11170_v24 }
 0x51e   : > { %10830 = vmatprep.subr.bf16.mxu1 %v11171_v56 }
 0x520   : > { %10809 = vmatpush3.bf16.msra.mxu0 %v11172_v19 }
 0x521   : > { %10831 = vmatpush3.bf16.msra.mxu1 %v11173_v21  ;;  %10810 = vmatprep.subr.bf16.mxu0 %v11174_v59  ;;  %v9509_v59 = vld [vmem:[#allocation10] ss:$0 sm:$0xff] }
 0x522   : > { %10832 = vmatprep.subr.bf16.mxu1 %v11175_v11  ;;  %v355_v11 = vstv %s347_s18 }
 0x524   : > { %10811 = vmatpush3.bf16.msra.mxu0 %v11176_v22  ;;  %v356_v22 = vmul.f32 %v9509_v59, %v355_v11 }
 0x525   : > { %10833 = vmatpush3.bf16.msra.mxu1 %v11177_v23  ;;  %10812 = vmatprep.subr.bf16.mxu0 %v11178_v16 }
 0x526   : > { %10834 = vmatprep.subr.bf16.mxu1 %v11179_v26  ;;  %357 = vst [vmem:[%s13076_s30] sm:$0x3] %v356_v22 }
 0x528   : > { %10813 = vmatpush3.bf16.msra.mxu0 %v11180_v31 }
 0x529   : > { %10835 = vmatpush3.bf16.msra.mxu1 %v11181_v27  ;;  %10814 = vmatprep.subr.bf16.mxu0 %v11182_v28 }
 0x52a   : > { %10836 = vmatprep.subr.bf16.mxu1 %v11183_v29 }
 0x52c   : > { %10815 = vmatpush3.bf16.msra.mxu0 %v11184_v62 }
 0x52d   : > { %10837 = vmatpush3.bf16.msra.mxu1 %v11185_v30  ;;  %10816 = vmatprep.subr.bf16.mxu0 %v11186_v54 }
 0x52e   : > { %10838 = vmatprep.subr.bf16.mxu1 %v11187_v58 }
 0x530   : > { %10817 = vmatpush3.bf16.msra.mxu0 %v11188_v32 }
 0x531   : > { %10839 = vmatpush3.bf16.msra.mxu1 %v11189_v4 }
 0x586   : > { %v7786_v9 = vpop.f32.mrb[12].mxu0  ;;  %v7950_v38 = vpop.f32.mrb[12].mxu1 }
 0x587   : > { %v10858_v40 = vadd.f32 %v7786_v9, %v1438_v5  ;;  %v7788_v36 = vpop.f32.mrb[13].mxu0  ;;  %v10860_v39 = vadd.f32 %v7950_v38, %v1446_v17  ;;  %v7952_v53 = vpop.f32.mrb[13].mxu1 }
 0x588   : > { %v10859_v41 = vadd.f32 %v7788_v36, %v1442_v37  ;;  %v7790_v8 = vpop.f32.mrb[14].mxu0  ;;  %v10861_v44 = vadd.f32 %v7952_v53, %v1450_v20  ;;  %v7954_v55 = vpop.f32.mrb[14].mxu1 }
 0x589   : > { %v7969_v42 = vmax.f32 %v10858_v40, 0.0  ;;  %v7791_v45 = vpop.f32.mrb[15].mxu0  ;;  %v7971_v46 = vmax.f32 %v10860_v39, 0.0  ;;  %v7955_v47 = vpop.f32.mrb[15].mxu1 }
 0x58a   : > { %v7970_v61 = vmax.f32 %v10859_v41, 0.0  ;;  %v7972_v34 = vmax.f32 %v10861_v44, 0.0  ;;  %v8235_v41 = vld [vmem:[%s13076_s30] sm:$0x3] }
 0x58b   : > { %v8248_v48 = vpack.c.bf16 %v7969_v42, %v7969_v42  ;;  %v8250_v7 = vpack.c.bf16 %v7971_v46, %v7971_v46 }
 0x58c   : > { %v8249_v6 = vpack.c.bf16 %v7970_v61, %v7970_v61  ;;  %v8251_v43 = vpack.c.bf16 %v7972_v34, %v7972_v34 }
 0x58e   : > { %9292 = vmatprep.mubr.bf16.mxu0 %v8249_v6  ;;  %9332 = vmatprep.mubr.bf16.mxu1 %v8251_v43 }
 0x58f   : > { %9293 = vmatmul.mubr.bf16.vlgmr.msra.gmra.mrb[28].mxu0 %v8248_v48  ;;  %9333 = vmatmul.mubr.bf16.vlgmr.msra.gmra.mrb[28].mxu1 %v8250_v7 }
 0x5a6   : > { %v10686_v50 = vpop.f32.mrb[16].mxu0 }
 0x5a7   : > { %v10708_v12 = vpop.f32.mrb[16].mxu1  ;;  %v10687_v51 = vpop.f32.mrb[17].mxu0 }
 0x5a8   : > { %v10688_v57 = vadd.f32 %v10687_v51, %v10686_v50  ;;  %v10709_v60 = vpop.f32.mrb[17].mxu1  ;;  %v10689_v0 = vpop.f32.mrb[18].mxu0 }
 0x5a9   : > { %v10710_v35 = vadd.f32 %v10709_v60, %v10708_v12  ;;  %v10711_v25 = vpop.f32.mrb[18].mxu1  ;;  %v10690_v1 = vpop.f32.mrb[19].mxu0 }
 0x5aa   : > { %v10712_v3 = vpop.f32.mrb[19].mxu1 }
 0x5ab   : > { %v9095_v49 = vadd.f32 %v10710_v35, %v10688_v57 }
 0x5c6   : > { %v10730_v10 = vpop.f32.mrb[20].mxu0 }
 0x5c7   : > { %v10752_v13 = vpop.f32.mrb[20].mxu1  ;;  %v10731_v52 = vpop.f32.mrb[21].mxu0 }
 0x5c8   : > { %v10732_v14 = vadd.f32 %v10731_v52, %v10730_v10  ;;  %v10753_v2 = vpop.f32.mrb[21].mxu1  ;;  %v10733_v15 = vpop.f32.mrb[22].mxu0 }
 0x5c9   : > { %v10754_v63 = vadd.f32 %v10753_v2, %v10752_v13  ;;  %v10755_v18 = vpop.f32.mrb[22].mxu1  ;;  %v10734_v24 = vpop.f32.mrb[23].mxu0 }
 0x5ca   : > { %v9135_v56 = vadd.f32 %v10732_v14, %v9095_v49  ;;  %v10756_v19 = vpop.f32.mrb[23].mxu1 }
 0x5cc   : > { %v9175_v21 = vadd.f32 %v10754_v63, %v9135_v56 }
 0x5e6   : > { %v10774_v23 = vpop.f32.mrb[24].mxu0 }
 0x5e7   : > { %v10796_v16 = vpop.f32.mrb[24].mxu1  ;;  %v10775_v26 = vpop.f32.mrb[25].mxu0 }
 0x5e8   : > { %v10776_v31 = vadd.f32 %v10775_v26, %v10774_v23  ;;  %v10797_v27 = vpop.f32.mrb[25].mxu1  ;;  %v10777_v28 = vpop.f32.mrb[26].mxu0 }
 0x5e9   : > { %v10798_v29 = vadd.f32 %v10797_v27, %v10796_v16  ;;  %v10799_v62 = vpop.f32.mrb[26].mxu1  ;;  %v10778_v30 = vpop.f32.mrb[27].mxu0 }
 0x5ea   : > { %v9215_v54 = vadd.f32 %v10776_v31, %v9175_v21  ;;  %v10800_v58 = vpop.f32.mrb[27].mxu1 }
 0x5ec   : > { %v9255_v32 = vadd.f32 %v10798_v29, %v9215_v54 }
 0x662   : > { %v10818_v4 = vpop.f32.mrb[28].mxu0  ;;  %v10840_v33 = vpop.f32.mrb[28].mxu1 }
 0x663   : > { %v10819_v5 = vpop.f32.mrb[29].mxu0  ;;  %v10841_v37 = vpop.f32.mrb[29].mxu1 }
 0x664   : > { %v10820_v17 = vadd.f32 %v10819_v5, %v10818_v4  ;;  %v10821_v20 = vpop.f32.mrb[30].mxu0  ;;  %v10842_v9 = vadd.f32 %v10841_v37, %v10840_v33  ;;  %v10843_v40 = vpop.f32.mrb[30].mxu1 }
 0x665   : > { %v10822_v38 = vpop.f32.mrb[31].mxu0  ;;  %v10844_v39 = vpop.f32.mrb[31].mxu1 }
 0x666   : > { %v9295_v36 = vadd.f32 %v10820_v17, %v9255_v32 }
 0x668   : > { %v9335_v53 = vadd.f32 %v10842_v9, %v9295_v36 }
 0x66a   : > { %v9340_v8 = vadd.f32 %v9335_v53, %v8235_v41 }
 0x66c   : > { %9341 = vst [vmem:[%s13076_s30] sm:$0x3] %v9340_v8 }
 0x66d   : > { %11348 = shalt.err (!%p11345_p1)
}
 0x66e   : > { %s11349_s29 = scalar_lea.hbm %s13085_s25, 32  ;;  %s11353_s27 = scalar_lea.hbm %s13187_s17, 64 }
 0x66f   : > { %p11350_p5 = scmp.ne.s32.totalorder %s13085_s25, %s11349_s29  ;;  %p11354_p7 = scmp.lt.u32.totalorder %s13085_s25, %s13187_s17 }
 0x670   : > { %p11355_p9 = scmp.lt.u32.totalorder %s11353_s27, %s11349_s29  ;;  %p11357_p6 = scmp.lt.u32.totalorder %s11349_s29, %s13085_s25 }
 0x671   : > { %p11351_p3 = pnand %p11350_p5, %p13188_p13 }
 0x672   : > { %p11356_p0 = por %p11355_p9, %p11354_p7 }
 0x673   : > { %p11352_p8 = pneg %p11351_p3 }
 0x674   : > { %p11358_p11 = por %p11357_p6, %p11356_p0 }
 0x676   : > { %p11359_p4 = pnand %p11358_p11, %p11352_p8 }
 0x678   : > { %11362 = shalt.err (!%p11359_p4)
}
 0x679   : > { %10974 = dma.vmem_to_hbm [thread:$0]  (%p13188_p13), %s13087_s14, 32, %s13085_s25, %s9343_s10  }
 0x67a PF: > { %s13189_s18 = sld [smem:[#allocation16_spill]]  ;;  %s13190_s5 = sld [smem:[#allocation19_spill]] }
 0x67b   : > { %p13192_p2 = scmp.ge.s32.totalorder %s11425_s23, 2 }
 0x680   : > { %s9368_s30 = sand.u32 1, %s13189_s18   ;;  %p13191_p12 = scmp.ne.s32.totalorder %s13190_s5, 0 }
 0x681   : > { %s9369_s26 = scalar_lea.sflag [#allocation4], %s9368_s30 }
 0x682   : > { %p10994_p10 = pnand %p13192_p2, %p13191_p12 }
 0x684   : > { %11400 = dma.done.wait (!%p10994_p10), %s9369_s26, 32  }
 0x685   : > { %11402 = vsyncadd (!%p10994_p10), %s9369_s26, 4294967264  ;;  %s23_s23 = sadd.s32 1, %s11425_s23   ;;  %s13193_s18 = smov %s11409_s19 }
 0x686   : > { %p20_p1 = scmp.ge.s32.totalorder %s23_s23, 4   ;;  %s13194_s19 = smov %s11413_s20 }
 0x687   : > { %s13195_s20 = smov %s11602_s21  ;;  %s13196_s21 = smov %s11421_s22 }
 0x688   : > { %s13197_s22 = smov %s13199_s11  ;;  %22 = sbr.rel (!%p20_p1) target bundleno = 11 (0xb), region = 114 }
 0x68f   :  { %9374 = vsyncpa [#allocation3], 1 }
 0x690   :  { %9376 = vsyncpa [#allocation3 + $0x1], 1 }
 0x691   :  { %9377 = vsyncpa [#allocation6], 1 }
 0x692   :  { %9379 = vsyncpa [#allocation6 + $0x1], 1 }
 0x693   :  { %9380 = vsyncpa [#allocation9], 1 }
 0x694   :  { %9381 = vsyncpa [#allocation4], 1 }
 0x695   :  { %9383 = vsyncpa [#allocation4 + $0x1], 1 }

</bundles_post_ra>
